<compile_context>
chip_gen: v7x
topology: tpu7x:2x2x1
jax: 0.10.0
libtpu: 0.0.40
codegen_flags: <defaults>
</compile_context>

<pallas_src>
import functools

import jax
import jax.numpy as jnp
import numpy as np
from jax.experimental import pallas as pl
from jax.experimental.pallas import tpu as pltpu


def _round_up(n, m):
  return ((n + m - 1) // m) * m


# ----------------------------------------------------------------------------
# Pallas kernel: full fused forward (encoder / LSTM / attention / MLPs)
# ----------------------------------------------------------------------------
def _consciousness_kernel(
    # inputs
    x_ref, h0_ref, c0_ref,
    w_enc_ref, b_enc_ref,
    w_lstm_ref, b_lstm_ref,
    w_qkv_ref, b_qkv_ref, w_out_ref, b_out_ref,
    w_r1_ref, b_r1_ref, w_r2_ref, b_r2_ref,
    w_rm_ref, b_rm_ref,
    w_d1_ref, b_d1_ref, w_d2_ref, b_d2_ref,
    # outputs
    out_ref, hN_ref, cN_ref, metrics_ref,
    *, hidden_size, n_layers, n_heads):
  H = hidden_size
  nh = n_heads
  hd = H // nh
  f32 = jnp.float32
  bf16 = jnp.bfloat16
  B = x_ref.shape[0]

  # 2-D matmul on the MXU: bf16 operands (weights already bf16), f32 accum.
  def mm(a, b):
    return jnp.dot(a.astype(bf16), b, preferred_element_type=f32)

  x = x_ref[...]                                                # (B, D) f32

  # ---- encoder: Linear(D, H) + ReLU (+ Dropout == identity) ----
  enc = jnp.maximum(mm(x, w_enc_ref[...]) + b_enc_ref[...], 0.0)  # (B, H) f32

  # ---- LSTM, n_layers, seq_len == 1, one fused K=2H matmul per layer ----
  layer_in = enc
  for l in range(n_layers):
    h_prev = h0_ref[l]                                          # (B, H)
    c_prev = c0_ref[l]                                          # (B, H)
    xh = jnp.concatenate([layer_in, h_prev], axis=-1)           # (B, 2H) f32
    gates = mm(xh, w_lstm_ref[l]) + b_lstm_ref[l]               # (B, 4H) f32
    i_g = jax.nn.sigmoid(gates[:, 0 * H:1 * H])
    f_g = jax.nn.sigmoid(gates[:, 1 * H:2 * H])
    g_g = jnp.tanh(gates[:, 2 * H:3 * H])
    o_g = jax.nn.sigmoid(gates[:, 3 * H:4 * H])
    c_new = f_g * c_prev + i_g * g_g
    h_new = o_g * jnp.tanh(c_new)
    hN_ref[l] = h_new
    cN_ref[l] = c_new
    layer_in = h_new
  mem_out = layer_in                                            # (B, H)

  # ---- MultiheadAttention over the batch axis (seq=B, batch=1) ----
  scale = 1.0 / float(np.sqrt(hd))
  qkv = mm(mem_out, w_qkv_ref[...]) + b_qkv_ref[...]            # (B, 3H) f32

  def split_heads(a2d):  # (B, H) -> (nh, B, hd): static lane slices + stack
    return jnp.stack([a2d[:, h * hd:(h + 1) * hd] for h in range(nh)], axis=0)

  q = split_heads(qkv[:, 0:H]) * scale                          # (nh, B, hd)
  k = split_heads(qkv[:, H:2 * H])
  v = split_heads(qkv[:, 2 * H:3 * H])
  # scores[h, i, j] = <q[h,i], k[h,j]>  (heads batched, contract feature axis)
  s = jax.lax.dot_general(q.astype(bf16), k.astype(bf16),
                          (((2,), (2,)), ((0,), (0,))),
                          preferred_element_type=f32)           # (nh, B, B)
  s = s - jnp.max(s, axis=-1, keepdims=True)
  p = jnp.exp(s)
  p = p * pl.reciprocal(jnp.sum(p, axis=-1, keepdims=True), approx=True)
  head_out = jax.lax.dot_general(p.astype(bf16), v.astype(bf16),
                                 (((2,), (1,)), ((0,), (0,))),
                                 preferred_element_type=f32)    # (nh, B, hd)
  # lane-concat heads -> (B, H), single K=H out-projection
  concat_heads = jnp.concatenate([head_out[h] for h in range(nh)], axis=-1)
  attended = mm(concat_heads, w_out_ref[...]) + b_out_ref[...]  # (B, H)

  # ---- SelfReflectionModule: single K=2H matmul on the lane-concat input ----
  ar = jnp.concatenate([attended, mem_out], axis=-1)            # (B, 2H)
  r1 = jnp.maximum(mm(ar, w_r1_ref[...]) + b_r1_ref[...], 0.0)  # (B, H)
  reflection = mm(r1, w_r2_ref[...]) + b_r2_ref[...]            # (B, H)
  # awareness metrics head pre-folded through the reflection layer (from r1),
  # lane-padded 4 -> 128 columns; mean over batch.
  metrics = jax.nn.sigmoid(mm(r1, w_rm_ref[...]) + b_rm_ref[...])
  metrics_ref[...] = jnp.mean(metrics, axis=0, keepdims=True)   # (1, 128)

  # ---- decoder on cat([attended, reflection]) (lane-padded D columns) ----
  ad = jnp.concatenate([attended, reflection], axis=-1)         # (B, 2H)
  d1 = jnp.maximum(mm(ad, w_d1_ref[...]) + b_d1_ref[...], 0.0)  # (B, H)
  out_ref[...] = mm(d1, w_d2_ref[...]) + b_d2_ref[...]          # (B, Dp)


# ----------------------------------------------------------------------------
# Wrapper (jitted; returns the metrics as a (4,) device array, no host syncs)
# ----------------------------------------------------------------------------
@functools.partial(jax.jit, static_argnames=("hidden_size", "n_layers",
                                             "n_heads"))
def consciousness_forward(x, params, h0, c0, *, hidden_size, n_layers,
                          n_heads=4):
  B, D = x.shape
  H, L = hidden_size, n_layers
  Dp = _round_up(D, 128)
  Mp = 128
  p = params

  inputs = (x, h0, c0,
            p['w_enc'], p['b_enc'],
            p['w_lstm'], p['b_lstm'],
            p['w_qkv'], p['b_qkv'], p['w_out'], p['b_out'],
            p['w_r1'], p['b_r1'], p['w_r2'], p['b_r2'],
            p['w_rm'], p['b_rm'],
            p['w_d1'], p['b_d1'], p['w_d2'], p['b_d2'])

  kernel = functools.partial(_consciousness_kernel, hidden_size=H,
                             n_layers=L, n_heads=n_heads)
  vmem = pl.BlockSpec(memory_space=pltpu.MemorySpace.VMEM)
  out_shape = (jax.ShapeDtypeStruct((B, Dp), jnp.float32),     # padded decoder
               jax.ShapeDtypeStruct((L, B, H), jnp.float32),   # h_n
               jax.ShapeDtypeStruct((L, B, H), jnp.float32),   # c_n
               jax.ShapeDtypeStruct((1, Mp), jnp.float32))     # padded metrics

  out_pad, hN, cN, metrics_pad = pl.pallas_call(
      kernel,
      out_shape=out_shape,
      in_specs=[vmem] * len(inputs),
      out_specs=(vmem, vmem, vmem, vmem),
      compiler_params=pltpu.CompilerParams(
          vmem_limit_bytes=32 * 1024 * 1024),
  )(*inputs)

  out = out_pad[:, :D]
  metrics = metrics_pad[0, :4]
  return out, (hN, cN), metrics


# ----------------------------------------------------------------------------
# Deterministic parameter init (PyTorch-style uniform bounds, fused layouts).
# Matmul weights are stored in bf16 once here (no per-call convert traffic);
# biases stay f32.
# ----------------------------------------------------------------------------
def init_params(key, input_size, hidden_size, n_layers, n_heads=4):
  D, H, L = input_size, hidden_size, n_layers
  Dp = _round_up(D, 128)
  bf16 = jnp.bfloat16
  ks = jax.random.split(key, 24)

  def u(k, shape, fan_in):
    bound = 1.0 / np.sqrt(fan_in)
    return jax.random.uniform(k, shape, jnp.float32, -bound, bound)

  p = {}
  p['w_enc'] = u(ks[0], (D, H), D).astype(bf16)
  p['b_enc'] = u(ks[1], (1, H), D)

  # LSTM: fused [x | h] weight (2H, 4H) per layer, gate order i, f, g, o.
  w_ih = u(ks[2], (L, H, 4 * H), H)
  w_hh = u(ks[3], (L, H, 4 * H), H)
  b_ih = u(ks[4], (L, 1, 4 * H), H)
  b_hh = u(ks[5], (L, 1, 4 * H), H)
  p['w_lstm'] = jnp.concatenate([w_ih, w_hh], axis=1).astype(bf16)  # (L,2H,4H)
  p['b_lstm'] = b_ih + b_hh                                         # (L,1,4H)

  # MHA in-proj fused: (H, 3H) columns = [Q | K | V], heads contiguous.
  p['w_qkv'] = u(ks[6], (H, 3 * H), H).astype(bf16)
  p['b_qkv'] = jnp.zeros((1, 3 * H), jnp.float32)
  # MHA out-proj fused: (H, H).
  p['w_out'] = u(ks[7], (H, H), H).astype(bf16)
  p['b_out'] = jnp.zeros((1, H), jnp.float32)

  # SelfReflection layer 1 fused over [attended | mem_out]: (2H, H).
  p['w_r1'] = u(ks[8], (2 * H, H), 2 * H).astype(bf16)
  p['b_r1'] = u(ks[9], (1, H), 2 * H)
  w_r2 = u(ks[10], (H, H), H)
  b_r2 = u(ks[11], (1, H), H)
  p['w_r2'] = w_r2.astype(bf16)
  p['b_r2'] = b_r2
  # Awareness metrics head folded through the reflection layer at init,
  # lane-padded 4 -> 128 columns (zero pad).
  w_m = u(ks[12], (H, 4), H)
  b_m = u(ks[13], (1, 4), H)
  p['w_rm'] = jnp.pad(w_r2 @ w_m, ((0, 0), (0, 128 - 4))).astype(bf16)
  p['b_rm'] = jnp.pad(b_r2 @ w_m + b_m, ((0, 0), (0, 128 - 4)))
  # Raw (un-folded) copies for the pure-JAX reference only.
  p['w_m_raw'] = w_m
  p['b_m_raw'] = b_m

  # decoder layer 1 fused over [attended | reflection]: (2H, H).
  p['w_d1'] = u(ks[14], (2 * H, H), 2 * H).astype(bf16)
  p['b_d1'] = u(ks[15], (1, H), 2 * H)
  # decoder layer 2, lane-padded D -> Dp columns (zero pad).
  w_d2 = u(ks[16], (H, D), H)
  b_d2 = u(ks[17], (1, D), H)
  p['w_d2'] = jnp.pad(w_d2, ((0, 0), (0, Dp - D))).astype(bf16)
  p['b_d2'] = jnp.pad(b_d2, ((0, 0), (0, Dp - D)))
  return p


# ----------------------------------------------------------------------------
# Pure-JAX reference (PyTorch structure, mirrors the kernel's bf16 matmuls;
# metrics use the un-folded two-stage path).
# ----------------------------------------------------------------------------
def reference_forward(x, p, h0, c0, *, hidden_size, n_layers, n_heads=4):
  H, nh = hidden_size, n_heads
  hd = H // nh
  B, D = x.shape
  bf16, f32 = jnp.bfloat16, jnp.float32

  def mm(a, b):
    return jnp.dot(a.astype(bf16), b.astype(bf16), preferred_element_type=f32)

  enc = jnp.maximum(mm(x, p['w_enc']) + p['b_enc'], 0.0)
  layer_in = enc
  hs, cs = [], []
  for l in range(n_layers):
    gates = (mm(layer_in, p['w_lstm'][l, :H]) + mm(h0[l], p['w_lstm'][l, H:])
             + p['b_lstm'][l])
    i_g = jax.nn.sigmoid(gates[:, 0:H])
    f_g = jax.nn.sigmoid(gates[:, H:2 * H])
    g_g = jnp.tanh(gates[:, 2 * H:3 * H])
    o_g = jax.nn.sigmoid(gates[:, 3 * H:4 * H])
    c_new = f_g * c0[l] + i_g * g_g
    h_new = o_g * jnp.tanh(c_new)
    hs.append(h_new)
    cs.append(c_new)
    layer_in = h_new
  mem_out = layer_in

  qkv = mm(mem_out, p['w_qkv']) + p['b_qkv']
  heads = []
  for h in range(nh):
    qh = qkv[:, h * hd:(h + 1) * hd] / np.sqrt(hd)
    kh = qkv[:, H + h * hd:H + (h + 1) * hd]
    vh = qkv[:, 2 * H + h * hd:2 * H + (h + 1) * hd]
    s = mm(qh, kh.T)                       # (B, B): attention across batch
    heads.append(mm(jax.nn.softmax(s, axis=-1), vh))
  attended = mm(jnp.concatenate(heads, axis=-1), p['w_out']) + p['b_out']

  r1 = jnp.maximum(mm(jnp.concatenate([attended, mem_out], axis=-1),
                      p['w_r1']) + p['b_r1'], 0.0)
  reflection = mm(r1, p['w_r2']) + p['b_r2']
  metrics = jnp.mean(jax.nn.sigmoid(mm(reflection, p['w_m_raw'])
                                    + p['b_m_raw']), axis=0)[:4]
  d1 = jnp.maximum(mm(jnp.concatenate([attended, reflection], axis=-1),
                      p['w_d1']) + p['b_d1'], 0.0)
  out = (mm(d1, p['w_d2']) + p['b_d2'])[:, :D]
  return out, (jnp.stack(hs), jnp.stack(cs)), metrics


if __name__ == "__main__":
  # PyTorch module defaults: input_size=64, hidden_size=128, n_layers=3, 4 heads.
  INPUT_SIZE, HIDDEN, LAYERS, HEADS = 64, 128, 3, 4
  BATCH = 8

  key = jax.random.PRNGKey(0)
  kx, kp = jax.random.split(key)
  x = jax.random.normal(kx, (BATCH, INPUT_SIZE), jnp.float32)
  params = init_params(kp, INPUT_SIZE, HIDDEN, LAYERS, HEADS)
  # memory_state=None path: zero initial hidden/cell state.
  h0 = jnp.zeros((LAYERS, BATCH, HIDDEN), jnp.float32)
  c0 = jnp.zeros((LAYERS, BATCH, HIDDEN), jnp.float32)

  out, (hN, cN), metrics = consciousness_forward(
      x, params, h0, c0, hidden_size=HIDDEN, n_layers=LAYERS, n_heads=HEADS)
  jax.block_until_ready((out, hN, cN, metrics))

  ref_out, (ref_h, ref_c), ref_m = reference_forward(
      x, params, h0, c0, hidden_size=HIDDEN, n_layers=LAYERS, n_heads=HEADS)
  np.testing.assert_allclose(np.asarray(out), np.asarray(ref_out),
                             rtol=1e-2, atol=1e-2)
  np.testing.assert_allclose(np.asarray(hN), np.asarray(ref_h),
                             rtol=1e-2, atol=1e-2)
  np.testing.assert_allclose(np.asarray(cN), np.asarray(ref_c),
                             rtol=1e-2, atol=1e-2)
  np.testing.assert_allclose(np.asarray(metrics), np.asarray(ref_m),
                             rtol=1e-2, atol=1e-2)

  # Single host transfer for the metrics dict (no per-scalar .item() syncs).
  m = np.asarray(metrics)
  metrics_dict = {'coherence': float(m[0]), 'self_awareness': float(m[1]),
                  'integration': float(m[2]), 'adaptability': float(m[3])}
  assert set(metrics_dict) == {'coherence', 'self_awareness',
                               'integration', 'adaptability'}

  print("KERNEL_OK")
</pallas_src>

<mosaic_0001>
module attributes {stable_mosaic.version = 11 : i64} {
  func.func @_consciousness_kernel(%arg0: memref<8x64xf32, #tpu.memory_space<vmem>>, %arg1: memref<3x8x128xf32, #tpu.memory_space<vmem>>, %arg2: memref<3x8x128xf32, #tpu.memory_space<vmem>>, %arg3: memref<64x128xbf16, #tpu.memory_space<vmem>>, %arg4: memref<1x128xf32, #tpu.memory_space<vmem>>, %arg5: memref<3x256x512xbf16, #tpu.memory_space<vmem>>, %arg6: memref<3x1x512xf32, #tpu.memory_space<vmem>>, %arg7: memref<128x384xbf16, #tpu.memory_space<vmem>>, %arg8: memref<1x384xf32, #tpu.memory_space<vmem>>, %arg9: memref<128x128xbf16, #tpu.memory_space<vmem>>, %arg10: memref<1x128xf32, #tpu.memory_space<vmem>>, %arg11: memref<256x128xbf16, #tpu.memory_space<vmem>>, %arg12: memref<1x128xf32, #tpu.memory_space<vmem>>, %arg13: memref<128x128xbf16, #tpu.memory_space<vmem>>, %arg14: memref<1x128xf32, #tpu.memory_space<vmem>>, %arg15: memref<128x128xbf16, #tpu.memory_space<vmem>>, %arg16: memref<1x128xf32, #tpu.memory_space<vmem>>, %arg17: memref<256x128xbf16, #tpu.memory_space<vmem>>, %arg18: memref<1x128xf32, #tpu.memory_space<vmem>>, %arg19: memref<128x128xbf16, #tpu.memory_space<vmem>>, %arg20: memref<1x128xf32, #tpu.memory_space<vmem>>, %arg21: memref<8x128xf32, #tpu.memory_space<vmem>>, %arg22: memref<3x8x128xf32, #tpu.memory_space<vmem>>, %arg23: memref<3x8x128xf32, #tpu.memory_space<vmem>>, %arg24: memref<1x128xf32, #tpu.memory_space<vmem>>) attributes {dimension_semantics = [], scalar_prefetch = 0 : i64, scratch_operands = 0 : i64, tpu.core_type = #tpu.core_type<tc>} {
    %c0 = arith.constant 0 : index
    %c0_0 = arith.constant 0 : index
    %0 = vector.load %arg0[%c0, %c0_0] : memref<8x64xf32, #tpu.memory_space<vmem>>, vector<8x64xf32>
    %c0_1 = arith.constant 0 : index
    %c0_2 = arith.constant 0 : index
    %1 = vector.load %arg3[%c0_1, %c0_2] : memref<64x128xbf16, #tpu.memory_space<vmem>>, vector<64x128xbf16>
    %2 = arith.truncf %0 : vector<8x64xf32> to vector<8x64xbf16>
    %cst = arith.constant dense<0.000000e+00> : vector<8x128xf32>
    %3 = tpu.matmul %2, %1, %cst {dimension_numbers = #tpu.dot_dimension_numbers<[1], [0], [0], [1], [0, 0, 1, 1], [], []>} : vector<8x64xbf16>, vector<64x128xbf16>, vector<8x128xf32> -> vector<8x128xf32>
    %c0_3 = arith.constant 0 : index
    %c0_4 = arith.constant 0 : index
    %4 = vector.load %arg4[%c0_3, %c0_4] : memref<1x128xf32, #tpu.memory_space<vmem>>, vector<1x128xf32>
    %5 = vector.broadcast %4 : vector<1x128xf32> to vector<8x128xf32>
    %6 = arith.addf %3, %5 : vector<8x128xf32>
    %cst_5 = arith.constant 0.000000e+00 : f32
    %7 = vector.broadcast %cst_5 : f32 to vector<8x128xf32>
    %8 = arith.maximumf %6, %7 : vector<8x128xf32>
    %c0_6 = arith.constant 0 : index
    %c0_7 = arith.constant 0 : index
    %c0_8 = arith.constant 0 : index
    %9 = vector.load %arg1[%c0_6, %c0_7, %c0_8] : memref<3x8x128xf32, #tpu.memory_space<vmem>>, vector<1x8x128xf32>
    %10 = vector.shape_cast %9 : vector<1x8x128xf32> to vector<8x128xf32>
    %c0_9 = arith.constant 0 : index
    %c0_10 = arith.constant 0 : index
    %c0_11 = arith.constant 0 : index
    %11 = vector.load %arg2[%c0_9, %c0_10, %c0_11] : memref<3x8x128xf32, #tpu.memory_space<vmem>>, vector<1x8x128xf32>
    %12 = vector.shape_cast %11 : vector<1x8x128xf32> to vector<8x128xf32>
    %13 = tpu.concatenate %8, %10 in 1 : vector<8x128xf32>, vector<8x128xf32> -> vector<8x256xf32>
    %c0_12 = arith.constant 0 : index
    %c0_13 = arith.constant 0 : index
    %c0_14 = arith.constant 0 : index
    %14 = vector.load %arg5[%c0_12, %c0_13, %c0_14] : memref<3x256x512xbf16, #tpu.memory_space<vmem>>, vector<1x256x512xbf16>
    %15 = vector.shape_cast %14 : vector<1x256x512xbf16> to vector<256x512xbf16>
    %16 = arith.truncf %13 : vector<8x256xf32> to vector<8x256xbf16>
    %cst_15 = arith.constant dense<0.000000e+00> : vector<8x512xf32>
    %17 = tpu.matmul %16, %15, %cst_15 {dimension_numbers = #tpu.dot_dimension_numbers<[1], [0], [0], [1], [0, 0, 1, 1], [], []>} : vector<8x256xbf16>, vector<256x512xbf16>, vector<8x512xf32> -> vector<8x512xf32>
    %c0_16 = arith.constant 0 : index
    %c0_17 = arith.constant 0 : index
    %c0_18 = arith.constant 0 : index
    %18 = vector.load %arg6[%c0_16, %c0_17, %c0_18] : memref<3x1x512xf32, #tpu.memory_space<vmem>>, vector<1x1x512xf32>
    %19 = vector.shape_cast %18 : vector<1x1x512xf32> to vector<1x512xf32>
    %20 = vector.broadcast %19 : vector<1x512xf32> to vector<8x512xf32>
    %21 = arith.addf %17, %20 : vector<8x512xf32>
    %22 = vector.extract_strided_slice %21 {offsets = [0, 0], sizes = [8, 128], strides = [1, 1]} : vector<8x512xf32> to vector<8x128xf32>
    %23 = arith.negf %22 : vector<8x128xf32>
    %24 = math.exp %23 : vector<8x128xf32>
    %cst_19 = arith.constant 1.000000e+00 : f32
    %25 = vector.broadcast %cst_19 : f32 to vector<8x128xf32>
    %26 = arith.addf %25, %24 : vector<8x128xf32>
    %27 = arith.divf %25, %26 : vector<8x128xf32>
    %28 = vector.extract_strided_slice %21 {offsets = [0, 128], sizes = [8, 128], strides = [1, 1]} : vector<8x512xf32> to vector<8x128xf32>
    %29 = arith.negf %28 : vector<8x128xf32>
    %30 = math.exp %29 : vector<8x128xf32>
    %cst_20 = arith.constant 1.000000e+00 : f32
    %31 = vector.broadcast %cst_20 : f32 to vector<8x128xf32>
    %32 = arith.addf %31, %30 : vector<8x128xf32>
    %33 = arith.divf %31, %32 : vector<8x128xf32>
    %34 = vector.extract_strided_slice %21 {offsets = [0, 256], sizes = [8, 128], strides = [1, 1]} : vector<8x512xf32> to vector<8x128xf32>
    %35 = math.tanh %34 : vector<8x128xf32>
    %36 = vector.extract_strided_slice %21 {offsets = [0, 384], sizes = [8, 128], strides = [1, 1]} : vector<8x512xf32> to vector<8x128xf32>
    %37 = arith.negf %36 : vector<8x128xf32>
    %38 = math.exp %37 : vector<8x128xf32>
    %cst_21 = arith.constant 1.000000e+00 : f32
    %39 = vector.broadcast %cst_21 : f32 to vector<8x128xf32>
    %40 = arith.addf %39, %38 : vector<8x128xf32>
    %41 = arith.divf %39, %40 : vector<8x128xf32>
    %42 = arith.mulf %33, %12 : vector<8x128xf32>
    %43 = arith.mulf %27, %35 : vector<8x128xf32>
    %44 = arith.addf %42, %43 : vector<8x128xf32>
    %45 = math.tanh %44 : vector<8x128xf32>
    %46 = arith.mulf %41, %45 : vector<8x128xf32>
    %c0_22 = arith.constant 0 : index
    %c0_23 = arith.constant 0 : index
    %c0_24 = arith.constant 0 : index
    %47 = vector.load %arg22[%c0_22, %c0_23, %c0_24] : memref<3x8x128xf32, #tpu.memory_space<vmem>>, vector<1x8x128xf32>
    %48 = vector.shape_cast %47 : vector<1x8x128xf32> to vector<8x128xf32>
    %49 = vector.shape_cast %46 : vector<8x128xf32> to vector<1x8x128xf32>
    tpu.vector_store %arg22[%c0_22, %c0_23, %c0_24], %49 {strides = array<i32>} : memref<3x8x128xf32, #tpu.memory_space<vmem>>, vector<1x8x128xf32>,
    %c0_25 = arith.constant 0 : index
    %c0_26 = arith.constant 0 : index
    %c0_27 = arith.constant 0 : index
    %50 = vector.load %arg23[%c0_25, %c0_26, %c0_27] : memref<3x8x128xf32, #tpu.memory_space<vmem>>, vector<1x8x128xf32>
    %51 = vector.shape_cast %50 : vector<1x8x128xf32> to vector<8x128xf32>
    %52 = vector.shape_cast %44 : vector<8x128xf32> to vector<1x8x128xf32>
    tpu.vector_store %arg23[%c0_25, %c0_26, %c0_27], %52 {strides = array<i32>} : memref<3x8x128xf32, #tpu.memory_space<vmem>>, vector<1x8x128xf32>,
    %c1 = arith.constant 1 : index
    %c0_28 = arith.constant 0 : index
    %c0_29 = arith.constant 0 : index
    %53 = vector.load %arg1[%c1, %c0_28, %c0_29] : memref<3x8x128xf32, #tpu.memory_space<vmem>>, vector<1x8x128xf32>
    %54 = vector.shape_cast %53 : vector<1x8x128xf32> to vector<8x128xf32>
    %c1_30 = arith.constant 1 : index
    %c0_31 = arith.constant 0 : index
    %c0_32 = arith.constant 0 : index
    %55 = vector.load %arg2[%c1_30, %c0_31, %c0_32] : memref<3x8x128xf32, #tpu.memory_space<vmem>>, vector<1x8x128xf32>
    %56 = vector.shape_cast %55 : vector<1x8x128xf32> to vector<8x128xf32>
    %57 = tpu.concatenate %46, %54 in 1 : vector<8x128xf32>, vector<8x128xf32> -> vector<8x256xf32>
    %c1_33 = arith.constant 1 : index
    %c0_34 = arith.constant 0 : index
    %c0_35 = arith.constant 0 : index
    %58 = vector.load %arg5[%c1_33, %c0_34, %c0_35] : memref<3x256x512xbf16, #tpu.memory_space<vmem>>, vector<1x256x512xbf16>
    %59 = vector.shape_cast %58 : vector<1x256x512xbf16> to vector<256x512xbf16>
    %60 = arith.truncf %57 : vector<8x256xf32> to vector<8x256xbf16>
    %cst_36 = arith.constant dense<0.000000e+00> : vector<8x512xf32>
    %61 = tpu.matmul %60, %59, %cst_36 {dimension_numbers = #tpu.dot_dimension_numbers<[1], [0], [0], [1], [0, 0, 1, 1], [], []>} : vector<8x256xbf16>, vector<256x512xbf16>, vector<8x512xf32> -> vector<8x512xf32>
    %c1_37 = arith.constant 1 : index
    %c0_38 = arith.constant 0 : index
    %c0_39 = arith.constant 0 : index
    %62 = vector.load %arg6[%c1_37, %c0_38, %c0_39] : memref<3x1x512xf32, #tpu.memory_space<vmem>>, vector<1x1x512xf32>
    %63 = vector.shape_cast %62 : vector<1x1x512xf32> to vector<1x512xf32>
    %64 = vector.broadcast %63 : vector<1x512xf32> to vector<8x512xf32>
    %65 = arith.addf %61, %64 : vector<8x512xf32>
    %66 = vector.extract_strided_slice %65 {offsets = [0, 0], sizes = [8, 128], strides = [1, 1]} : vector<8x512xf32> to vector<8x128xf32>
    %67 = arith.negf %66 : vector<8x128xf32>
    %68 = math.exp %67 : vector<8x128xf32>
    %cst_40 = arith.constant 1.000000e+00 : f32
    %69 = vector.broadcast %cst_40 : f32 to vector<8x128xf32>
    %70 = arith.addf %69, %68 : vector<8x128xf32>
    %71 = arith.divf %69, %70 : vector<8x128xf32>
    %72 = vector.extract_strided_slice %65 {offsets = [0, 128], sizes = [8, 128], strides = [1, 1]} : vector<8x512xf32> to vector<8x128xf32>
    %73 = arith.negf %72 : vector<8x128xf32>
    %74 = math.exp %73 : vector<8x128xf32>
    %cst_41 = arith.constant 1.000000e+00 : f32
    %75 = vector.broadcast %cst_41 : f32 to vector<8x128xf32>
    %76 = arith.addf %75, %74 : vector<8x128xf32>
    %77 = arith.divf %75, %76 : vector<8x128xf32>
    %78 = vector.extract_strided_slice %65 {offsets = [0, 256], sizes = [8, 128], strides = [1, 1]} : vector<8x512xf32> to vector<8x128xf32>
    %79 = math.tanh %78 : vector<8x128xf32>
    %80 = vector.extract_strided_slice %65 {offsets = [0, 384], sizes = [8, 128], strides = [1, 1]} : vector<8x512xf32> to vector<8x128xf32>
    %81 = arith.negf %80 : vector<8x128xf32>
    %82 = math.exp %81 : vector<8x128xf32>
    %cst_42 = arith.constant 1.000000e+00 : f32
    %83 = vector.broadcast %cst_42 : f32 to vector<8x128xf32>
    %84 = arith.addf %83, %82 : vector<8x128xf32>
    %85 = arith.divf %83, %84 : vector<8x128xf32>
    %86 = arith.mulf %77, %56 : vector<8x128xf32>
    %87 = arith.mulf %71, %79 : vector<8x128xf32>
    %88 = arith.addf %86, %87 : vector<8x128xf32>
    %89 = math.tanh %88 : vector<8x128xf32>
    %90 = arith.mulf %85, %89 : vector<8x128xf32>
    %c1_43 = arith.constant 1 : index
    %c0_44 = arith.constant 0 : index
    %c0_45 = arith.constant 0 : index
    %91 = vector.load %arg22[%c1_43, %c0_44, %c0_45] : memref<3x8x128xf32, #tpu.memory_space<vmem>>, vector<1x8x128xf32>
    %92 = vector.shape_cast %91 : vector<1x8x128xf32> to vector<8x128xf32>
    %93 = vector.shape_cast %90 : vector<8x128xf32> to vector<1x8x128xf32>
    tpu.vector_store %arg22[%c1_43, %c0_44, %c0_45], %93 {strides = array<i32>} : memref<3x8x128xf32, #tpu.memory_space<vmem>>, vector<1x8x128xf32>,
    %c1_46 = arith.constant 1 : index
    %c0_47 = arith.constant 0 : index
    %c0_48 = arith.constant 0 : index
    %94 = vector.load %arg23[%c1_46, %c0_47, %c0_48] : memref<3x8x128xf32, #tpu.memory_space<vmem>>, vector<1x8x128xf32>
    %95 = vector.shape_cast %94 : vector<1x8x128xf32> to vector<8x128xf32>
    %96 = vector.shape_cast %88 : vector<8x128xf32> to vector<1x8x128xf32>
    tpu.vector_store %arg23[%c1_46, %c0_47, %c0_48], %96 {strides = array<i32>} : memref<3x8x128xf32, #tpu.memory_space<vmem>>, vector<1x8x128xf32>,
    %c2 = arith.constant 2 : index
    %c0_49 = arith.constant 0 : index
    %c0_50 = arith.constant 0 : index
    %97 = vector.load %arg1[%c2, %c0_49, %c0_50] : memref<3x8x128xf32, #tpu.memory_space<vmem>>, vector<1x8x128xf32>
    %98 = vector.shape_cast %97 : vector<1x8x128xf32> to vector<8x128xf32>
    %c2_51 = arith.constant 2 : index
    %c0_52 = arith.constant 0 : index
    %c0_53 = arith.constant 0 : index
    %99 = vector.load %arg2[%c2_51, %c0_52, %c0_53] : memref<3x8x128xf32, #tpu.memory_space<vmem>>, vector<1x8x128xf32>
    %100 = vector.shape_cast %99 : vector<1x8x128xf32> to vector<8x128xf32>
    %101 = tpu.concatenate %90, %98 in 1 : vector<8x128xf32>, vector<8x128xf32> -> vector<8x256xf32>
    %c2_54 = arith.constant 2 : index
    %c0_55 = arith.constant 0 : index
    %c0_56 = arith.constant 0 : index
    %102 = vector.load %arg5[%c2_54, %c0_55, %c0_56] : memref<3x256x512xbf16, #tpu.memory_space<vmem>>, vector<1x256x512xbf16>
    %103 = vector.shape_cast %102 : vector<1x256x512xbf16> to vector<256x512xbf16>
    %104 = arith.truncf %101 : vector<8x256xf32> to vector<8x256xbf16>
    %cst_57 = arith.constant dense<0.000000e+00> : vector<8x512xf32>
    %105 = tpu.matmul %104, %103, %cst_57 {dimension_numbers = #tpu.dot_dimension_numbers<[1], [0], [0], [1], [0, 0, 1, 1], [], []>} : vector<8x256xbf16>, vector<256x512xbf16>, vector<8x512xf32> -> vector<8x512xf32>
    %c2_58 = arith.constant 2 : index
    %c0_59 = arith.constant 0 : index
    %c0_60 = arith.constant 0 : index
    %106 = vector.load %arg6[%c2_58, %c0_59, %c0_60] : memref<3x1x512xf32, #tpu.memory_space<vmem>>, vector<1x1x512xf32>
    %107 = vector.shape_cast %106 : vector<1x1x512xf32> to vector<1x512xf32>
    %108 = vector.broadcast %107 : vector<1x512xf32> to vector<8x512xf32>
    %109 = arith.addf %105, %108 : vector<8x512xf32>
    %110 = vector.extract_strided_slice %109 {offsets = [0, 0], sizes = [8, 128], strides = [1, 1]} : vector<8x512xf32> to vector<8x128xf32>
    %111 = arith.negf %110 : vector<8x128xf32>
    %112 = math.exp %111 : vector<8x128xf32>
    %cst_61 = arith.constant 1.000000e+00 : f32
    %113 = vector.broadcast %cst_61 : f32 to vector<8x128xf32>
    %114 = arith.addf %113, %112 : vector<8x128xf32>
    %115 = arith.divf %113, %114 : vector<8x128xf32>
    %116 = vector.extract_strided_slice %109 {offsets = [0, 128], sizes = [8, 128], strides = [1, 1]} : vector<8x512xf32> to vector<8x128xf32>
    %117 = arith.negf %116 : vector<8x128xf32>
    %118 = math.exp %117 : vector<8x128xf32>
    %cst_62 = arith.constant 1.000000e+00 : f32
    %119 = vector.broadcast %cst_62 : f32 to vector<8x128xf32>
    %120 = arith.addf %119, %118 : vector<8x128xf32>
    %121 = arith.divf %119, %120 : vector<8x128xf32>
    %122 = vector.extract_strided_slice %109 {offsets = [0, 256], sizes = [8, 128], strides = [1, 1]} : vector<8x512xf32> to vector<8x128xf32>
    %123 = math.tanh %122 : vector<8x128xf32>
    %124 = vector.extract_strided_slice %109 {offsets = [0, 384], sizes = [8, 128], strides = [1, 1]} : vector<8x512xf32> to vector<8x128xf32>
    %125 = arith.negf %124 : vector<8x128xf32>
    %126 = math.exp %125 : vector<8x128xf32>
    %cst_63 = arith.constant 1.000000e+00 : f32
    %127 = vector.broadcast %cst_63 : f32 to vector<8x128xf32>
    %128 = arith.addf %127, %126 : vector<8x128xf32>
    %129 = arith.divf %127, %128 : vector<8x128xf32>
    %130 = arith.mulf %121, %100 : vector<8x128xf32>
    %131 = arith.mulf %115, %123 : vector<8x128xf32>
    %132 = arith.addf %130, %131 : vector<8x128xf32>
    %133 = math.tanh %132 : vector<8x128xf32>
    %134 = arith.mulf %129, %133 : vector<8x128xf32>
    %c2_64 = arith.constant 2 : index
    %c0_65 = arith.constant 0 : index
    %c0_66 = arith.constant 0 : index
    %135 = vector.load %arg22[%c2_64, %c0_65, %c0_66] : memref<3x8x128xf32, #tpu.memory_space<vmem>>, vector<1x8x128xf32>
    %136 = vector.shape_cast %135 : vector<1x8x128xf32> to vector<8x128xf32>
    %137 = vector.shape_cast %134 : vector<8x128xf32> to vector<1x8x128xf32>
    tpu.vector_store %arg22[%c2_64, %c0_65, %c0_66], %137 {strides = array<i32>} : memref<3x8x128xf32, #tpu.memory_space<vmem>>, vector<1x8x128xf32>,
    %c2_67 = arith.constant 2 : index
    %c0_68 = arith.constant 0 : index
    %c0_69 = arith.constant 0 : index
    %138 = vector.load %arg23[%c2_67, %c0_68, %c0_69] : memref<3x8x128xf32, #tpu.memory_space<vmem>>, vector<1x8x128xf32>
    %139 = vector.shape_cast %138 : vector<1x8x128xf32> to vector<8x128xf32>
    %140 = vector.shape_cast %132 : vector<8x128xf32> to vector<1x8x128xf32>
    tpu.vector_store %arg23[%c2_67, %c0_68, %c0_69], %140 {strides = array<i32>} : memref<3x8x128xf32, #tpu.memory_space<vmem>>, vector<1x8x128xf32>,
    %c0_70 = arith.constant 0 : index
    %c0_71 = arith.constant 0 : index
    %141 = vector.load %arg7[%c0_70, %c0_71] : memref<128x384xbf16, #tpu.memory_space<vmem>>, vector<128x384xbf16>
    %142 = arith.truncf %134 : vector<8x128xf32> to vector<8x128xbf16>
    %cst_72 = arith.constant dense<0.000000e+00> : vector<8x384xf32>
    %143 = tpu.matmul %142, %141, %cst_72 {dimension_numbers = #tpu.dot_dimension_numbers<[1], [0], [0], [1], [0, 0, 1, 1], [], []>} : vector<8x128xbf16>, vector<128x384xbf16>, vector<8x384xf32> -> vector<8x384xf32>
    %c0_73 = arith.constant 0 : index
    %c0_74 = arith.constant 0 : index
    %144 = vector.load %arg8[%c0_73, %c0_74] : memref<1x384xf32, #tpu.memory_space<vmem>>, vector<1x384xf32>
    %145 = vector.broadcast %144 : vector<1x384xf32> to vector<8x384xf32>
    %146 = arith.addf %143, %145 : vector<8x384xf32>
    %147 = vector.extract_strided_slice %146 {offsets = [0, 0], sizes = [8, 128], strides = [1, 1]} : vector<8x384xf32> to vector<8x128xf32>
    %148 = vector.extract_strided_slice %147 {offsets = [0, 0], sizes = [8, 32], strides = [1, 1]} : vector<8x128xf32> to vector<8x32xf32>
    %149 = vector.extract_strided_slice %147 {offsets = [0, 32], sizes = [8, 32], strides = [1, 1]} : vector<8x128xf32> to vector<8x32xf32>
    %150 = vector.extract_strided_slice %147 {offsets = [0, 64], sizes = [8, 32], strides = [1, 1]} : vector<8x128xf32> to vector<8x32xf32>
    %151 = vector.extract_strided_slice %147 {offsets = [0, 96], sizes = [8, 32], strides = [1, 1]} : vector<8x128xf32> to vector<8x32xf32>
    %152 = vector.shape_cast %148 : vector<8x32xf32> to vector<1x8x32xf32>
    %153 = vector.shape_cast %149 : vector<8x32xf32> to vector<1x8x32xf32>
    %154 = vector.shape_cast %150 : vector<8x32xf32> to vector<1x8x32xf32>
    %155 = vector.shape_cast %151 : vector<8x32xf32> to vector<1x8x32xf32>
    %156 = tpu.concatenate %152, %153, %154, %155 in 0 : vector<1x8x32xf32>, vector<1x8x32xf32>, vector<1x8x32xf32>, vector<1x8x32xf32> -> vector<4x8x32xf32>
    %cst_75 = arith.constant 0.176776692 : f32
    %157 = vector.broadcast %cst_75 : f32 to vector<4x8x32xf32>
    %158 = arith.mulf %156, %157 : vector<4x8x32xf32>
    %159 = vector.extract_strided_slice %146 {offsets = [0, 128], sizes = [8, 128], strides = [1, 1]} : vector<8x384xf32> to vector<8x128xf32>
    %160 = vector.extract_strided_slice %159 {offsets = [0, 0], sizes = [8, 32], strides = [1, 1]} : vector<8x128xf32> to vector<8x32xf32>
    %161 = vector.extract_strided_slice %159 {offsets = [0, 32], sizes = [8, 32], strides = [1, 1]} : vector<8x128xf32> to vector<8x32xf32>
    %162 = vector.extract_strided_slice %159 {offsets = [0, 64], sizes = [8, 32], strides = [1, 1]} : vector<8x128xf32> to vector<8x32xf32>
    %163 = vector.extract_strided_slice %159 {offsets = [0, 96], sizes = [8, 32], strides = [1, 1]} : vector<8x128xf32> to vector<8x32xf32>
    %164 = vector.shape_cast %160 : vector<8x32xf32> to vector<1x8x32xf32>
    %165 = vector.shape_cast %161 : vector<8x32xf32> to vector<1x8x32xf32>
    %166 = vector.shape_cast %162 : vector<8x32xf32> to vector<1x8x32xf32>
    %167 = vector.shape_cast %163 : vector<8x32xf32> to vector<1x8x32xf32>
    %168 = tpu.concatenate %164, %165, %166, %167 in 0 : vector<1x8x32xf32>, vector<1x8x32xf32>, vector<1x8x32xf32>, vector<1x8x32xf32> -> vector<4x8x32xf32>
    %169 = vector.extract_strided_slice %146 {offsets = [0, 256], sizes = [8, 128], strides = [1, 1]} : vector<8x384xf32> to vector<8x128xf32>
    %170 = vector.extract_strided_slice %169 {offsets = [0, 0], sizes = [8, 32], strides = [1, 1]} : vector<8x128xf32> to vector<8x32xf32>
    %171 = vector.extract_strided_slice %169 {offsets = [0, 32], sizes = [8, 32], strides = [1, 1]} : vector<8x128xf32> to vector<8x32xf32>
    %172 = vector.extract_strided_slice %169 {offsets = [0, 64], sizes = [8, 32], strides = [1, 1]} : vector<8x128xf32> to vector<8x32xf32>
    %173 = vector.extract_strided_slice %169 {offsets = [0, 96], sizes = [8, 32], strides = [1, 1]} : vector<8x128xf32> to vector<8x32xf32>
    %174 = vector.shape_cast %170 : vector<8x32xf32> to vector<1x8x32xf32>
    %175 = vector.shape_cast %171 : vector<8x32xf32> to vector<1x8x32xf32>
    %176 = vector.shape_cast %172 : vector<8x32xf32> to vector<1x8x32xf32>
    %177 = vector.shape_cast %173 : vector<8x32xf32> to vector<1x8x32xf32>
    %178 = tpu.concatenate %174, %175, %176, %177 in 0 : vector<1x8x32xf32>, vector<1x8x32xf32>, vector<1x8x32xf32>, vector<1x8x32xf32> -> vector<4x8x32xf32>
    %179 = arith.truncf %158 : vector<4x8x32xf32> to vector<4x8x32xbf16>
    %180 = arith.truncf %168 : vector<4x8x32xf32> to vector<4x8x32xbf16>
    %cst_76 = arith.constant dense<0.000000e+00> : vector<4x8x8xf32>
    %181 = tpu.matmul %179, %180, %cst_76 {dimension_numbers = #tpu.dot_dimension_numbers<[2], [2], [1], [1], [0, 0, 0, 1, 1, 1], [0], [0]>} : vector<4x8x32xbf16>, vector<4x8x32xbf16>, vector<4x8x8xf32> -> vector<4x8x8xf32>
    %cst_77 = arith.constant dense<0xFF800000> : vector<4x8xf32>
    %182 = vector.multi_reduction <maximumf>, %181, %cst_77 [2] : vector<4x8x8xf32> to vector<4x8xf32>
    %183 = vector.shape_cast %182 : vector<4x8xf32> to vector<4x8x1xf32>
    %184 = vector.broadcast %183 : vector<4x8x1xf32> to vector<4x8x8xf32>
    %185 = arith.subf %181, %184 : vector<4x8x8xf32>
    %186 = math.exp %185 : vector<4x8x8xf32>
    %cst_78 = arith.constant dense<0.000000e+00> : vector<4x8xf32>
    %187 = vector.multi_reduction <add>, %186, %cst_78 [2] : vector<4x8x8xf32> to vector<4x8xf32>
    %188 = vector.shape_cast %187 : vector<4x8xf32> to vector<4x8x1xf32>
    %189 = tpu.reciprocal %188 {approx = true} : vector<4x8x1xf32> -> vector<4x8x1xf32>
    %190 = vector.broadcast %189 : vector<4x8x1xf32> to vector<4x8x8xf32>
    %191 = arith.mulf %186, %190 : vector<4x8x8xf32>
    %192 = arith.truncf %191 : vector<4x8x8xf32> to vector<4x8x8xbf16>
    %193 = arith.truncf %178 : vector<4x8x32xf32> to vector<4x8x32xbf16>
    %cst_79 = arith.constant dense<0.000000e+00> : vector<4x8x32xf32>
    %194 = tpu.matmul %192, %193, %cst_79 {dimension_numbers = #tpu.dot_dimension_numbers<[2], [1], [1], [2], [0, 0, 0, 1, 1, 2], [0], [0]>} : vector<4x8x8xbf16>, vector<4x8x32xbf16>, vector<4x8x32xf32> -> vector<4x8x32xf32>
    %195 = vector.extract_strided_slice %194 {offsets = [0, 0, 0], sizes = [1, 8, 32], strides = [1, 1, 1]} : vector<4x8x32xf32> to vector<1x8x32xf32>
    %196 = vector.shape_cast %195 : vector<1x8x32xf32> to vector<8x32xf32>
    %197 = vector.extract_strided_slice %194 {offsets = [1, 0, 0], sizes = [1, 8, 32], strides = [1, 1, 1]} : vector<4x8x32xf32> to vector<1x8x32xf32>
    %198 = vector.shape_cast %197 : vector<1x8x32xf32> to vector<8x32xf32>
    %199 = vector.extract_strided_slice %194 {offsets = [2, 0, 0], sizes = [1, 8, 32], strides = [1, 1, 1]} : vector<4x8x32xf32> to vector<1x8x32xf32>
    %200 = vector.shape_cast %199 : vector<1x8x32xf32> to vector<8x32xf32>
    %201 = vector.extract_strided_slice %194 {offsets = [3, 0, 0], sizes = [1, 8, 32], strides = [1, 1, 1]} : vector<4x8x32xf32> to vector<1x8x32xf32>
    %202 = vector.shape_cast %201 : vector<1x8x32xf32> to vector<8x32xf32>
    %203 = tpu.concatenate %196, %198, %200, %202 in 1 : vector<8x32xf32>, vector<8x32xf32>, vector<8x32xf32>, vector<8x32xf32> -> vector<8x128xf32>
    %c0_80 = arith.constant 0 : index
    %c0_81 = arith.constant 0 : index
    %204 = vector.load %arg9[%c0_80, %c0_81] : memref<128x128xbf16, #tpu.memory_space<vmem>>, vector<128x128xbf16>
    %205 = arith.truncf %203 : vector<8x128xf32> to vector<8x128xbf16>
    %cst_82 = arith.constant dense<0.000000e+00> : vector<8x128xf32>
    %206 = tpu.matmul %205, %204, %cst_82 {dimension_numbers = #tpu.dot_dimension_numbers<[1], [0], [0], [1], [0, 0, 1, 1], [], []>} : vector<8x128xbf16>, vector<128x128xbf16>, vector<8x128xf32> -> vector<8x128xf32>
    %c0_83 = arith.constant 0 : index
    %c0_84 = arith.constant 0 : index
    %207 = vector.load %arg10[%c0_83, %c0_84] : memref<1x128xf32, #tpu.memory_space<vmem>>, vector<1x128xf32>
    %208 = vector.broadcast %207 : vector<1x128xf32> to vector<8x128xf32>
    %209 = arith.addf %206, %208 : vector<8x128xf32>
    %210 = tpu.concatenate %209, %134 in 1 : vector<8x128xf32>, vector<8x128xf32> -> vector<8x256xf32>
    %c0_85 = arith.constant 0 : index
    %c0_86 = arith.constant 0 : index
    %211 = vector.load %arg11[%c0_85, %c0_86] : memref<256x128xbf16, #tpu.memory_space<vmem>>, vector<256x128xbf16>
    %212 = arith.truncf %210 : vector<8x256xf32> to vector<8x256xbf16>
    %cst_87 = arith.constant dense<0.000000e+00> : vector<8x128xf32>
    %213 = tpu.matmul %212, %211, %cst_87 {dimension_numbers = #tpu.dot_dimension_numbers<[1], [0], [0], [1], [0, 0, 1, 1], [], []>} : vector<8x256xbf16>, vector<256x128xbf16>, vector<8x128xf32> -> vector<8x128xf32>
    %c0_88 = arith.constant 0 : index
    %c0_89 = arith.constant 0 : index
    %214 = vector.load %arg12[%c0_88, %c0_89] : memref<1x128xf32, #tpu.memory_space<vmem>>, vector<1x128xf32>
    %215 = vector.broadcast %214 : vector<1x128xf32> to vector<8x128xf32>
    %216 = arith.addf %213, %215 : vector<8x128xf32>
    %cst_90 = arith.constant 0.000000e+00 : f32
    %217 = vector.broadcast %cst_90 : f32 to vector<8x128xf32>
    %218 = arith.maximumf %216, %217 : vector<8x128xf32>
    %c0_91 = arith.constant 0 : index
    %c0_92 = arith.constant 0 : index
    %219 = vector.load %arg13[%c0_91, %c0_92] : memref<128x128xbf16, #tpu.memory_space<vmem>>, vector<128x128xbf16>
    %220 = arith.truncf %218 : vector<8x128xf32> to vector<8x128xbf16>
    %cst_93 = arith.constant dense<0.000000e+00> : vector<8x128xf32>
    %221 = tpu.matmul %220, %219, %cst_93 {dimension_numbers = #tpu.dot_dimension_numbers<[1], [0], [0], [1], [0, 0, 1, 1], [], []>} : vector<8x128xbf16>, vector<128x128xbf16>, vector<8x128xf32> -> vector<8x128xf32>
    %c0_94 = arith.constant 0 : index
    %c0_95 = arith.constant 0 : index
    %222 = vector.load %arg14[%c0_94, %c0_95] : memref<1x128xf32, #tpu.memory_space<vmem>>, vector<1x128xf32>
    %223 = vector.broadcast %222 : vector<1x128xf32> to vector<8x128xf32>
    %224 = arith.addf %221, %223 : vector<8x128xf32>
    %c0_96 = arith.constant 0 : index
    %c0_97 = arith.constant 0 : index
    %225 = vector.load %arg15[%c0_96, %c0_97] : memref<128x128xbf16, #tpu.memory_space<vmem>>, vector<128x128xbf16>
    %226 = arith.truncf %218 : vector<8x128xf32> to vector<8x128xbf16>
    %cst_98 = arith.constant dense<0.000000e+00> : vector<8x128xf32>
    %227 = tpu.matmul %226, %225, %cst_98 {dimension_numbers = #tpu.dot_dimension_numbers<[1], [0], [0], [1], [0, 0, 1, 1], [], []>} : vector<8x128xbf16>, vector<128x128xbf16>, vector<8x128xf32> -> vector<8x128xf32>
    %c0_99 = arith.constant 0 : index
    %c0_100 = arith.constant 0 : index
    %228 = vector.load %arg16[%c0_99, %c0_100] : memref<1x128xf32, #tpu.memory_space<vmem>>, vector<1x128xf32>
    %229 = vector.broadcast %228 : vector<1x128xf32> to vector<8x128xf32>
    %230 = arith.addf %227, %229 : vector<8x128xf32>
    %231 = arith.negf %230 : vector<8x128xf32>
    %232 = math.exp %231 : vector<8x128xf32>
    %cst_101 = arith.constant 1.000000e+00 : f32
    %233 = vector.broadcast %cst_101 : f32 to vector<8x128xf32>
    %234 = arith.addf %233, %232 : vector<8x128xf32>
    %235 = arith.divf %233, %234 : vector<8x128xf32>
    %cst_102 = arith.constant dense<0.000000e+00> : vector<128xf32>
    %236 = vector.multi_reduction <add>, %235, %cst_102 [0] : vector<8x128xf32> to vector<128xf32>
    %237 = vector.shape_cast %236 : vector<128xf32> to vector<1x128xf32>
    %cst_103 = arith.constant 8.000000e+00 : f32
    %238 = vector.broadcast %cst_103 : f32 to vector<1x128xf32>
    %239 = arith.divf %237, %238 : vector<1x128xf32>
    %c0_104 = arith.constant 0 : index
    %c0_105 = arith.constant 0 : index
    %240 = vector.load %arg24[%c0_104, %c0_105] : memref<1x128xf32, #tpu.memory_space<vmem>>, vector<1x128xf32>
    tpu.vector_store %arg24[%c0_104, %c0_105], %239 {strides = array<i32>} : memref<1x128xf32, #tpu.memory_space<vmem>>, vector<1x128xf32>,
    %241 = tpu.concatenate %209, %224 in 1 : vector<8x128xf32>, vector<8x128xf32> -> vector<8x256xf32>
    %c0_106 = arith.constant 0 : index
    %c0_107 = arith.constant 0 : index
    %242 = vector.load %arg17[%c0_106, %c0_107] : memref<256x128xbf16, #tpu.memory_space<vmem>>, vector<256x128xbf16>
    %243 = arith.truncf %241 : vector<8x256xf32> to vector<8x256xbf16>
    %cst_108 = arith.constant dense<0.000000e+00> : vector<8x128xf32>
    %244 = tpu.matmul %243, %242, %cst_108 {dimension_numbers = #tpu.dot_dimension_numbers<[1], [0], [0], [1], [0, 0, 1, 1], [], []>} : vector<8x256xbf16>, vector<256x128xbf16>, vector<8x128xf32> -> vector<8x128xf32>
    %c0_109 = arith.constant 0 : index
    %c0_110 = arith.constant 0 : index
    %245 = vector.load %arg18[%c0_109, %c0_110] : memref<1x128xf32, #tpu.memory_space<vmem>>, vector<1x128xf32>
    %246 = vector.broadcast %245 : vector<1x128xf32> to vector<8x128xf32>
    %247 = arith.addf %244, %246 : vector<8x128xf32>
    %cst_111 = arith.constant 0.000000e+00 : f32
    %248 = vector.broadcast %cst_111 : f32 to vector<8x128xf32>
    %249 = arith.maximumf %247, %248 : vector<8x128xf32>
    %c0_112 = arith.constant 0 : index
    %c0_113 = arith.constant 0 : index
    %250 = vector.load %arg19[%c0_112, %c0_113] : memref<128x128xbf16, #tpu.memory_space<vmem>>, vector<128x128xbf16>
    %251 = arith.truncf %249 : vector<8x128xf32> to vector<8x128xbf16>
    %cst_114 = arith.constant dense<0.000000e+00> : vector<8x128xf32>
    %252 = tpu.matmul %251, %250, %cst_114 {dimension_numbers = #tpu.dot_dimension_numbers<[1], [0], [0], [1], [0, 0, 1, 1], [], []>} : vector<8x128xbf16>, vector<128x128xbf16>, vector<8x128xf32> -> vector<8x128xf32>
    %c0_115 = arith.constant 0 : index
    %c0_116 = arith.constant 0 : index
    %253 = vector.load %arg20[%c0_115, %c0_116] : memref<1x128xf32, #tpu.memory_space<vmem>>, vector<1x128xf32>
    %254 = vector.broadcast %253 : vector<1x128xf32> to vector<8x128xf32>
    %255 = arith.addf %252, %254 : vector<8x128xf32>
    %c0_117 = arith.constant 0 : index
    %c0_118 = arith.constant 0 : index
    %256 = vector.load %arg21[%c0_117, %c0_118] : memref<8x128xf32, #tpu.memory_space<vmem>>, vector<8x128xf32>
    tpu.vector_store %arg21[%c0_117, %c0_118], %255 {strides = array<i32>} : memref<8x128xf32, #tpu.memory_space<vmem>>, vector<8x128xf32>,
    return
  }
}

</mosaic_0001>

<bundles_post_ra>
// kernel: consciousness_forward.1
= control target key start
LH: loop header
LB: loop body
LE: loop exit
PB: predicated region body
PF: predicated region fallthrough
CT: control target
= control target key end

     0   :  { %s5873_s0 = inlined_call_operand.hbm [shape: f32[8,64], index: 0, kind: input, shape index: {}]   ;;  %s5874_s1 = inlined_call_operand.hbm [shape: f32[3,8,128], index: 1, kind: input, shape index: {}]   ;;  %s5875_s2 = inlined_call_operand.hbm [shape: f32[3,8,128], index: 2, kind: input, shape index: {}]   ;;  %s5876_s3 = inlined_call_operand.hbm [shape: bf16[64,128], index: 3, kind: input, shape index: {}]   ;;  %s5877_s4 = inlined_call_operand.hbm [shape: f32[1,128], index: 4, kind: input, shape index: {}]   ;;  %s5878_s5 = inlined_call_operand.hbm [shape: bf16[3,256,512], index: 5, kind: input, shape index: {}]   ;;  %s5879_s6 = inlined_call_operand.hbm [shape: f32[3,1,512], index: 6, kind: input, shape index: {}]   ;;  %s5880_s7 = inlined_call_operand.hbm [shape: bf16[128,384], index: 7, kind: input, shape index: {}]   ;;  %s5881_s8 = inlined_call_operand.hbm [shape: f32[1,384], index: 8, kind: input, shape index: {}]   ;;  %s5882_s9 = inlined_call_operand.hbm [shape: bf16[128,128], index: 9, kind: input, shape index: {}]   ;;  %s5883_s10 = inlined_call_operand.hbm [shape: f32[1,128], index: 10, kind: input, shape index: {}]   ;;  %s5884_s11 = inlined_call_operand.hbm [shape: bf16[256,128], index: 11, kind: input, shape index: {}]   ;;  %s5885_s12 = inlined_call_operand.hbm [shape: f32[1,128], index: 12, kind: input, shape index: {}]   ;;  %s5886_s13 = inlined_call_operand.vmem [shape: bf16[128,128], index: 13, kind: input, shape index: {}]   ;;  %s5887_s14 = inlined_call_operand.hbm [shape: f32[1,128], index: 14, kind: input, shape index: {}]   ;;  %s5888_s15 = inlined_call_operand.hbm [shape: bf16[128,128], index: 15, kind: input, shape index: {}]   ;;  %s5889_s16 = inlined_call_operand.hbm [shape: f32[1,128], index: 16, kind: input, shape index: {}]   ;;  %s5890_s17 = inlined_call_operand.hbm [shape: bf16[256,128], index: 17, kind: input, shape index: {}]   ;;  %s5891_s18 = inlined_call_operand.hbm [shape: f32[1,128], index: 18, kind: input, shape index: {}]   ;;  %s5892_s19 = inlined_call_operand.hbm [shape: bf16[128,128], index: 19, kind: input, shape index: {}]   ;;  %s5893_s20 = inlined_call_operand.hbm [shape: f32[1,128], index: 20, kind: input, shape index: {}]   ;;  %s5894_s21 = inlined_call_operand.hbm [shape: f32[8,128], index: 21, kind: output, shape index: {0}]   ;;  %s5895_s22 = inlined_call_operand.hbm [shape: f32[3,8,128], index: 22, kind: output, shape index: {1}]   ;;  %s5896_s23 = inlined_call_operand.hbm [shape: f32[3,8,128], index: 23, kind: output, shape index: {2}]   ;;  %s5897_s24 = inlined_call_operand.vmem [shape: f32[1,128], index: 24, kind: output, shape index: {3}]  }
   0x1   :  { %5917 = sst [smem:[#allocation51_spill]] %s5873_s0 }
   0x2   :  { %5918 = sst [smem:[#allocation52_spill]] %s5874_s1 }
   0x3   :  { %5919 = sst [smem:[#allocation53_spill]] %s5875_s2 }
   0x4   :  { %5920 = sst [smem:[#allocation54_spill]] %s5876_s3 }
   0x5   :  { %5921 = sst [smem:[#allocation55_spill]] %s5877_s4 }
   0x6   :  { %5922 = sst [smem:[#allocation56_spill]] %s5878_s5 }
   0x7   :  { %5923 = sst [smem:[#allocation57_spill]] %s5879_s6 }
   0x8   :  { %5924 = sst [smem:[#allocation58_spill]] %s5880_s7 }
   0x9   :  { %5925 = sst [smem:[#allocation59_spill]] %s5881_s8 }
   0xa   :  { %5926 = sst [smem:[#allocation60_spill]] %s5894_s21 }
   0xb   :  { %5927 = sst [smem:[#allocation61_spill]] %s5896_s23 }
   0xc   :  { %30 = vsyncpa [#allocation3], 0 }
   0xd   :  { %31 = vsyncpa [#allocation6], 0 }
   0xe   :  { %32 = vsyncpa [#allocation9], 0 }
   0xf   :  { %33 = vsyncpa [#allocation12], 0 }
  0x10   :  { %34 = vsyncpa [#allocation15], 0 }
  0x11   :  { %35 = vsyncpa [#allocation18], 0 }
  0x12   :  { %36 = vsyncpa [#allocation21], 0 }
  0x13   :  { %37 = vsyncpa [#allocation24], 0 }
  0x14   :  { %38 = vsyncpa [#allocation27], 0 }
  0x15   :  { %39 = vsyncpa [#allocation30], 0 }
  0x16   :  { %40 = vsyncpa [#allocation33], 0 }
  0x17   :  { %41 = vsyncpa [#allocation4], 0 }
  0x18   :  { %42 = vsyncpa [#allocation36], 0  ;;  %s5201_s5 = smov [#allocation5]   ;;  %s5928_s6 = sld [smem:[#allocation52_spill]] }
  0x19   :  { %s58_s26 = sshll.u32 %s5201_s5, 4  ;;  %s59_s26 = int_to_ptr.vmem [resolvable:$true] %s58_s26 }
  0x1e   :  { %s4669_s2 = scalar_lea.hbm %s5928_s6, 384 }
  0x1f   :  { %p4670_p0 = scmp.ne.s32.totalorder %s5928_s6, %s4669_s2  ;;  %p4673_p1 = scmp.lt.u32.totalorder %s4669_s2, %s5928_s6 }
  0x21   :  { %p4675_p2 = pnand %p4673_p1, %p4670_p0 }
  0x23   :  { %4678 = shalt.err (!%p4675_p2)
}
  0x24   :  { %s4679_s3 = scalar_lea.vmem %s59_s26, 384  ;;  %p4684_p4 = scmp.lt.s32.totalorder %s59_s26, %s59_s26 }
  0x25   :  { %p4680_p3 = scmp.ne.s32.totalorder %s59_s26, %s4679_s3  ;;  %p4685_p5 = scmp.lt.s32.totalorder %s4679_s3, %s4679_s3 }
  0x27   :  { %p4686_p6 = por %p4685_p5, %p4684_p4 }
  0x29   :  { %p4687_p7 = pnand %p4686_p6, %p4680_p3 }
  0x2b   :  { %4690 = shalt.err (!%p4687_p7)
}
  0x2c   :  { %s5909_s25 = smov 128   ;;  %s5911_s8 = smov 8  }
  0x2d   :  { %64 = dma.hbm_to_vmem [thread:$0]  %s5928_s6, 384, %s59_s26, [#allocation6], %s5909_s25, %s5909_s25, %s5911_s8  }
  0x2e   :  { %s5204_s5 = smov [#allocation8]   ;;  %s5929_s29 = sld [smem:[#allocation54_spill]] }
  0x2f   :  { %s82_s27 = sshll.u32 %s5204_s5, 4  ;;  %s83_s27 = int_to_ptr.vmem [resolvable:$true] %s82_s27 }
  0x34   :  { %s4691_s0 = scalar_lea.hbm %s5929_s29, 512 }
  0x35   :  { %p4692_p8 = scmp.ne.s32.totalorder %s5929_s29, %s4691_s0  ;;  %p4695_p9 = scmp.lt.u32.totalorder %s4691_s0, %s5929_s29 }
  0x37   :  { %p4697_p10 = pnand %p4695_p9, %p4692_p8 }
  0x39   :  { %4700 = shalt.err (!%p4697_p10)
}
  0x3a   :  { %s4701_s23 = scalar_lea.vmem %s83_s27, 512  ;;  %p4706_p12 = scmp.lt.s32.totalorder %s83_s27, %s83_s27 }
  0x3b   :  { %p4702_p11 = scmp.ne.s32.totalorder %s83_s27, %s4701_s23  ;;  %p4707_p13 = scmp.lt.s32.totalorder %s4701_s23, %s4701_s23 }
  0x3d   :  { %p4708_p0 = por %p4707_p13, %p4706_p12 }
  0x3f   :  { %p4709_p1 = pnand %p4708_p0, %p4702_p11 }
  0x41   :  { %4712 = shalt.err (!%p4709_p1)
}
  0x42   :  { %s5913_s26 = smov 64   ;;  %s5915_s6 = smov 4  }
  0x43   :  { %88 = dma.hbm_to_vmem [thread:$0]  %s5929_s29, 512, %s83_s27, [#allocation9], %s5913_s26, %s5913_s26, %s5915_s6  }
  0x44   :  { %s5207_s21 = smov [#allocation11]   ;;  %s5930_s0 = sld [smem:[#allocation56_spill]] }
  0x45   :  { %s104_s5 = sshll.u32 %s5207_s21, 4  ;;  %s105_s5 = int_to_ptr.vmem [resolvable:$true] %s104_s5 }
  0x4a   :  { %s4713_s7 = scalar_lea.hbm %s5930_s0, 24576 }
  0x4b   :  { %p4714_p2 = scmp.ne.s32.totalorder %s5930_s0, %s4713_s7  ;;  %p4717_p3 = scmp.lt.u32.totalorder %s4713_s7, %s5930_s0 }
  0x4d   :  { %p4719_p4 = pnand %p4717_p3, %p4714_p2 }
  0x4f   :  { %4722 = shalt.err (!%p4719_p4)
}
  0x50   :  { %s4723_s8 = scalar_lea.vmem %s105_s5, 24576  ;;  %p4728_p6 = scmp.lt.s32.totalorder %s105_s5, %s105_s5 }
  0x51   :  { %p4724_p5 = scmp.ne.s32.totalorder %s105_s5, %s4723_s8  ;;  %p4729_p7 = scmp.lt.s32.totalorder %s4723_s8, %s4723_s8 }
  0x53   :  { %p4730_p8 = por %p4729_p7, %p4728_p6 }
  0x55   :  { %p4731_p9 = pnand %p4730_p8, %p4724_p5 }
  0x57   :  { %4734 = shalt.err (!%p4731_p9)
}
  0x58   :  { %s5208_s27 = smov 256   ;;  %s5209_s29 = smov 16  }
  0x59   :  { %110 = dma.hbm_to_vmem [thread:$0]  %s5930_s0, 24576, %s105_s5, [#allocation12], %s5208_s27, %s5208_s27, %s5209_s29  }
  0x5a   :  { %s5210_s21 = smov [#allocation14]   ;;  %s5931_s7 = sld [smem:[#allocation58_spill]] }
  0x5b   :  { %s128_s28 = sshll.u32 %s5210_s21, 4  ;;  %s129_s28 = int_to_ptr.vmem [resolvable:$true] %s128_s28 }
  0x60   :  { %s4735_s23 = scalar_lea.hbm %s5931_s7, 3072 }
  0x61   :  { %p4736_p10 = scmp.ne.s32.totalorder %s5931_s7, %s4735_s23  ;;  %p4739_p11 = scmp.lt.u32.totalorder %s4735_s23, %s5931_s7 }
  0x63   :  { %p4741_p12 = pnand %p4739_p11, %p4736_p10 }
  0x65   :  { %4744 = shalt.err (!%p4741_p12)
}
  0x66   :  { %s4745_s6 = scalar_lea.vmem %s129_s28, 3072  ;;  %p4750_p0 = scmp.lt.s32.totalorder %s129_s28, %s129_s28 }
  0x67   :  { %p4746_p13 = scmp.ne.s32.totalorder %s129_s28, %s4745_s6  ;;  %p4751_p1 = scmp.lt.s32.totalorder %s4745_s6, %s4745_s6 }
  0x69   :  { %p4752_p2 = por %p4751_p1, %p4750_p0 }
  0x6b   :  { %p4753_p3 = pnand %p4752_p2, %p4746_p13 }
  0x6d   :  { %4756 = shalt.err (!%p4753_p3)
}
  0x6e   :  { %s5211_s5 = smov 192   ;;  %s5212_s0 = smov 12  }
  0x6f   :  { %134 = dma.hbm_to_vmem [thread:$0]  %s5931_s7, 3072, %s129_s28, [#allocation15], %s5211_s5, %s5211_s5, %s5212_s0  }
  0x70   :  { %s5213_s4 = smov [#allocation17]   ;;  %s5214_s21 = smov [#allocation20]  }
  0x71   :  { %s150_s1 = sshll.u32 %s5213_s4, 4  ;;  %s172_s26 = sshll.u32 %s5214_s21, 4  ;;  %s151_s1 = int_to_ptr.vmem [resolvable:$true] %s150_s1  ;;  %s5416_s26 = int_to_ptr.vmem [resolvable:$true] %s172_s26 }
  0x72   :  { %s4757_s6 = scalar_lea.hbm %s5882_s9, 1024 }
  0x73   :  { %p4758_p4 = scmp.ne.s32.totalorder %s5882_s9, %s4757_s6  ;;  %p4761_p5 = scmp.lt.u32.totalorder %s4757_s6, %s5882_s9 }
  0x75   :  { %p4763_p6 = pnand %p4761_p5, %p4758_p4 }
  0x77   :  { %4766 = shalt.err (!%p4763_p6)
}
  0x78   :  { %s4767_s28 = scalar_lea.vmem %s151_s1, 1024  ;;  %p4772_p8 = scmp.lt.s32.totalorder %s151_s1, %s151_s1 }
  0x79   :  { %p4768_p7 = scmp.ne.s32.totalorder %s151_s1, %s4767_s28  ;;  %p4773_p9 = scmp.lt.s32.totalorder %s4767_s28, %s4767_s28 }
  0x7b   :  { %p4774_p10 = por %p4773_p9, %p4772_p8 }
  0x7d   :  { %p4775_p11 = pnand %p4774_p10, %p4768_p7 }
  0x7f   :  { %4778 = shalt.err (!%p4775_p11)
}
  0x80   :  { %s5932_s7 = smov 4   ;;  %s5933_s5 = smov 64  }
  0x81   :  { %156 = dma.hbm_to_vmem [thread:$0]  %s5882_s9, 1024, %s151_s1, [#allocation18], %s5933_s5, %s5933_s5, %s5932_s7  }
  0x82   :  { %s4779_s21 = scalar_lea.hbm %s5884_s11, 2048 }
  0x83   :  { %p4780_p12 = scmp.ne.s32.totalorder %s5884_s11, %s4779_s21  ;;  %p4783_p13 = scmp.lt.u32.totalorder %s4779_s21, %s5884_s11 }
  0x85   :  { %p4785_p0 = pnand %p4783_p13, %p4780_p12 }
  0x87   :  { %4788 = shalt.err (!%p4785_p0)
}
  0x88   :  { %s4789_s30 = scalar_lea.vmem %s5416_s26, 2048  ;;  %p4794_p2 = scmp.lt.s32.totalorder %s5416_s26, %s5416_s26 }
  0x89   :  { %p4790_p1 = scmp.ne.s32.totalorder %s5416_s26, %s4789_s30  ;;  %p4795_p3 = scmp.lt.s32.totalorder %s4789_s30, %s4789_s30 }
  0x8b   :  { %p4796_p4 = por %p4795_p3, %p4794_p2 }
  0x8d   :  { %p4797_p5 = pnand %p4796_p4, %p4790_p1 }
  0x8f   :  { %4800 = shalt.err (!%p4797_p5)
}
  0x90   :  { %178 = dma.hbm_to_vmem [thread:$0]  %s5884_s11, 2048, %s5416_s26, [#allocation21], %s5933_s5, %s5933_s5, %s5932_s7  }
  0x91   :  { %s5215_s3 = smov [#allocation23]   ;;  %s5216_s28 = smov [#allocation26]  }
  0x92   :  { %s197_s8 = sshll.u32 %s5215_s3, 4  ;;  %s219_s0 = sshll.u32 %s5216_s28, 4  ;;  %s198_s8 = int_to_ptr.vmem [resolvable:$true] %s197_s8  ;;  %s220_s0 = int_to_ptr.vmem [resolvable:$true] %s219_s0 }
  0x93   :  { %s4801_s4 = scalar_lea.hbm %s5887_s14, 16 }
  0x94   :  { %p4802_p6 = scmp.ne.s32.totalorder %s5887_s14, %s4801_s4  ;;  %p4805_p7 = scmp.lt.u32.totalorder %s4801_s4, %s5887_s14 }
  0x96   :  { %p4807_p8 = pnand %p4805_p7, %p4802_p6 }
  0x98   :  { %4810 = shalt.err (!%p4807_p8)
}
  0x99   :  { %s4811_s11 = scalar_lea.vmem %s198_s8, 16  ;;  %s4815_s26 = scalar_lea.vmem %s198_s8, 32 }
  0x9a   :  { %p4812_p9 = scmp.ne.s32.totalorder %s198_s8, %s4811_s11  ;;  %p4816_p10 = scmp.lt.s32.totalorder %s198_s8, %s198_s8 }
  0x9b   :  { %p4817_p11 = scmp.lt.s32.totalorder %s4815_s26, %s4811_s11 }
  0x9d   :  { %p4818_p12 = por %p4817_p11, %p4816_p10 }
  0x9f   :  { %p4819_p13 = pnand %p4818_p12, %p4812_p9 }
  0xa1   :  { %4822 = shalt.err (!%p4819_p13)
}
  0xa2   :  { %200 = dma.hbm_to_vmem [thread:$0]  %s5887_s14, 16, %s198_s8, [#allocation24]  }
  0xa3   :  { %s4823_s3 = scalar_lea.hbm %s5889_s16, 16 }
  0xa4   :  { %p4824_p0 = scmp.ne.s32.totalorder %s5889_s16, %s4823_s3  ;;  %p4827_p1 = scmp.lt.u32.totalorder %s4823_s3, %s5889_s16 }
  0xa6   :  { %p4829_p2 = pnand %p4827_p1, %p4824_p0 }
  0xa8   :  { %4832 = shalt.err (!%p4829_p2)
}
  0xa9   :  { %s4833_s21 = scalar_lea.vmem %s220_s0, 16  ;;  %s4837_s25 = scalar_lea.vmem %s220_s0, 32 }
  0xaa   :  { %p4834_p3 = scmp.ne.s32.totalorder %s220_s0, %s4833_s21  ;;  %p4838_p4 = scmp.lt.s32.totalorder %s220_s0, %s220_s0 }
  0xab   :  { %p4839_p5 = scmp.lt.s32.totalorder %s4837_s25, %s4833_s21 }
  0xad   :  { %p4840_p6 = por %p4839_p5, %p4838_p4 }
  0xaf   :  { %p4841_p7 = pnand %p4840_p6, %p4834_p3 }
  0xb1   :  { %4844 = shalt.err (!%p4841_p7)
}
  0xb2   :  { %222 = dma.hbm_to_vmem [thread:$0]  %s5889_s16, 16, %s220_s0, [#allocation27]  }
  0xb3   :  { %s5217_s2 = smov [#allocation29]   ;;  %s5218_s11 = smov [#allocation2]  }
  0xb4   :  { %s241_s6 = sshll.u32 %s5217_s2, 4  ;;  %s49_s26 = sshll.u32 %s5218_s11, 4  ;;  %s242_s6 = int_to_ptr.vmem [resolvable:$true] %s241_s6  ;;  %s50_s26 = int_to_ptr.vmem [resolvable:$true] %s49_s26 }
  0xb5   :  { %s4845_s9 = scalar_lea.hbm %s5891_s18, 16 }
  0xb6   :  { %p4846_p8 = scmp.ne.s32.totalorder %s5891_s18, %s4845_s9  ;;  %p4849_p9 = scmp.lt.u32.totalorder %s4845_s9, %s5891_s18 }
  0xb8   :  { %p4851_p10 = pnand %p4849_p9, %p4846_p8 }
  0xba   :  { %4854 = shalt.err (!%p4851_p10)
}
  0xbb   :  { %s4855_s16 = scalar_lea.vmem %s242_s6, 16  ;;  %s4859_s0 = scalar_lea.vmem %s242_s6, 32 }
  0xbc   :  { %p4856_p11 = scmp.ne.s32.totalorder %s242_s6, %s4855_s16  ;;  %p4860_p12 = scmp.lt.s32.totalorder %s242_s6, %s242_s6 }
  0xbd   :  { %p4861_p13 = scmp.lt.s32.totalorder %s4859_s0, %s4855_s16 }
  0xbf   :  { %p4862_p0 = por %p4861_p13, %p4860_p12 }
  0xc1   :  { %p4863_p1 = pnand %p4862_p0, %p4856_p11 }
  0xc3   :  { %4866 = shalt.err (!%p4863_p1)
}
  0xc4   :  { %244 = dma.hbm_to_vmem [thread:$0]  %s5891_s18, 16, %s242_s6, [#allocation30]  }
  0xc5   :  { %s5934_s14 = sld [smem:[#allocation51_spill]] }
  0xcb   :  { %s4867_s8 = scalar_lea.hbm %s5934_s14, 128 }
  0xcc   :  { %p4868_p2 = scmp.ne.s32.totalorder %s5934_s14, %s4867_s8  ;;  %p4871_p3 = scmp.lt.u32.totalorder %s4867_s8, %s5934_s14 }
  0xce   :  { %p4873_p4 = pnand %p4871_p3, %p4868_p2 }
  0xd0   :  { %4876 = shalt.err (!%p4873_p4)
}
  0xd1   :  { %s4877_s9 = scalar_lea.vmem %s50_s26, 128  ;;  %p4882_p6 = scmp.lt.s32.totalorder %s50_s26, %s50_s26 }
  0xd2   :  { %p4878_p5 = scmp.ne.s32.totalorder %s50_s26, %s4877_s9  ;;  %p4883_p7 = scmp.lt.s32.totalorder %s4877_s9, %s4877_s9 }
  0xd4   :  { %p4884_p8 = por %p4883_p7, %p4882_p6 }
  0xd6   :  { %p4885_p9 = pnand %p4884_p8, %p4878_p5 }
  0xd8   :  { %4888 = shalt.err (!%p4885_p9)
}
  0xd9   :  { %52 = dma.hbm_to_vmem [thread:$0]  %s5934_s14, 128, %s50_s26, [#allocation3]  }
  0xda   :  { %s5219_s1 = smov [#allocation7]   ;;  %s5220_s28 = smov [#allocation10]  }
  0xdb   :  { %s70_s3 = sshll.u32 %s5219_s1, 4  ;;  %s95_s27 = sshll.u32 %s5220_s28, 4  ;;  %s71_s3 = int_to_ptr.vmem [resolvable:$true] %s70_s3  ;;  %s96_s27 = int_to_ptr.vmem [resolvable:$true] %s95_s27 }
  0xdc   :  { %s5935_s29 = sld [smem:[#allocation53_spill]] }
  0xe2   :  { %s4889_s4 = scalar_lea.hbm %s5935_s29, 384 }
  0xe3   :  { %p4890_p10 = scmp.ne.s32.totalorder %s5935_s29, %s4889_s4  ;;  %p4893_p11 = scmp.lt.u32.totalorder %s4889_s4, %s5935_s29 }
  0xe5   :  { %p4895_p12 = pnand %p4893_p11, %p4890_p10 }
  0xe7   :  { %4898 = shalt.err (!%p4895_p12)
}
  0xe8   :  { %s4899_s26 = scalar_lea.vmem %s71_s3, 384  ;;  %p4904_p0 = scmp.lt.s32.totalorder %s71_s3, %s71_s3 }
  0xe9   :  { %p4900_p13 = scmp.ne.s32.totalorder %s71_s3, %s4899_s26  ;;  %p4905_p1 = scmp.lt.s32.totalorder %s4899_s26, %s4899_s26 }
  0xeb   :  { %p4906_p2 = por %p4905_p1, %p4904_p0 }
  0xed   :  { %p4907_p3 = pnand %p4906_p2, %p4900_p13 }
  0xef   :  { %4910 = shalt.err (!%p4907_p3)
}
  0xf0   :  { %s5936_s14 = smov 8   ;;  %s5937_s11 = smov 128  }
  0xf1   :  { %76 = dma.hbm_to_vmem [thread:$0]  %s5935_s29, 384, %s71_s3, [#allocation6], %s5937_s11, %s5937_s11, %s5936_s14  }
  0xf2   :  { %s5938_s6 = sld [smem:[#allocation55_spill]] }
  0xf8   :  { %s4911_s1 = scalar_lea.hbm %s5938_s6, 16 }
  0xf9   :  { %p4912_p4 = scmp.ne.s32.totalorder %s5938_s6, %s4911_s1  ;;  %p4915_p5 = scmp.lt.u32.totalorder %s4911_s1, %s5938_s6 }
  0xfb   :  { %p4917_p6 = pnand %p4915_p5, %p4912_p4 }
  0xfd   :  { %4920 = shalt.err (!%p4917_p6)
}
  0xfe   :  { %s4921_s21 = scalar_lea.vmem %s96_s27, 16  ;;  %s4925_s25 = scalar_lea.vmem %s96_s27, 32 }
  0xff   :  { %p4922_p7 = scmp.ne.s32.totalorder %s96_s27, %s4921_s21  ;;  %p4926_p8 = scmp.lt.s32.totalorder %s96_s27, %s96_s27 }
 0x100   :  { %p4927_p9 = scmp.lt.s32.totalorder %s4925_s25, %s4921_s21 }
 0x102   :  { %p4928_p10 = por %p4927_p9, %p4926_p8 }
 0x104   :  { %p4929_p11 = pnand %p4928_p10, %p4922_p7 }
 0x106   :  { %4932 = shalt.err (!%p4929_p11)
}
 0x107   :  { %98 = dma.hbm_to_vmem [thread:$0]  %s5938_s6, 16, %s96_s27, [#allocation9]  }
 0x108   :  { %s5221_s8 = smov [#allocation13]   ;;  %s5222_s26 = smov [#allocation16]  }
 0x109   :  { %s116_s2 = sshll.u32 %s5221_s8, 4  ;;  %s141_s23 = sshll.u32 %s5222_s26, 4  ;;  %s117_s2 = int_to_ptr.vmem [resolvable:$true] %s116_s2  ;;  %s142_s23 = int_to_ptr.vmem [resolvable:$true] %s141_s23 }
 0x10a   :  { %s5939_s18 = sld [smem:[#allocation57_spill]] }
 0x110   :  { %s4933_s1 = scalar_lea.hbm %s5939_s18, 192 }
 0x111   :  { %p4934_p12 = scmp.ne.s32.totalorder %s5939_s18, %s4933_s1  ;;  %p4937_p13 = scmp.lt.u32.totalorder %s4933_s1, %s5939_s18 }
 0x113   :  { %p4939_p0 = pnand %p4937_p13, %p4934_p12 }
 0x115   :  { %4942 = shalt.err (!%p4939_p0)
}
 0x116   :  { %s4943_s27 = scalar_lea.vmem %s117_s2, 192  ;;  %p4948_p2 = scmp.lt.s32.totalorder %s117_s2, %s117_s2 }
 0x117   :  { %p4944_p1 = scmp.ne.s32.totalorder %s117_s2, %s4943_s27  ;;  %p4949_p3 = scmp.lt.s32.totalorder %s4943_s27, %s4943_s27 }
 0x119   :  { %p4950_p4 = por %p4949_p3, %p4948_p2 }
 0x11b   :  { %p4951_p5 = pnand %p4950_p4, %p4944_p1 }
 0x11d   :  { %4954 = shalt.err (!%p4951_p5)
}
 0x11e   :  { %122 = dma.hbm_to_vmem [thread:$0]  %s5939_s18, 192, %s117_s2, [#allocation12], %s5933_s5, %s5933_s5, %s5932_s7  }
 0x11f   :  { %s5940_s29 = sld [smem:[#allocation59_spill]] }
 0x125   :  { %s4955_s8 = scalar_lea.hbm %s5940_s29, 48 }
 0x126   :  { %p4956_p6 = scmp.ne.s32.totalorder %s5940_s29, %s4955_s8  ;;  %p4959_p7 = scmp.lt.u32.totalorder %s4955_s8, %s5940_s29 }
 0x128   :  { %p4961_p8 = pnand %p4959_p7, %p4956_p6 }
 0x12a   :  { %4964 = shalt.err (!%p4961_p8)
}
 0x12b   :  { %s4965_s28 = scalar_lea.vmem %s142_s23, 48  ;;  %s4969_s16 = scalar_lea.vmem %s142_s23, 64 }
 0x12c   :  { %p4966_p9 = scmp.ne.s32.totalorder %s142_s23, %s4965_s28  ;;  %p4970_p10 = scmp.lt.s32.totalorder %s142_s23, %s142_s23 }
 0x12d   :  { %p4971_p11 = scmp.lt.s32.totalorder %s4969_s16, %s4965_s28 }
 0x12f   :  { %p4972_p12 = por %p4971_p11, %p4970_p10 }
 0x131   :  { %p4973_p13 = pnand %p4972_p12, %p4966_p9 }
 0x133   :  { %4976 = shalt.err (!%p4973_p13)
}
 0x134   :  { %144 = dma.hbm_to_vmem [thread:$0]  %s5940_s29, 48, %s142_s23, [#allocation15]  }
 0x135   :  { %s5223_s0 = smov [#allocation19]   ;;  %s5224_s27 = smov [#allocation22]  }
 0x136   :  { %s163_s4 = sshll.u32 %s5223_s0, 4  ;;  %s185_s6 = sshll.u32 %s5224_s27, 4  ;;  %s164_s4 = int_to_ptr.vmem [resolvable:$true] %s163_s4  ;;  %s186_s6 = int_to_ptr.vmem [resolvable:$true] %s185_s6 }
 0x137   :  { %s4977_s3 = scalar_lea.hbm %s5883_s10, 16 }
 0x138   :  { %p4978_p0 = scmp.ne.s32.totalorder %s5883_s10, %s4977_s3  ;;  %p4981_p1 = scmp.lt.u32.totalorder %s4977_s3, %s5883_s10 }
 0x13a   :  { %p4983_p2 = pnand %p4981_p1, %p4978_p0 }
 0x13c   :  { %4986 = shalt.err (!%p4983_p2)
}
 0x13d   :  { %s4987_s23 = scalar_lea.vmem %s164_s4, 16  ;;  %s4991_s29 = scalar_lea.vmem %s164_s4, 32 }
 0x13e   :  { %p4988_p3 = scmp.ne.s32.totalorder %s164_s4, %s4987_s23  ;;  %p4992_p4 = scmp.lt.s32.totalorder %s164_s4, %s164_s4 }
 0x13f   :  { %p4993_p5 = scmp.lt.s32.totalorder %s4991_s29, %s4987_s23 }
 0x141   :  { %p4994_p6 = por %p4993_p5, %p4992_p4 }
 0x143   :  { %p4995_p7 = pnand %p4994_p6, %p4988_p3 }
 0x145   :  { %4998 = shalt.err (!%p4995_p7)
}
 0x146   :  { %166 = dma.hbm_to_vmem [thread:$0]  %s5883_s10, 16, %s164_s4, [#allocation18]  }
 0x147   :  { %s4999_s18 = scalar_lea.hbm %s5885_s12, 16 }
 0x148   :  { %p5000_p8 = scmp.ne.s32.totalorder %s5885_s12, %s4999_s18  ;;  %p5003_p9 = scmp.lt.u32.totalorder %s4999_s18, %s5885_s12 }
 0x14a   :  { %p5005_p10 = pnand %p5003_p9, %p5000_p8 }
 0x14c   :  { %5008 = shalt.err (!%p5005_p10)
}
 0x14d   :  { %s5009_s3 = scalar_lea.vmem %s186_s6, 16  ;;  %s5013_s8 = scalar_lea.vmem %s186_s6, 32 }
 0x14e   :  { %p5010_p11 = scmp.ne.s32.totalorder %s186_s6, %s5009_s3  ;;  %p5014_p12 = scmp.lt.s32.totalorder %s186_s6, %s186_s6 }
 0x14f   :  { %p5015_p13 = scmp.lt.s32.totalorder %s5013_s8, %s5009_s3 }
 0x151   :  { %p5016_p0 = por %p5015_p13, %p5014_p12 }
 0x153   :  { %p5017_p1 = pnand %p5016_p0, %p5010_p11 }
 0x155   :  { %5020 = shalt.err (!%p5017_p1)
}
 0x156   :  { %188 = dma.hbm_to_vmem [thread:$0]  %s5885_s12, 16, %s186_s6, [#allocation21]  }
 0x157   :  { %s5225_s26 = smov [#allocation25]   ;;  %s5226_s9 = smov [#allocation28]  }
 0x158   :  { %s206_s30 = sshll.u32 %s5225_s26, 4  ;;  %s228_s23 = sshll.u32 %s5226_s9, 4  ;;  %s207_s30 = int_to_ptr.vmem [resolvable:$true] %s206_s30  ;;  %s5579_s23 = int_to_ptr.vmem [resolvable:$true] %s228_s23 }
 0x159   :  { %s5021_s28 = scalar_lea.hbm %s5888_s15, 1024 }
 0x15a   :  { %p5022_p2 = scmp.ne.s32.totalorder %s5888_s15, %s5021_s28  ;;  %p5025_p3 = scmp.lt.u32.totalorder %s5021_s28, %s5888_s15 }
 0x15c   :  { %p5027_p4 = pnand %p5025_p3, %p5022_p2 }
 0x15e   :  { %5030 = shalt.err (!%p5027_p4)
}
 0x15f   :  { %s5031_s12 = scalar_lea.vmem %s207_s30, 1024  ;;  %p5036_p6 = scmp.lt.s32.totalorder %s207_s30, %s207_s30 }
 0x160   :  { %p5032_p5 = scmp.ne.s32.totalorder %s207_s30, %s5031_s12  ;;  %p5037_p7 = scmp.lt.s32.totalorder %s5031_s12, %s5031_s12 }
 0x162   :  { %p5038_p8 = por %p5037_p7, %p5036_p6 }
 0x164   :  { %p5039_p9 = pnand %p5038_p8, %p5032_p5 }
 0x166   :  { %5042 = shalt.err (!%p5039_p9)
}
 0x167   :  { %212 = dma.hbm_to_vmem [thread:$0]  %s5888_s15, 1024, %s207_s30, [#allocation24], %s5933_s5, %s5933_s5, %s5932_s7  }
 0x168   :  { %s5043_s3 = scalar_lea.hbm %s5890_s17, 2048 }
 0x169   :  { %p5044_p10 = scmp.ne.s32.totalorder %s5890_s17, %s5043_s3  ;;  %p5047_p11 = scmp.lt.u32.totalorder %s5043_s3, %s5890_s17 }
 0x16b   :  { %p5049_p12 = pnand %p5047_p11, %p5044_p10 }
 0x16d   :  { %5052 = shalt.err (!%p5049_p12)
}
 0x16e   :  { %s5053_s9 = scalar_lea.vmem %s5579_s23, 2048  ;;  %p5058_p0 = scmp.lt.s32.totalorder %s5579_s23, %s5579_s23 }
 0x16f   :  { %p5054_p13 = scmp.ne.s32.totalorder %s5579_s23, %s5053_s9  ;;  %p5059_p1 = scmp.lt.s32.totalorder %s5053_s9, %s5053_s9 }
 0x171   :  { %p5060_p2 = por %p5059_p1, %p5058_p0 }
 0x173   :  { %p5061_p3 = pnand %p5060_p2, %p5054_p13 }
 0x175   :  { %5064 = shalt.err (!%p5061_p3)
}
 0x176   :  { %234 = dma.hbm_to_vmem [thread:$0]  %s5890_s17, 2048, %s5579_s23, [#allocation27], %s5933_s5, %s5933_s5, %s5932_s7  }
 0x177   :  { %s5227_s29 = smov [#allocation31]   ;;  %s5228_s28 = smov [#allocation32]  }
 0x178   :  { %s250_s1 = sshll.u32 %s5227_s29, 4  ;;  %s263_s16 = sshll.u32 %s5228_s28, 4  ;;  %s251_s1 = int_to_ptr.vmem [resolvable:$true] %s250_s1  ;;  %s264_s16 = int_to_ptr.vmem [resolvable:$true] %s263_s16 }
 0x179   :  { %s5065_s0 = scalar_lea.hbm %s5892_s19, 1024 }
 0x17a   :  { %p5066_p4 = scmp.ne.s32.totalorder %s5892_s19, %s5065_s0  ;;  %p5069_p5 = scmp.lt.u32.totalorder %s5065_s0, %s5892_s19 }
 0x17c   :  { %p5071_p6 = pnand %p5069_p5, %p5066_p4 }
 0x17e   :  { %5074 = shalt.err (!%p5071_p6)
}
 0x17f   :  { %s5075_s17 = scalar_lea.vmem %s251_s1, 1024  ;;  %p5080_p8 = scmp.lt.s32.totalorder %s251_s1, %s251_s1 }
 0x180   :  { %p5076_p7 = scmp.ne.s32.totalorder %s251_s1, %s5075_s17  ;;  %p5081_p9 = scmp.lt.s32.totalorder %s5075_s17, %s5075_s17 }
 0x182   :  { %p5082_p10 = por %p5081_p9, %p5080_p8 }
 0x184   :  { %p5083_p11 = pnand %p5082_p10, %p5076_p7 }
 0x186   :  { %5086 = shalt.err (!%p5083_p11)
}
 0x187   :  { %256 = dma.hbm_to_vmem [thread:$0]  %s5892_s19, 1024, %s251_s1, [#allocation30], %s5933_s5, %s5933_s5, %s5932_s7  }
 0x188   :  { %s5087_s10 = scalar_lea.hbm %s5893_s20, 16 }
 0x189   :  { %p5088_p12 = scmp.ne.s32.totalorder %s5893_s20, %s5087_s10  ;;  %p5091_p13 = scmp.lt.u32.totalorder %s5087_s10, %s5893_s20 }
 0x18b   :  { %p5093_p0 = pnand %p5091_p13, %p5088_p12 }
 0x18d   :  { %5096 = shalt.err (!%p5093_p0)
}
 0x18e   :  { %s5097_s30 = scalar_lea.vmem %s264_s16, 16  ;;  %s5101_s29 = scalar_lea.vmem %s264_s16, 32 }
 0x18f   :  { %p5098_p1 = scmp.ne.s32.totalorder %s264_s16, %s5097_s30  ;;  %p5102_p2 = scmp.lt.s32.totalorder %s264_s16, %s264_s16 }
 0x190   :  { %p5103_p3 = scmp.lt.s32.totalorder %s5101_s29, %s5097_s30 }
 0x192   :  { %p5104_p4 = por %p5103_p3, %p5102_p2 }
 0x194   :  { %p5105_p5 = pnand %p5104_p4, %p5098_p1 }
 0x196   :  { %5108 = shalt.err (!%p5105_p5)
}
 0x197   :  { %266 = dma.hbm_to_vmem [thread:$0]  %s5893_s20, 16, %s264_s16, [#allocation33]  }
 0x198   :  { %5175 = dma.done.wait [#allocation3], 128  }
 0x199   :  { %5176 = vsyncadd [#allocation3], 4294967168 }
 0x19a   :  { %5177 = dma.done.wait [#allocation6], 768  }
 0x19b   :  { %5178 = vsyncadd [#allocation6], 4294966528 }
 0x19c   :  { %5179 = dma.done.wait [#allocation9], 528  }
 0x19d   :  { %5180 = vsyncadd [#allocation9], 4294966768 }
 0x19e   :  { %5181 = dma.done.wait [#allocation12], 24768  }
 0x19f   :  { %5182 = vsyncadd [#allocation12], 4294942528 }
 0x1a0   :  { %5183 = dma.done.wait [#allocation15], 3120  }
 0x1a1   :  { %5184 = vsyncadd [#allocation15], 4294964176 }
 0x1a2   :  { %5185 = dma.done.wait [#allocation18], 1040  }
 0x1a3   :  { %5186 = vsyncadd [#allocation18], 4294966256 }
 0x1a4   :  { %5187 = dma.done.wait [#allocation21], 2064  }
 0x1a5   :  { %5188 = vsyncadd [#allocation21], 4294965232 }
 0x1a6   :  { %5189 = dma.done.wait [#allocation24], 1040  }
 0x1a7   :  { %5190 = vsyncadd [#allocation24], 4294966256 }
 0x1a8   :  { %5191 = dma.done.wait [#allocation27], 2064  }
 0x1a9   :  { %5192 = vsyncadd [#allocation27], 4294965232 }
 0x1aa   :  { %5193 = dma.done.wait [#allocation30], 1040  }
 0x1ab   :  { %5194 = vsyncadd [#allocation30], 4294966256 }
 0x1ac   :  { %5195 = dma.done.wait [#allocation33], 16  }
 0x1ad   :  { %5196 = vsyncadd [#allocation33], 4294967280  ;;  %v5229_v0 = vmov 0.0   ;;  %vm5230_vm0 = vmmov 0   ;;  %v4213_v1 = vld [vmem:[#allocation8] sm:$0xff]   ;;  %v4214_v2 = vld [vmem:[#allocation8 + $0x8] sm:$0xff]  }
 0x1ae   :  { %4017 = vmatprep.subr.bf16.mxu0 %v5229_v0  ;;  %4025 = vmatprep.mubr.msk.bf16.mxu0 %vm5230_vm0, %v5229_v0  ;;  %v4217_v3 = vld [vmem:[#allocation11 + $0x4] ss:$16 sps:$4 sm:$0xff]   ;;  %v4222_v5 = vld [vmem:[#allocation11] ss:$16 sps:$4 sm:$0xff]   ;;  %v4221_v11 = vld [vmem:[#allocation11 + $0xc] ss:$16 sps:$4 sm:$0xff]  }
 0x1af   :  { %4018 = vmatpush3.bf16.msra.mxu0 %v4213_v1  ;;  %v4215_v4 = vld [vmem:[#allocation8 + $0x10] sm:$0xff]   ;;  %824 = vmatprep.subr.bf16.mxu1 %v4217_v3  ;;  %v4216_v7 = vld [vmem:[#allocation8 + $0x18] sm:$0xff]   ;;  %v328_v8 = vld [vmem:[#allocation2] sm:$0xff]  ;;  %vm369_vm1 = vcmask 523264   ;;  %vm2281_vm2 = vcmask 261120   ;;  %s5232_s20 = smov 96  }
 0x1b0   :  { %4019 = vmatprep.subr.bf16.mxu0 %v5229_v0  ;;  %v4223_v6 = vld [vmem:[#allocation11 + $0x24] ss:$16 sps:$4 sm:$0xff]   ;;  %825 = vmatpush1.bf16.msra.mxu1 %v4222_v5  ;;  %v4228_v9 = vld [vmem:[#allocation11 + $0x20] ss:$16 sps:$4 sm:$0xff]   ;;  %v337_v13 = vpack.c.bf16 %v328_v8, %v328_v8  ;;  %v4219_v15 = vld [vmem:[#allocation11 + $0x8] ss:$16 sps:$4 sm:$0xff]  }
 0x1b1   :  { %826 = vmatprep.subr.bf16.mxu1 %v4223_v6  ;;  %v4229_v10 = vld [vmem:[#allocation11 + $0x44] ss:$16 sps:$4 sm:$0xff]   ;;  %v4234_v12 = vld [vmem:[#allocation11 + $0x40] ss:$16 sps:$4 sm:$0xff]   ;;  %v4227_v16 = vld [vmem:[#allocation11 + $0x2c] ss:$16 sps:$4 sm:$0xff]  }
 0x1b2   :  { %v4235_v14 = vld [vmem:[#allocation11 + $0x64] ss:$16 sps:$4 sm:$0xff]   ;;  %v4240_v17 = vld [vmem:[#allocation11 + $0x60] ss:$16 sps:$4 sm:$0xff]   ;;  %v4225_v19 = vld [vmem:[#allocation11 + $0x28] ss:$16 sps:$4 sm:$0xff]  }
 0x1b3   :  { %4020 = vmatpush3.bf16.msra.mxu0 %v4214_v2  ;;  %v4241_v18 = vld [vmem:[#allocation11 + $0x84] ss:$16 sps:$4 sm:$0xff]   ;;  %v4233_v20 = vld [vmem:[#allocation11 + $0x4c] ss:$16 sps:$4 sm:$0xff]   ;;  %v4246_v21 = vld [vmem:[#allocation11 + $0x80] ss:$16 sps:$4 sm:$0xff]  }
 0x1b4   :  { %4021 = vmatprep.subr.bf16.mxu0 %v5229_v0  ;;  %827 = vmatpush1.bf16.msra.mxu1 %v4228_v9  ;;  %v4247_v22 = vld [vmem:[#allocation11 + $0xa4] ss:$16 sps:$4 sm:$0xff]   ;;  %v4231_v23 = vld [vmem:[#allocation11 + $0x48] ss:$16 sps:$4 sm:$0xff]   ;;  %v4239_v24 = vld [vmem:[#allocation11 + $0x6c] ss:$16 sps:$4 sm:$0xff]  }
 0x1b5   :  { %828 = vmatprep.subr.bf16.mxu1 %v4229_v10  ;;  %v4252_v25 = vld [vmem:[#allocation11 + $0xa0] ss:$16 sps:$4 sm:$0xff]   ;;  %v4253_v26 = vld [vmem:[#allocation11 + $0xc4] ss:$16 sps:$4 sm:$0xff]   ;;  %v4237_v27 = vld [vmem:[#allocation11 + $0x68] ss:$16 sps:$4 sm:$0xff]  }
 0x1b6   :  { %v4245_v28 = vld [vmem:[#allocation11 + $0x8c] ss:$16 sps:$4 sm:$0xff]   ;;  %v4258_v29 = vld [vmem:[#allocation11 + $0xc0] ss:$16 sps:$4 sm:$0xff]   ;;  %v4259_v30 = vld [vmem:[#allocation11 + $0xe4] ss:$16 sps:$4 sm:$0xff]  }
 0x1b7   :  { %4022 = vmatpush3.bf16.msra.mxu0 %v4215_v4  ;;  %v4243_v31 = vld [vmem:[#allocation11 + $0x88] ss:$16 sps:$4 sm:$0xff]   ;;  %v4251_v32 = vld [vmem:[#allocation11 + $0xac] ss:$16 sps:$4 sm:$0xff]   ;;  %v4264_v33 = vld [vmem:[#allocation11 + $0xe0] ss:$16 sps:$4 sm:$0xff]  }
 0x1b8   :  { %4023 = vmatprep.subr.bf16.mxu0 %v5229_v0  ;;  %829 = vmatpush1.bf16.msra.mxu1 %v4234_v12  ;;  %v4265_v34 = vld [vmem:[#allocation11 + $0x104] ss:$16 sps:$4 sm:$0xff]   ;;  %v4249_v35 = vld [vmem:[#allocation11 + $0xa8] ss:$16 sps:$4 sm:$0xff]   ;;  %v4257_v36 = vld [vmem:[#allocation11 + $0xcc] ss:$16 sps:$4 sm:$0xff]  }
 0x1b9   :  { %830 = vmatprep.subr.bf16.mxu1 %v4235_v14  ;;  %v4270_v37 = vld [vmem:[#allocation11 + $0x100] ss:$16 sps:$4 sm:$0xff]   ;;  %v4271_v38 = vld [vmem:[#allocation11 + $0x124] ss:$16 sps:$4 sm:$0xff]   ;;  %v4255_v39 = vld [vmem:[#allocation11 + $0xc8] ss:$16 sps:$4 sm:$0xff]  }
 0x1ba   :  { %v4263_v40 = vld [vmem:[#allocation11 + $0xec] ss:$16 sps:$4 sm:$0xff]   ;;  %v4276_v41 = vld [vmem:[#allocation11 + $0x120] ss:$16 sps:$4 sm:$0xff]   ;;  %v4277_v42 = vld [vmem:[#allocation11 + $0x144] ss:$16 sps:$4 sm:$0xff]  }
 0x1bb   :  { %4024 = vmatpush3.bf16.msra.mxu0 %v4216_v7  ;;  %v4261_v43 = vld [vmem:[#allocation11 + $0xe8] ss:$16 sps:$4 sm:$0xff]   ;;  %v4269_v44 = vld [vmem:[#allocation11 + $0x10c] ss:$16 sps:$4 sm:$0xff]   ;;  %v4282_v45 = vld [vmem:[#allocation11 + $0x140] ss:$16 sps:$4 sm:$0xff]  }
 0x1bc   :  { %865 = vmatprep.subr.bf16.mxu0 %v4221_v11  ;;  %831 = vmatpush1.bf16.msra.mxu1 %v4240_v17  ;;  %v4267_v46 = vld [vmem:[#allocation11 + $0x108] ss:$16 sps:$4 sm:$0xff]   ;;  %v4283_v47 = vld [vmem:[#allocation11 + $0x164] ss:$16 sps:$4 sm:$0xff]   ;;  %v4275_v48 = vld [vmem:[#allocation11 + $0x12c] ss:$16 sps:$4 sm:$0xff]  }
 0x1bd   :  { %832 = vmatprep.subr.bf16.mxu1 %v4241_v18  ;;  %v4288_v49 = vld [vmem:[#allocation11 + $0x160] ss:$16 sps:$4 sm:$0xff]   ;;  %v4289_v50 = vld [vmem:[#allocation11 + $0x184] ss:$16 sps:$4 sm:$0xff]   ;;  %v4273_v51 = vld [vmem:[#allocation11 + $0x128] ss:$16 sps:$4 sm:$0xff]  }
 0x1be   :  { %4026 = vmatmul.mubr.msk.bf16.vlgmr.msra.gmra.mrb[0].mxu0 %vm369_vm1, %v337_v13  ;;  %v4281_v52 = vld [vmem:[#allocation11 + $0x14c] ss:$16 sps:$4 sm:$0xff]   ;;  %v4294_v53 = vld [vmem:[#allocation11 + $0x180] ss:$16 sps:$4 sm:$0xff]   ;;  %v4295_v54 = vld [vmem:[#allocation11 + $0x1a4] ss:$16 sps:$4 sm:$0xff]  }
 0x1bf   :  { %866 = vmatpush1.bf16.msra.mxu0 %v4219_v15  ;;  %v4279_v55 = vld [vmem:[#allocation11 + $0x148] ss:$16 sps:$4 sm:$0xff]   ;;  %v4287_v56 = vld [vmem:[#allocation11 + $0x16c] ss:$16 sps:$4 sm:$0xff]   ;;  %v4300_v57 = vld [vmem:[#allocation11 + $0x1a0] ss:$16 sps:$4 sm:$0xff]  }
 0x1c0   :  { %867 = vmatprep.subr.bf16.mxu0 %v4227_v16  ;;  %833 = vmatpush1.bf16.msra.mxu1 %v4246_v21  ;;  %v4301_v58 = vld [vmem:[#allocation11 + $0x1c4] ss:$16 sps:$4 sm:$0xff]   ;;  %v4285_v59 = vld [vmem:[#allocation11 + $0x168] ss:$16 sps:$4 sm:$0xff]   ;;  %v4293_v60 = vld [vmem:[#allocation11 + $0x18c] ss:$16 sps:$4 sm:$0xff]  }
 0x1c1   :  { %834 = vmatprep.subr.bf16.mxu1 %v4247_v22  ;;  %v4291_v61 = vld [vmem:[#allocation11 + $0x188] ss:$16 sps:$4 sm:$0xff]   ;;  %v4299_v62 = vld [vmem:[#allocation11 + $0x1ac] ss:$16 sps:$4 sm:$0xff]   ;;  %v4306_v3 = vld [vmem:[#allocation11 + $0x1c0] ss:$16 sps:$4 sm:$0xff]  }
 0x1c2   :  { %v4297_v63 = vld [vmem:[#allocation11 + $0x1a8] ss:$16 sps:$4 sm:$0xff]   ;;  %v4305_v1 = vld [vmem:[#allocation11 + $0x1cc] ss:$16 sps:$4 sm:$0xff]   ;;  %v4307_v4 = vld [vmem:[#allocation11 + $0x1e4] ss:$16 sps:$4 sm:$0xff]  }
 0x1c3   :  { %868 = vmatpush1.bf16.msra.mxu0 %v4225_v19  ;;  %v4303_v2 = vld [vmem:[#allocation11 + $0x1c8] ss:$16 sps:$4 sm:$0xff]   ;;  %v4311_v5 = vld [vmem:[#allocation11 + $0x1ec] ss:$16 sps:$4 sm:$0xff]   ;;  %v4312_v7 = vld [vmem:[#allocation11 + $0x1e0] ss:$16 sps:$4 sm:$0xff]  }
 0x1c4   :  { %869 = vmatprep.subr.bf16.mxu0 %v4233_v20  ;;  %835 = vmatpush1.bf16.msra.mxu1 %v4252_v25  ;;  %v4309_v6 = vld [vmem:[#allocation11 + $0x1e8] ss:$16 sps:$4 sm:$0xff]   ;;  %v414_v8 = vld [vmem:[#allocation5] sm:$0xff]  ;;  %v3597_v12 = vld [vmem:[#allocation10] ss:$0 sm:$0xff]  ;;  %s5233_s1 = smov 32  }
 0x1c5   :  { %836 = vmatprep.subr.bf16.mxu1 %v4253_v26  ;;  %v481_v9 = vpack.c.bf16 %v414_v8, %v414_v8  ;;  %v4315_v10 = vld [vmem:[#allocation11 + $0x204] ss:$16 sps:$4 sm:$0xff]   ;;  %v4318_v11 = vld [vmem:[#allocation11 + $0x20c] ss:$16 sps:$4 sm:$0xff]   ;;  %v4313_v19 = vld [vmem:[#allocation11 + $0x200] ss:$16 sps:$4 sm:$0xff]  }
 0x1c6   :  { %v4316_v20 = vld [vmem:[#allocation11 + $0x208] ss:$16 sps:$4 sm:$0xff]   ;;  %v4321_v22 = vld [vmem:[#allocation11 + $0x224] ss:$16 sps:$4 sm:$0xff]   ;;  %v4391_v8 = vld [vmem:[#allocation11 + $0x3a0] ss:$16 sps:$4 sm:$0xff]  }
 0x1c7   :  { %870 = vmatpush1.bf16.msra.mxu0 %v4231_v23  ;;  %856 = vmatprep.mubr.bf16.mxu1 %v481_v9  ;;  %v4324_v23 = vld [vmem:[#allocation11 + $0x22c] ss:$16 sps:$4 sm:$0xff]   ;;  %v4322_v25 = vld [vmem:[#allocation11 + $0x228] ss:$16 sps:$4 sm:$0xff]   ;;  %v4327_v26 = vld [vmem:[#allocation11 + $0x244] ss:$16 sps:$4 sm:$0xff]  }
 0x1c8   :  { %871 = vmatprep.subr.bf16.mxu0 %v4239_v24  ;;  %837 = vmatpush1.bf16.msra.mxu1 %v4258_v29  ;;  %v4319_v24 = vld [vmem:[#allocation11 + $0x220] ss:$16 sps:$4 sm:$0xff]   ;;  %v4328_v29 = vld [vmem:[#allocation11 + $0x248] ss:$16 sps:$4 sm:$0xff]   ;;  %vm2522_vm3 = vcmask 1043456   ;;  %vm2466_vm4 = vcmask 64512  }
 0x1c9   :  { %838 = vmatprep.subr.bf16.mxu1 %v4259_v30  ;;  %897 = vmatprep.mubr.bf16.mxu0 %v481_v9  ;;  %v4333_v30 = vld [vmem:[#allocation11 + $0x264] ss:$16 sps:$4 sm:$0xff]   ;;  %v4394_v9 = vld [vmem:[#allocation11 + $0x3a8] ss:$16 sps:$4 sm:$0xff]   ;;  %vm2718_vm5 = vcmask 785408   ;;  %s5234_s26 = smov [#allocation35]  }
 0x1ca   :  { %s3552_s9 = sshll.u32 %s5234_s26, 4  ;;  %s3553_s9 = int_to_ptr.vmem [resolvable:$true] %s3552_s9 }
 0x1cb   :  { %872 = vmatpush1.bf16.msra.mxu0 %v4237_v27  ;;  %v4330_v27 = vld [vmem:[#allocation11 + $0x24c] ss:$16 sps:$4 sm:$0xff]   ;;  %p5114_p7 = scmp.lt.s32.totalorder %s3553_s9, %s3553_s9 }
 0x1cc   :  { %873 = vmatprep.subr.bf16.mxu0 %v4245_v28  ;;  %839 = vmatpush1.bf16.msra.mxu1 %v4264_v33  ;;  %v4325_v28 = vld [vmem:[#allocation11 + $0x240] ss:$16 sps:$4 sm:$0xff]   ;;  %v4334_v33 = vld [vmem:[#allocation11 + $0x268] ss:$16 sps:$4 sm:$0xff]  }
 0x1cd   :  { %840 = vmatprep.subr.bf16.mxu1 %v4265_v34  ;;  %v4339_v34 = vld [vmem:[#allocation11 + $0x284] ss:$16 sps:$4 sm:$0xff]  }
 0x1cf   :  { %874 = vmatpush1.bf16.msra.mxu0 %v4243_v31  ;;  %v4336_v31 = vld [vmem:[#allocation11 + $0x26c] ss:$16 sps:$4 sm:$0xff]  }
 0x1d0   :  { %875 = vmatprep.subr.bf16.mxu0 %v4251_v32  ;;  %841 = vmatpush1.bf16.msra.mxu1 %v4270_v37  ;;  %v4331_v32 = vld [vmem:[#allocation11 + $0x260] ss:$16 sps:$4 sm:$0xff]   ;;  %v4340_v37 = vld [vmem:[#allocation11 + $0x288] ss:$16 sps:$4 sm:$0xff]  }
 0x1d1   :  { %842 = vmatprep.subr.bf16.mxu1 %v4271_v38  ;;  %v4345_v38 = vld [vmem:[#allocation11 + $0x2a4] ss:$16 sps:$4 sm:$0xff]  }
 0x1d3   :  { %876 = vmatpush1.bf16.msra.mxu0 %v4249_v35  ;;  %v4342_v35 = vld [vmem:[#allocation11 + $0x28c] ss:$16 sps:$4 sm:$0xff]  }
 0x1d4   :  { %877 = vmatprep.subr.bf16.mxu0 %v4257_v36  ;;  %843 = vmatpush1.bf16.msra.mxu1 %v4276_v41  ;;  %v4337_v36 = vld [vmem:[#allocation11 + $0x280] ss:$16 sps:$4 sm:$0xff]   ;;  %v4346_v41 = vld [vmem:[#allocation11 + $0x2a8] ss:$16 sps:$4 sm:$0xff]  }
 0x1d5   :  { %844 = vmatprep.subr.bf16.mxu1 %v4277_v42  ;;  %v4351_v42 = vld [vmem:[#allocation11 + $0x2c4] ss:$16 sps:$4 sm:$0xff]  }
 0x1d7   :  { %878 = vmatpush1.bf16.msra.mxu0 %v4255_v39  ;;  %v4348_v39 = vld [vmem:[#allocation11 + $0x2ac] ss:$16 sps:$4 sm:$0xff]  }
 0x1d8   :  { %879 = vmatprep.subr.bf16.mxu0 %v4263_v40  ;;  %845 = vmatpush1.bf16.msra.mxu1 %v4282_v45  ;;  %v4343_v40 = vld [vmem:[#allocation11 + $0x2a0] ss:$16 sps:$4 sm:$0xff]   ;;  %v4352_v45 = vld [vmem:[#allocation11 + $0x2c8] ss:$16 sps:$4 sm:$0xff]  }
 0x1d9   :  { %846 = vmatprep.subr.bf16.mxu1 %v4283_v47  ;;  %v4360_v47 = vld [vmem:[#allocation11 + $0x2ec] ss:$16 sps:$4 sm:$0xff]  }
 0x1db   :  { %880 = vmatpush1.bf16.msra.mxu0 %v4261_v43  ;;  %v4354_v43 = vld [vmem:[#allocation11 + $0x2cc] ss:$16 sps:$4 sm:$0xff]  }
 0x1dc   :  { %881 = vmatprep.subr.bf16.mxu0 %v4269_v44  ;;  %847 = vmatpush1.bf16.msra.mxu1 %v4288_v49  ;;  %v4349_v44 = vld [vmem:[#allocation11 + $0x2c0] ss:$16 sps:$4 sm:$0xff]   ;;  %v4358_v49 = vld [vmem:[#allocation11 + $0x2e8] ss:$16 sps:$4 sm:$0xff]  }
 0x1dd   :  { %848 = vmatprep.subr.bf16.mxu1 %v4289_v50  ;;  %v4363_v50 = vld [vmem:[#allocation11 + $0x304] ss:$16 sps:$4 sm:$0xff]  }
 0x1df   :  { %882 = vmatpush1.bf16.msra.mxu0 %v4267_v46  ;;  %v4357_v46 = vld [vmem:[#allocation11 + $0x2e4] ss:$16 sps:$4 sm:$0xff]  }
 0x1e0   :  { %883 = vmatprep.subr.bf16.mxu0 %v4275_v48  ;;  %849 = vmatpush1.bf16.msra.mxu1 %v4294_v53  ;;  %v4355_v48 = vld [vmem:[#allocation11 + $0x2e0] ss:$16 sps:$4 sm:$0xff]   ;;  %v4364_v53 = vld [vmem:[#allocation11 + $0x308] ss:$16 sps:$4 sm:$0xff]  }
 0x1e1   :  { %850 = vmatprep.subr.bf16.mxu1 %v4295_v54  ;;  %v4369_v54 = vld [vmem:[#allocation11 + $0x324] ss:$16 sps:$4 sm:$0xff]  }
 0x1e3   :  { %884 = vmatpush1.bf16.msra.mxu0 %v4273_v51  ;;  %v4366_v51 = vld [vmem:[#allocation11 + $0x30c] ss:$16 sps:$4 sm:$0xff]  }
 0x1e4   :  { %885 = vmatprep.subr.bf16.mxu0 %v4281_v52  ;;  %851 = vmatpush1.bf16.msra.mxu1 %v4300_v57  ;;  %v4361_v52 = vld [vmem:[#allocation11 + $0x300] ss:$16 sps:$4 sm:$0xff]   ;;  %v4370_v57 = vld [vmem:[#allocation11 + $0x328] ss:$16 sps:$4 sm:$0xff]  }
 0x1e5   :  { %852 = vmatprep.subr.bf16.mxu1 %v4301_v58  ;;  %v4375_v58 = vld [vmem:[#allocation11 + $0x344] ss:$16 sps:$4 sm:$0xff]  }
 0x1e7   :  { %886 = vmatpush1.bf16.msra.mxu0 %v4279_v55  ;;  %v4372_v55 = vld [vmem:[#allocation11 + $0x32c] ss:$16 sps:$4 sm:$0xff]  }
 0x1e8   :  { %887 = vmatprep.subr.bf16.mxu0 %v4287_v56  ;;  %853 = vmatpush1.bf16.msra.mxu1 %v4306_v3  ;;  %v4367_v56 = vld [vmem:[#allocation11 + $0x320] ss:$16 sps:$4 sm:$0xff]   ;;  %v4387_v3 = vld [vmem:[#allocation11 + $0x384] ss:$16 sps:$4 sm:$0xff]  }
 0x1e9   :  { %854 = vmatprep.subr.bf16.mxu1 %v4307_v4  ;;  %v4390_v4 = vld [vmem:[#allocation11 + $0x38c] ss:$16 sps:$4 sm:$0xff]  }
 0x1eb   :  { %888 = vmatpush1.bf16.msra.mxu0 %v4285_v59  ;;  %v4378_v59 = vld [vmem:[#allocation11 + $0x34c] ss:$16 sps:$4 sm:$0xff]  }
 0x1ec   :  { %889 = vmatprep.subr.bf16.mxu0 %v4293_v60  ;;  %855 = vmatpush1.bf16.msra.mxu1 %v4312_v7  ;;  %v4373_v60 = vld [vmem:[#allocation11 + $0x340] ss:$16 sps:$4 sm:$0xff]   ;;  %v4393_v7 = vld [vmem:[#allocation11 + $0x3a4] ss:$16 sps:$4 sm:$0xff]  }
 0x1ed   :  { %1346 = vmatprep.subr.bf16.mxu1 %v4315_v10  ;;  %v4396_v10 = vld [vmem:[#allocation11 + $0x3ac] ss:$16 sps:$4 sm:$0xff]  }
 0x1ef   :  { %890 = vmatpush1.bf16.msra.mxu0 %v4291_v61  ;;  %v4376_v61 = vld [vmem:[#allocation11 + $0x348] ss:$16 sps:$4 sm:$0xff]  }
 0x1f0   :  { %891 = vmatprep.subr.bf16.mxu0 %v4299_v62  ;;  %v4381_v62 = vld [vmem:[#allocation11 + $0x364] ss:$16 sps:$4 sm:$0xff]  }
 0x1f3   :  { %892 = vmatpush1.bf16.msra.mxu0 %v4297_v63  ;;  %v4384_v63 = vld [vmem:[#allocation11 + $0x36c] ss:$16 sps:$4 sm:$0xff]  }
 0x1f4   :  { %893 = vmatprep.subr.bf16.mxu0 %v4305_v1  ;;  %v4379_v1 = vld [vmem:[#allocation11 + $0x360] ss:$16 sps:$4 sm:$0xff]  }
 0x1f7   :  { %894 = vmatpush1.bf16.msra.mxu0 %v4303_v2  ;;  %v4382_v2 = vld [vmem:[#allocation11 + $0x368] ss:$16 sps:$4 sm:$0xff]  }
 0x1f8   :  { %895 = vmatprep.subr.bf16.mxu0 %v4311_v5  ;;  %v4385_v5 = vld [vmem:[#allocation11 + $0x380] ss:$16 sps:$4 sm:$0xff]  }
 0x1fb   :  { %896 = vmatpush1.bf16.msra.mxu0 %v4309_v6  ;;  %v4388_v6 = vld [vmem:[#allocation11 + $0x388] ss:$16 sps:$4 sm:$0xff]  }
 0x1fc   :  { %1387 = vmatprep.subr.bf16.mxu0 %v4318_v11  ;;  %v4399_v11 = vld [vmem:[#allocation11 + $0x3c4] ss:$16 sps:$4 sm:$0xff]  }
 0x291   :  { %v407_v13 = vpop.f32.mrb[0].mxu0 }
 0x292   :  { %v408_v14 = vadd.f32 %v3597_v12, %v407_v13  ;;  %v4027_v15 = vpop.f32.mrb[1].mxu0  ;;  %v4402_v12 = vld [vmem:[#allocation11 + $0x3cc] ss:$16 sps:$4 sm:$0xff]  }
 0x293   :  { %v410_v16 = vpop.f32.mrb[2].mxu0  ;;  %v933_v13 = vld [vmem:[#allocation5 + $0x8] sm:$0xff] }
 0x294   :  { %v413_v17 = vmax.f32 %v408_v14, 0.0  ;;  %v4028_v18 = vpop.f32.mrb[3].mxu0  ;;  %v4397_v14 = vld [vmem:[#allocation11 + $0x3c0] ss:$16 sps:$4 sm:$0xff]   ;;  %v4400_v15 = vld [vmem:[#allocation11 + $0x3c8] ss:$16 sps:$4 sm:$0xff]   ;;  %v1002_v16 = vpack.c.bf16 %v933_v13, %v933_v13 }
 0x295   :  { %v4408_v18 = vld [vmem:[#allocation11 + $0x3ec] ss:$16 sps:$4 sm:$0xff]   ;;  %v4429_v13 = vld [vmem:[#allocation11 + $0x464] ss:$16 sps:$4 sm:$0xff]  }
 0x296   :  { %v480_v21 = vpack.c.bf16 %v413_v17, %v413_v17  ;;  %v4405_v17 = vld [vmem:[#allocation11 + $0x3e4] ss:$16 sps:$4 sm:$0xff]  }
 0x298   :  { %857 = vmatmul.mubr.bf16.vlgmr.msra.gmra.mrb[0].mxu1 %v480_v21  ;;  %898 = vmatmul.mubr.bf16.vlgmr.msra.gmra.mrb[4].mxu0 %v480_v21  ;;  %v4411_v21 = vld [vmem:[#allocation11 + $0x404] ss:$16 sps:$4 sm:$0xff]  }
 0x299   :  { %1347 = vmatpush1.bf16.msra.mxu1 %v4313_v19  ;;  %1388 = vmatpush1.bf16.msra.mxu0 %v4316_v20  ;;  %v4403_v19 = vld [vmem:[#allocation11 + $0x3e0] ss:$16 sps:$4 sm:$0xff]   ;;  %v4406_v20 = vld [vmem:[#allocation11 + $0x3e8] ss:$16 sps:$4 sm:$0xff]  }
 0x29a   :  { %1348 = vmatprep.subr.bf16.mxu1 %v4321_v22  ;;  %1389 = vmatprep.subr.bf16.mxu0 %v4324_v23  ;;  %v4414_v22 = vld [vmem:[#allocation11 + $0x40c] ss:$16 sps:$4 sm:$0xff]   ;;  %v484_v23 = vlaneseq }
 0x29b   :  { %1378 = vmatprep.mubr.bf16.mxu1 %v1002_v16  ;;  %1419 = vmatprep.mubr.bf16.mxu0 %v1002_v16  ;;  %v4430_v16 = vld [vmem:[#allocation11 + $0x468] ss:$16 sps:$4 sm:$0xff]  }
 0x29d   :  { %1349 = vmatpush1.bf16.msra.mxu1 %v4319_v24  ;;  %1390 = vmatpush1.bf16.msra.mxu0 %v4322_v25  ;;  %v485_v24 = vshrl.u32 %v484_v23, 7  ;;  %v4439_v23 = vld [vmem:[#allocation11 + $0x4a0] ss:$16 sps:$4 sm:$0xff]  }
 0x29e   :  { %1350 = vmatprep.subr.bf16.mxu1 %v4327_v26  ;;  %1391 = vmatprep.subr.bf16.mxu0 %v4330_v27  ;;  %v482_v26 = vld [vmem:[#allocation13] sm:$0xf] }
 0x29f   :  { %v5650_v25 = vsub.s32 0, %v485_v24  ;;  %v5652_v27 = vsub.s32 1, %v485_v24 }
 0x2a1   :  { %1351 = vmatpush1.bf16.msra.mxu1 %v4325_v28  ;;  %1392 = vmatpush1.bf16.msra.mxu0 %v4328_v29  ;;  %v487_v28 = vrot.slane %v482_v26, %v5650_v25  ;;  %v491_v29 = vrot.slane %v482_v26, %v5652_v27 }
 0x2a2   :  { %1352 = vmatprep.subr.bf16.mxu1 %v4333_v30  ;;  %1393 = vmatprep.subr.bf16.mxu0 %v4336_v31 }
 0x2a5   :  { %1353 = vmatpush1.bf16.msra.mxu1 %v4331_v32  ;;  %1394 = vmatpush1.bf16.msra.mxu0 %v4334_v33  ;;  %v5656_v32 = vsub.s32 3, %v485_v24 }
 0x2a6   :  { %1354 = vmatprep.subr.bf16.mxu1 %v4339_v34  ;;  %1395 = vmatprep.subr.bf16.mxu0 %v4342_v35 }
 0x2a9   :  { %1355 = vmatpush1.bf16.msra.mxu1 %v4337_v36  ;;  %1396 = vmatpush1.bf16.msra.mxu0 %v4340_v37 }
 0x2aa   :  { %1356 = vmatprep.subr.bf16.mxu1 %v4345_v38  ;;  %1397 = vmatprep.subr.bf16.mxu0 %v4348_v39 }
 0x2ad   :  { %1357 = vmatpush1.bf16.msra.mxu1 %v4343_v40  ;;  %1398 = vmatpush1.bf16.msra.mxu0 %v4346_v41 }
 0x2ae   :  { %1358 = vmatprep.subr.bf16.mxu1 %v4351_v42  ;;  %1399 = vmatprep.subr.bf16.mxu0 %v4354_v43  ;;  %v499_v43 = vrot.slane %v482_v26, %v5656_v32 }
 0x2b1   :  { %1359 = vmatpush1.bf16.msra.mxu1 %v4349_v44  ;;  %1400 = vmatpush1.bf16.msra.mxu0 %v4352_v45  ;;  %v5659_v44 = vsub.s32 2, %v485_v24  ;;  %v4442_v24 = vld [vmem:[#allocation11 + $0x4a8] ss:$16 sps:$4 sm:$0xff]  }
 0x2b2   :  { %1360 = vmatprep.subr.bf16.mxu1 %v4357_v46  ;;  %1401 = vmatprep.subr.bf16.mxu0 %v4360_v47 }
 0x2b3   :  { %v495_v46 = vrot.slane %v482_v26, %v5659_v44  ;;  %v4447_v26 = vld [vmem:[#allocation11 + $0x4c4] ss:$16 sps:$4 sm:$0xff]  }
 0x2b5   :  { %1361 = vmatpush1.bf16.msra.mxu1 %v4355_v48  ;;  %1402 = vmatpush1.bf16.msra.mxu0 %v4358_v49 }
 0x2b6   :  { %1362 = vmatprep.subr.bf16.mxu1 %v4363_v50  ;;  %1403 = vmatprep.subr.bf16.mxu0 %v4366_v51 }
 0x2b9   :  { %1363 = vmatpush1.bf16.msra.mxu1 %v4361_v52  ;;  %1404 = vmatpush1.bf16.msra.mxu0 %v4364_v53 }
 0x2ba   :  { %1364 = vmatprep.subr.bf16.mxu1 %v4369_v54  ;;  %1405 = vmatprep.subr.bf16.mxu0 %v4372_v55  ;;  %v415_v55 = vld [vmem:[#allocation7] sm:$0xff] }
 0x2bd   :  { %1365 = vmatpush1.bf16.msra.mxu1 %v4367_v56  ;;  %1406 = vmatpush1.bf16.msra.mxu0 %v4370_v57 }
 0x2be   :  { %1366 = vmatprep.subr.bf16.mxu1 %v4375_v58  ;;  %1407 = vmatprep.subr.bf16.mxu0 %v4378_v59 }
 0x2c1   :  { %1367 = vmatpush1.bf16.msra.mxu1 %v4373_v60  ;;  %1408 = vmatpush1.bf16.msra.mxu0 %v4376_v61 }
 0x2c2   :  { %1368 = vmatprep.subr.bf16.mxu1 %v4381_v62  ;;  %1409 = vmatprep.subr.bf16.mxu0 %v4384_v63 }
 0x2c5   :  { %1369 = vmatpush1.bf16.msra.mxu1 %v4379_v1  ;;  %1410 = vmatpush1.bf16.msra.mxu0 %v4382_v2  ;;  %v4409_v2 = vld [vmem:[#allocation11 + $0x400] ss:$16 sps:$4 sm:$0xff]  }
 0x2c6   :  { %1370 = vmatprep.subr.bf16.mxu1 %v4387_v3  ;;  %1411 = vmatprep.subr.bf16.mxu0 %v4390_v4  ;;  %v4412_v3 = vld [vmem:[#allocation11 + $0x408] ss:$16 sps:$4 sm:$0xff]  }
 0x2c9   :  { %1371 = vmatpush1.bf16.msra.mxu1 %v4385_v5  ;;  %1412 = vmatpush1.bf16.msra.mxu0 %v4388_v6  ;;  %v4417_v5 = vld [vmem:[#allocation11 + $0x424] ss:$16 sps:$4 sm:$0xff]   ;;  %v4420_v6 = vld [vmem:[#allocation11 + $0x42c] ss:$16 sps:$4 sm:$0xff]  }
 0x2ca   :  { %1372 = vmatprep.subr.bf16.mxu1 %v4393_v7  ;;  %1413 = vmatprep.subr.bf16.mxu0 %v4396_v10  ;;  %v4415_v7 = vld [vmem:[#allocation11 + $0x420] ss:$16 sps:$4 sm:$0xff]   ;;  %v4426_v10 = vld [vmem:[#allocation11 + $0x44c] ss:$16 sps:$4 sm:$0xff]  }
 0x2cd   :  { %1373 = vmatpush1.bf16.msra.mxu1 %v4391_v8  ;;  %1414 = vmatpush1.bf16.msra.mxu0 %v4394_v9  ;;  %v4418_v8 = vld [vmem:[#allocation11 + $0x428] ss:$16 sps:$4 sm:$0xff]   ;;  %v4423_v9 = vld [vmem:[#allocation11 + $0x444] ss:$16 sps:$4 sm:$0xff]  }
 0x2ce   :  { %1374 = vmatprep.subr.bf16.mxu1 %v4399_v11  ;;  %1415 = vmatprep.subr.bf16.mxu0 %v4402_v12  ;;  %v4421_v11 = vld [vmem:[#allocation11 + $0x440] ss:$16 sps:$4 sm:$0xff]   ;;  %v4424_v12 = vld [vmem:[#allocation11 + $0x448] ss:$16 sps:$4 sm:$0xff]  }
 0x2d1   :  { %1375 = vmatpush1.bf16.msra.mxu1 %v4397_v14  ;;  %1416 = vmatpush1.bf16.msra.mxu0 %v4400_v15  ;;  %v4432_v14 = vld [vmem:[#allocation11 + $0x46c] ss:$16 sps:$4 sm:$0xff]   ;;  %v4427_v15 = vld [vmem:[#allocation11 + $0x460] ss:$16 sps:$4 sm:$0xff]  }
 0x2d2   :  { %1376 = vmatprep.subr.bf16.mxu1 %v4405_v17  ;;  %1417 = vmatprep.subr.bf16.mxu0 %v4408_v18  ;;  %v4435_v17 = vld [vmem:[#allocation11 + $0x484] ss:$16 sps:$4 sm:$0xff]   ;;  %v4438_v18 = vld [vmem:[#allocation11 + $0x48c] ss:$16 sps:$4 sm:$0xff]  }
 0x2d5   :  { %1377 = vmatpush1.bf16.msra.mxu1 %v4403_v19  ;;  %1418 = vmatpush1.bf16.msra.mxu0 %v4406_v20  ;;  %v4433_v19 = vld [vmem:[#allocation11 + $0x480] ss:$16 sps:$4 sm:$0xff]   ;;  %v4436_v20 = vld [vmem:[#allocation11 + $0x488] ss:$16 sps:$4 sm:$0xff]  }
 0x2d6   :  { %1870 = vmatprep.subr.bf16.mxu1 %v4411_v21  ;;  %1911 = vmatprep.subr.bf16.mxu0 %v4414_v22  ;;  %v4441_v21 = vld [vmem:[#allocation11 + $0x4a4] ss:$16 sps:$4 sm:$0xff]   ;;  %v4444_v22 = vld [vmem:[#allocation11 + $0x4ac] ss:$16 sps:$4 sm:$0xff]  }
 0x36b   :  { %v858_v30 = vpop.f32.mrb[0].mxu1  ;;  %v899_v31 = vpop.f32.mrb[4].mxu0 }
 0x36c   :  { %v859_v33 = vadd.f32 %v858_v30, %v487_v28  ;;  %v860_v34 = vpop.f32.mrb[1].mxu1  ;;  %v901_v35 = vpop.f32.mrb[5].mxu0  ;;  %v900_v48 = vadd.f32 %v899_v31, %v495_v46  ;;  %v4450_v28 = vld [vmem:[#allocation11 + $0x4cc] ss:$16 sps:$4 sm:$0xff]   ;;  %v4448_v30 = vld [vmem:[#allocation11 + $0x4c8] ss:$16 sps:$4 sm:$0xff]  }
 0x36d   :  { %v861_v36 = vadd.f32 %v860_v34, %v491_v29  ;;  %v862_v37 = vpop.f32.mrb[2].mxu1  ;;  %v903_v38 = vpop.f32.mrb[6].mxu0  ;;  %v902_v45 = vadd.f32 %v901_v35, %v499_v43  ;;  %v4445_v29 = vld [vmem:[#allocation11 + $0x4c0] ss:$16 sps:$4 sm:$0xff]   ;;  %v4453_v31 = vld [vmem:[#allocation11 + $0x4e4] ss:$16 sps:$4 sm:$0xff]  }
 0x36e   :  { %v3667_v39 = vmul.f32 -1.442695, %v859_v33  ;;  %v863_v40 = vpop.f32.mrb[3].mxu1  ;;  %v904_v41 = vpop.f32.mrb[7].mxu0  ;;  %v4456_v33 = vld [vmem:[#allocation11 + $0x4ec] ss:$16 sps:$4 sm:$0xff]  }
 0x36f   :  { %v3668_v42 = vmul.f32 -1.442695, %v861_v36  ;;  %v3669_v47 = vmul.f32 -1.442695, %v902_v45  ;;  %v4451_v34 = vld [vmem:[#allocation11 + $0x4e0] ss:$16 sps:$4 sm:$0xff]  }
 0x370   :  { %4601 = vpow2.f32 %v3667_v39  ;;  %v4454_v35 = vld [vmem:[#allocation11 + $0x4e8] ss:$16 sps:$4 sm:$0xff]   ;;  %v4459_v36 = vld [vmem:[#allocation11 + $0x504] ss:$16 sps:$4 sm:$0xff]   ;;  %v4462_v37 = vld [vmem:[#allocation11 + $0x50c] ss:$16 sps:$4 sm:$0xff]  }
 0x371   :  { %4603 = vpow2.f32 %v3668_v42  ;;  %v4457_v38 = vld [vmem:[#allocation11 + $0x500] ss:$16 sps:$4 sm:$0xff]   ;;  %v4460_v39 = vld [vmem:[#allocation11 + $0x508] ss:$16 sps:$4 sm:$0xff]   ;;  %v4465_v40 = vld [vmem:[#allocation11 + $0x524] ss:$16 sps:$4 sm:$0xff]  }
 0x372   :  { %4605 = vpow2.f32 %v3669_v47  ;;  %v4468_v41 = vld [vmem:[#allocation11 + $0x52c] ss:$16 sps:$4 sm:$0xff]   ;;  %v4463_v42 = vld [vmem:[#allocation11 + $0x520] ss:$16 sps:$4 sm:$0xff]   ;;  %v4466_v43 = vld [vmem:[#allocation11 + $0x528] ss:$16 sps:$4 sm:$0xff]  }
 0x373   :  { %4607 = vtanh.f32 %v900_v48  ;;  %v4471_v45 = vld [vmem:[#allocation11 + $0x544] ss:$16 sps:$4 sm:$0xff]   ;;  %v4474_v46 = vld [vmem:[#allocation11 + $0x54c] ss:$16 sps:$4 sm:$0xff]   ;;  %v4469_v47 = vld [vmem:[#allocation11 + $0x540] ss:$16 sps:$4 sm:$0xff]  }
 0x374   :  { %v4472_v48 = vld [vmem:[#allocation11 + $0x548] ss:$16 sps:$4 sm:$0xff]  }
 0x37a   :  { %v4602_v49 = vpop.eup %4601 }
 0x37b   :  { %v4604_v50 = vpop.eup %4603  ;;  %v909_v51 = vadd.f32 1.0, %v4602_v49  ;;  %v4477_v49 = vld [vmem:[#allocation11 + $0x564] ss:$16 sps:$4 sm:$0xff]  }
 0x37c   :  { %v915_v52 = vadd.f32 1.0, %v4604_v50  ;;  %v4606_v53 = vpop.eup %4605  ;;  %v4480_v50 = vld [vmem:[#allocation11 + $0x56c] ss:$16 sps:$4 sm:$0xff]  }
 0x37d   :  { %4609 = vrcp.f32 %v909_v51  ;;  %v4608_v54 = vpop.eup %4607  ;;  %v922_v59 = vadd.f32 1.0, %v4606_v53  ;;  %v4475_v51 = vld [vmem:[#allocation11 + $0x560] ss:$16 sps:$4 sm:$0xff]   ;;  %v4483_v53 = vld [vmem:[#allocation11 + $0x584] ss:$16 sps:$4 sm:$0xff]  }
 0x37e   :  { %4611 = vrcp.f32 %v915_v52  ;;  %v4478_v52 = vld [vmem:[#allocation11 + $0x568] ss:$16 sps:$4 sm:$0xff]  }
 0x37f   :  { %4613 = vrcp.f32 %v922_v59  ;;  %v4490_v59 = vld [vmem:[#allocation11 + $0x5a8] ss:$16 sps:$4 sm:$0xff]  }
 0x387   :  { %v4610_v56 = vpop.eup %4609 }
 0x388   :  { %v4612_v57 = vpop.eup %4611  ;;  %v926_v58 = vmul.f32 %v4610_v56, %v4608_v54  ;;  %v4486_v54 = vld [vmem:[#allocation11 + $0x58c] ss:$16 sps:$4 sm:$0xff]   ;;  %v4484_v56 = vld [vmem:[#allocation11 + $0x588] ss:$16 sps:$4 sm:$0xff]  }
 0x389   :  { %v925_v60 = vmul.f32 %v4612_v57, %v415_v55  ;;  %v4614_v62 = vpop.eup %4613  ;;  %v4481_v55 = vld [vmem:[#allocation11 + $0x580] ss:$16 sps:$4 sm:$0xff]   ;;  %v4489_v57 = vld [vmem:[#allocation11 + $0x5a4] ss:$16 sps:$4 sm:$0xff]  }
 0x38b   :  { %v927_v61 = vadd.f32 %v926_v58, %v925_v60  ;;  %v4487_v58 = vld [vmem:[#allocation11 + $0x5a0] ss:$16 sps:$4 sm:$0xff]   ;;  %v4492_v60 = vld [vmem:[#allocation11 + $0x5ac] ss:$16 sps:$4 sm:$0xff]  }
 0x38d   :  { %4615 = vtanh.f32 %v927_v61  ;;  %931 = vst [vmem:[#allocation37] sm:$0xff] %v927_v61  ;;  %v4495_v61 = vld [vmem:[#allocation11 + $0x5c4] ss:$16 sps:$4 sm:$0xff]  }
 0x397   :  { %v4616_v63 = vpop.eup %4615 }
 0x398   :  { %v929_v1 = vmul.f32 %v4616_v63, %v4614_v62  ;;  %v4498_v62 = vld [vmem:[#allocation11 + $0x5cc] ss:$16 sps:$4 sm:$0xff]  }
 0x399   :  { %v1457_v63 = vld [vmem:[#allocation5 + $0x10] sm:$0xff] }
 0x39a   :  { %v1001_v4 = vpack.c.bf16 %v929_v1, %v929_v1  ;;  %930 = vst [vmem:[#allocation35] sm:$0xff] %v929_v1  ;;  %v4493_v1 = vld [vmem:[#allocation11 + $0x5c0] ss:$16 sps:$4 sm:$0xff]  }
 0x39c   :  { %1379 = vmatmul.mubr.bf16.vlgmr.msra.gmra.mrb[4].mxu1 %v1001_v4  ;;  %1420 = vmatmul.mubr.bf16.vlgmr.msra.gmra.mrb[8].mxu0 %v1001_v4  ;;  %v4501_v4 = vld [vmem:[#allocation11 + $0x5e4] ss:$16 sps:$4 sm:$0xff]  }
 0x39d   :  { %1871 = vmatpush1.bf16.msra.mxu1 %v4409_v2  ;;  %1912 = vmatpush1.bf16.msra.mxu0 %v4412_v3  ;;  %v4496_v2 = vld [vmem:[#allocation11 + $0x5c8] ss:$16 sps:$4 sm:$0xff]   ;;  %v1526_v3 = vpack.c.bf16 %v1457_v63, %v1457_v63  ;;  %v4524_v63 = vld [vmem:[#allocation14 + $0x68] ss:$12 sps:$4 sm:$0xff]  }
 0x39e   :  { %1872 = vmatprep.subr.bf16.mxu1 %v4417_v5  ;;  %1913 = vmatprep.subr.bf16.mxu0 %v4420_v6  ;;  %v4504_v5 = vld [vmem:[#allocation11 + $0x5ec] ss:$16 sps:$4 sm:$0xff]   ;;  %v4499_v6 = vld [vmem:[#allocation11 + $0x5e0] ss:$16 sps:$4 sm:$0xff]  }
 0x39f   :  { %1902 = vmatprep.mubr.bf16.mxu1 %v1526_v3  ;;  %1943 = vmatprep.mubr.bf16.mxu0 %v1526_v3  ;;  %v4528_v3 = vld [vmem:[#allocation14 + $0x80] ss:$12 sps:$4 sm:$0xff]  }
 0x3a1   :  { %1873 = vmatpush1.bf16.msra.mxu1 %v4415_v7  ;;  %1914 = vmatpush1.bf16.msra.mxu0 %v4418_v8  ;;  %v4502_v7 = vld [vmem:[#allocation11 + $0x5e8] ss:$16 sps:$4 sm:$0xff]   ;;  %v1004_v8 = vld [vmem:[#allocation13 + $0x4] sm:$0xf] }
 0x3a2   :  { %1874 = vmatprep.subr.bf16.mxu1 %v4423_v9  ;;  %1915 = vmatprep.subr.bf16.mxu0 %v4426_v10  ;;  %v1009_v9 = vrot.slane %v1004_v8, %v5650_v25  ;;  %v1013_v10 = vrot.slane %v1004_v8, %v5652_v27 }
 0x3a5   :  { %1875 = vmatpush1.bf16.msra.mxu1 %v4421_v11  ;;  %1916 = vmatpush1.bf16.msra.mxu0 %v4424_v12 }
 0x3a6   :  { %1876 = vmatprep.subr.bf16.mxu1 %v4429_v13  ;;  %1917 = vmatprep.subr.bf16.mxu0 %v4432_v14 }
 0x3a9   :  { %1877 = vmatpush1.bf16.msra.mxu1 %v4427_v15  ;;  %1918 = vmatpush1.bf16.msra.mxu0 %v4430_v16 }
 0x3aa   :  { %1878 = vmatprep.subr.bf16.mxu1 %v4435_v17  ;;  %1919 = vmatprep.subr.bf16.mxu0 %v4438_v18 }
 0x3ad   :  { %1879 = vmatpush1.bf16.msra.mxu1 %v4433_v19  ;;  %1920 = vmatpush1.bf16.msra.mxu0 %v4436_v20 }
 0x3ae   :  { %1880 = vmatprep.subr.bf16.mxu1 %v4441_v21  ;;  %1921 = vmatprep.subr.bf16.mxu0 %v4444_v22 }
 0x3b1   :  { %1881 = vmatpush1.bf16.msra.mxu1 %v4439_v23  ;;  %1922 = vmatpush1.bf16.msra.mxu0 %v4442_v24  ;;  %v1021_v23 = vrot.slane %v1004_v8, %v5656_v32 }
 0x3b2   :  { %1882 = vmatprep.subr.bf16.mxu1 %v4447_v26  ;;  %1923 = vmatprep.subr.bf16.mxu0 %v4450_v28  ;;  %v1017_v26 = vrot.slane %v1004_v8, %v5659_v44  ;;  %v4535_v8 = vld [vmem:[#allocation14 + $0xac] ss:$12 sps:$4 sm:$0xff]  }
 0x3b5   :  { %1883 = vmatpush1.bf16.msra.mxu1 %v4445_v29  ;;  %1924 = vmatpush1.bf16.msra.mxu0 %v4448_v30 }
 0x3b6   :  { %1884 = vmatprep.subr.bf16.mxu1 %v4453_v31  ;;  %1925 = vmatprep.subr.bf16.mxu0 %v4456_v33 }
 0x3b9   :  { %1885 = vmatpush1.bf16.msra.mxu1 %v4451_v34  ;;  %1926 = vmatpush1.bf16.msra.mxu0 %v4454_v35 }
 0x3ba   :  { %1886 = vmatprep.subr.bf16.mxu1 %v4459_v36  ;;  %1927 = vmatprep.subr.bf16.mxu0 %v4462_v37  ;;  %v935_v37 = vld [vmem:[#allocation7 + $0x8] sm:$0xff] }
 0x3bd   :  { %1887 = vmatpush1.bf16.msra.mxu1 %v4457_v38  ;;  %1928 = vmatpush1.bf16.msra.mxu0 %v4460_v39 }
 0x3be   :  { %1888 = vmatprep.subr.bf16.mxu1 %v4465_v40  ;;  %1929 = vmatprep.subr.bf16.mxu0 %v4468_v41 }
 0x3c1   :  { %1889 = vmatpush1.bf16.msra.mxu1 %v4463_v42  ;;  %1930 = vmatpush1.bf16.msra.mxu0 %v4466_v43 }
 0x3c2   :  { %1890 = vmatprep.subr.bf16.mxu1 %v4471_v45  ;;  %1931 = vmatprep.subr.bf16.mxu0 %v4474_v46 }
 0x3c5   :  { %1891 = vmatpush1.bf16.msra.mxu1 %v4469_v47  ;;  %1932 = vmatpush1.bf16.msra.mxu0 %v4472_v48 }
 0x3c6   :  { %1892 = vmatprep.subr.bf16.mxu1 %v4477_v49  ;;  %1933 = vmatprep.subr.bf16.mxu0 %v4480_v50  ;;  %v4507_v49 = vld [vmem:[#allocation14 + $0x4] ss:$12 sps:$4 sm:$0xff]   ;;  %v4505_v50 = vld [vmem:[#allocation14] ss:$12 sps:$4 sm:$0xff]  }
 0x3c9   :  { %1893 = vmatpush1.bf16.msra.mxu1 %v4475_v51  ;;  %1934 = vmatpush1.bf16.msra.mxu0 %v4478_v52  ;;  %v4508_v51 = vld [vmem:[#allocation14 + $0x8] ss:$12 sps:$4 sm:$0xff]  }
 0x3ca   :  { %1894 = vmatprep.subr.bf16.mxu1 %v4483_v53  ;;  %1935 = vmatprep.subr.bf16.mxu0 %v4486_v54  ;;  %v4511_v52 = vld [vmem:[#allocation14 + $0x1c] ss:$12 sps:$4 sm:$0xff]   ;;  %v4509_v53 = vld [vmem:[#allocation14 + $0x18] ss:$12 sps:$4 sm:$0xff]   ;;  %v4512_v54 = vld [vmem:[#allocation14 + $0x20] ss:$12 sps:$4 sm:$0xff]  }
 0x3cd   :  { %1895 = vmatpush1.bf16.msra.mxu1 %v4481_v55  ;;  %1936 = vmatpush1.bf16.msra.mxu0 %v4484_v56  ;;  %v4515_v55 = vld [vmem:[#allocation14 + $0x34] ss:$12 sps:$4 sm:$0xff]   ;;  %v4513_v56 = vld [vmem:[#allocation14 + $0x30] ss:$12 sps:$4 sm:$0xff]  }
 0x3ce   :  { %1896 = vmatprep.subr.bf16.mxu1 %v4489_v57  ;;  %1937 = vmatprep.subr.bf16.mxu0 %v4492_v60  ;;  %v4516_v57 = vld [vmem:[#allocation14 + $0x38] ss:$12 sps:$4 sm:$0xff]   ;;  %v4520_v60 = vld [vmem:[#allocation14 + $0x50] ss:$12 sps:$4 sm:$0xff]  }
 0x3d1   :  { %1897 = vmatpush1.bf16.msra.mxu1 %v4487_v58  ;;  %1938 = vmatpush1.bf16.msra.mxu0 %v4490_v59  ;;  %v4519_v58 = vld [vmem:[#allocation14 + $0x4c] ss:$12 sps:$4 sm:$0xff]   ;;  %v4517_v59 = vld [vmem:[#allocation14 + $0x48] ss:$12 sps:$4 sm:$0xff]  }
 0x3d2   :  { %1898 = vmatprep.subr.bf16.mxu1 %v4495_v61  ;;  %1939 = vmatprep.subr.bf16.mxu0 %v4498_v62  ;;  %v4523_v61 = vld [vmem:[#allocation14 + $0x64] ss:$12 sps:$4 sm:$0xff]   ;;  %v4521_v62 = vld [vmem:[#allocation14 + $0x60] ss:$12 sps:$4 sm:$0xff]  }
 0x3d5   :  { %1899 = vmatpush1.bf16.msra.mxu1 %v4493_v1  ;;  %1940 = vmatpush1.bf16.msra.mxu0 %v4496_v2  ;;  %v4527_v1 = vld [vmem:[#allocation14 + $0x7c] ss:$12 sps:$4 sm:$0xff]   ;;  %v4525_v2 = vld [vmem:[#allocation14 + $0x78] ss:$12 sps:$4 sm:$0xff]  }
 0x3d6   :  { %1900 = vmatprep.subr.bf16.mxu1 %v4501_v4  ;;  %1941 = vmatprep.subr.bf16.mxu0 %v4504_v5  ;;  %v4531_v4 = vld [vmem:[#allocation14 + $0x94] ss:$12 sps:$4 sm:$0xff]   ;;  %v5231_v5 = vmov 0  }
 0x3d9   :  { %1901 = vmatpush1.bf16.msra.mxu1 %v4499_v6  ;;  %1942 = vmatpush1.bf16.msra.mxu0 %v4502_v7  ;;  %v4529_v6 = vld [vmem:[#allocation14 + $0x90] ss:$12 sps:$4 sm:$0xff]   ;;  %v4532_v7 = vld [vmem:[#allocation14 + $0x98] ss:$12 sps:$4 sm:$0xff]  }
 0x3da   :  { %4029 = vmatprep.subr.bf16.mxu0 %v5229_v0  ;;  %2158 = vmatprep.subr.bf16.mxu1 %v4507_v49 }
 0x46f   :  { %v1380_v11 = vpop.f32.mrb[4].mxu1  ;;  %v1421_v12 = vpop.f32.mrb[8].mxu0 }
 0x470   :  { %v1381_v13 = vadd.f32 %v1380_v11, %v1009_v9  ;;  %v1382_v14 = vpop.f32.mrb[5].mxu1  ;;  %v1423_v15 = vpop.f32.mrb[9].mxu0  ;;  %v1422_v29 = vadd.f32 %v1421_v12, %v1017_v26  ;;  %v4533_v9 = vld [vmem:[#allocation14 + $0xa8] ss:$12 sps:$4 sm:$0xff]   ;;  %v1528_v11 = vld [vmem:[#allocation13 + $0x8] sm:$0xf] }
 0x471   :  { %v1383_v16 = vadd.f32 %v1382_v14, %v1013_v10  ;;  %v1384_v17 = vpop.f32.mrb[6].mxu1  ;;  %v1425_v18 = vpop.f32.mrb[10].mxu0  ;;  %v1424_v24 = vadd.f32 %v1423_v15, %v1021_v23  ;;  %v4536_v10 = vld [vmem:[#allocation14 + $0xb0] ss:$12 sps:$4 sm:$0xff]   ;;  %v1533_v12 = vrot.slane %v1528_v11, %v5650_v25 }
 0x472   :  { %v3734_v19 = vmul.f32 -1.442695, %v1381_v13  ;;  %v1385_v20 = vpop.f32.mrb[7].mxu1  ;;  %v1426_v21 = vpop.f32.mrb[11].mxu0  ;;  %v1537_v13 = vrot.slane %v1528_v11, %v5652_v27 }
 0x473   :  { %v3735_v22 = vmul.f32 -1.442695, %v1383_v16  ;;  %v3736_v28 = vmul.f32 -1.442695, %v1424_v24 }
 0x474   :  { %4617 = vpow2.f32 %v3734_v19 }
 0x475   :  { %4619 = vpow2.f32 %v3735_v22 }
 0x476   :  { %4621 = vpow2.f32 %v3736_v28  ;;  %v1545_v28 = vrot.slane %v1528_v11, %v5656_v32 }
 0x477   :  { %4623 = vtanh.f32 %v1422_v29 }
 0x47e   :  { %v4618_v30 = vpop.eup %4617 }
 0x47f   :  { %v4620_v31 = vpop.eup %4619  ;;  %v1431_v33 = vadd.f32 1.0, %v4618_v30  ;;  %v1541_v30 = vrot.slane %v1528_v11, %v5659_v44 }
 0x480   :  { %v1437_v34 = vadd.f32 1.0, %v4620_v31  ;;  %v4622_v35 = vpop.eup %4621 }
 0x481   :  { %4625 = vrcp.f32 %v1431_v33  ;;  %v4624_v36 = vpop.eup %4623  ;;  %v1444_v41 = vadd.f32 1.0, %v4622_v35 }
 0x482   :  { %4627 = vrcp.f32 %v1437_v34 }
 0x483   :  { %4629 = vrcp.f32 %v1444_v41 }
 0x48b   :  { %v4626_v38 = vpop.eup %4625 }
 0x48c   :  { %v4628_v39 = vpop.eup %4627  ;;  %v1448_v40 = vmul.f32 %v4626_v38, %v4624_v36 }
 0x48d   :  { %v1447_v42 = vmul.f32 %v4628_v39, %v935_v37  ;;  %v4630_v45 = vpop.eup %4629 }
 0x48f   :  { %v1449_v43 = vadd.f32 %v1448_v40, %v1447_v42  ;;  %v1459_v40 = vld [vmem:[#allocation7 + $0x10] sm:$0xff] }
 0x491   :  { %4631 = vtanh.f32 %v1449_v43  ;;  %1455 = vst [vmem:[#allocation37 + $0x8] sm:$0xff] %v1449_v43 }
 0x49b   :  { %v4632_v46 = vpop.eup %4631 }
 0x49c   :  { %v1451_v47 = vmul.f32 %v4632_v46, %v4630_v45 }
 0x49e   :  { %v1525_v48 = vpack.c.bf16 %v1451_v47, %v1451_v47  ;;  %1453 = vst [vmem:[#allocation35 + $0x8] sm:$0xff] %v1451_v47 }
 0x4a0   :  { %1903 = vmatmul.mubr.bf16.vlgmr.msra.gmra.mrb[8].mxu1 %v1525_v48  ;;  %1944 = vmatmul.mubr.bf16.vlgmr.msra.gmra.mrb[12].mxu0 %v1525_v48 }
 0x4a1   :  { %4045 = vmatprep.mubr.msk.bf16.mxu0 %vm5230_vm0, %v5229_v0  ;;  %2159 = vmatpush1.bf16.msra.mxu1 %v4505_v50 }
 0x4a2   :  { %4030 = vmatpush3.bf16.msra.mxu0 %v4508_v51  ;;  %2160 = vmatprep.subr.bf16.mxu1 %v4511_v52  ;;  %v2013_v51 = vld [vmem:[#allocation16] sm:$0x7] }
 0x4a3   :  { %4031 = vmatprep.subr.bf16.mxu0 %v5229_v0  ;;  %2190 = vmatprep.mubr.bf16.mxu1 %v5231_v5  ;;  %v2022_v52 = vrot.slane %v2013_v51, %v5652_v27  ;;  %v2026_v5 = vrot.slane %v2013_v51, %v5659_v44 }
 0x4a5   :  { %2161 = vmatpush1.bf16.msra.mxu1 %v4509_v53  ;;  %v2018_v53 = vrot.slane %v2013_v51, %v5650_v25 }
 0x4a6   :  { %4032 = vmatpush3.bf16.msra.mxu0 %v4512_v54  ;;  %2162 = vmatprep.subr.bf16.mxu1 %v4515_v55 }
 0x4a7   :  { %4033 = vmatprep.subr.bf16.mxu0 %v5229_v0 }
 0x4a9   :  { %2163 = vmatpush1.bf16.msra.mxu1 %v4513_v56 }
 0x4aa   :  { %4034 = vmatpush3.bf16.msra.mxu0 %v4516_v57  ;;  %2164 = vmatprep.subr.bf16.mxu1 %v4519_v58 }
 0x4ab   :  { %4035 = vmatprep.subr.bf16.mxu0 %v5229_v0 }
 0x4ad   :  { %2165 = vmatpush1.bf16.msra.mxu1 %v4517_v59 }
 0x4ae   :  { %4036 = vmatpush3.bf16.msra.mxu0 %v4520_v60  ;;  %2166 = vmatprep.subr.bf16.mxu1 %v4523_v61 }
 0x4af   :  { %4037 = vmatprep.subr.bf16.mxu0 %v5229_v0 }
 0x4b1   :  { %2167 = vmatpush1.bf16.msra.mxu1 %v4521_v62 }
 0x4b2   :  { %4038 = vmatpush3.bf16.msra.mxu0 %v4524_v63  ;;  %2168 = vmatprep.subr.bf16.mxu1 %v4527_v1 }
 0x4b3   :  { %4039 = vmatprep.subr.bf16.mxu0 %v5229_v0 }
 0x4b5   :  { %2169 = vmatpush1.bf16.msra.mxu1 %v4525_v2 }
 0x4b6   :  { %4040 = vmatpush3.bf16.msra.mxu0 %v4528_v3  ;;  %2170 = vmatprep.subr.bf16.mxu1 %v4531_v4 }
 0x4b7   :  { %4041 = vmatprep.subr.bf16.mxu0 %v5229_v0 }
 0x4b9   :  { %2171 = vmatpush1.bf16.msra.mxu1 %v4529_v6 }
 0x4ba   :  { %4042 = vmatpush3.bf16.msra.mxu0 %v4532_v7  ;;  %2172 = vmatprep.subr.bf16.mxu1 %v4535_v8 }
 0x4bb   :  { %4043 = vmatprep.subr.bf16.mxu0 %v5229_v0 }
 0x4bd   :  { %2173 = vmatpush1.bf16.msra.mxu1 %v4533_v9 }
 0x4be   :  { %4044 = vmatpush3.bf16.msra.mxu0 %v4536_v10  ;;  %4049 = vmatprep.subr.bf16.mxu1 %v5229_v0 }
 0x4bf   :  { %4061 = vmatprep.subr.bf16.mxu0 %v5229_v0 }
 0x573   :  { %v1904_v14 = vpop.f32.mrb[8].mxu1  ;;  %v1945_v15 = vpop.f32.mrb[12].mxu0 }
 0x574   :  { %v1905_v16 = vadd.f32 %v1904_v14, %v1533_v12  ;;  %v1906_v17 = vpop.f32.mrb[9].mxu1  ;;  %v1947_v18 = vpop.f32.mrb[13].mxu0  ;;  %v1946_v33 = vadd.f32 %v1945_v15, %v1541_v30 }
 0x575   :  { %v1907_v19 = vadd.f32 %v1906_v17, %v1537_v13  ;;  %v1908_v20 = vpop.f32.mrb[10].mxu1  ;;  %v1949_v21 = vpop.f32.mrb[14].mxu0  ;;  %v1948_v29 = vadd.f32 %v1947_v18, %v1545_v28 }
 0x576   :  { %v3801_v22 = vmul.f32 -1.442695, %v1905_v16  ;;  %v1909_v23 = vpop.f32.mrb[11].mxu1  ;;  %v1950_v24 = vpop.f32.mrb[15].mxu0 }
 0x577   :  { %v3802_v26 = vmul.f32 -1.442695, %v1907_v19  ;;  %v3803_v31 = vmul.f32 -1.442695, %v1948_v29 }
 0x578   :  { %4633 = vpow2.f32 %v3801_v22 }
 0x579   :  { %4635 = vpow2.f32 %v3802_v26 }
 0x57a   :  { %4637 = vpow2.f32 %v3803_v31 }
 0x57b   :  { %4639 = vtanh.f32 %v1946_v33 }
 0x582   :  { %v4634_v34 = vpop.eup %4633 }
 0x583   :  { %v4636_v35 = vpop.eup %4635  ;;  %v1955_v36 = vadd.f32 1.0, %v4634_v34 }
 0x584   :  { %v1961_v37 = vadd.f32 1.0, %v4636_v35  ;;  %v4638_v38 = vpop.eup %4637 }
 0x585   :  { %4641 = vrcp.f32 %v1955_v36  ;;  %v4640_v39 = vpop.eup %4639  ;;  %v1968_v43 = vadd.f32 1.0, %v4638_v38 }
 0x586   :  { %4643 = vrcp.f32 %v1961_v37 }
 0x587   :  { %4645 = vrcp.f32 %v1968_v43 }
 0x58f   :  { %v4642_v41 = vpop.eup %4641 }
 0x590   :  { %v4644_v32 = vpop.eup %4643  ;;  %v1972_v42 = vmul.f32 %v4642_v41, %v4640_v39 }
 0x591   :  { %v1971_v45 = vmul.f32 %v4644_v32, %v1459_v40  ;;  %v4646_v47 = vpop.eup %4645 }
 0x593   :  { %v1973_v46 = vadd.f32 %v1972_v42, %v1971_v45 }
 0x595   :  { %4647 = vtanh.f32 %v1973_v46  ;;  %1979 = vst [vmem:[#allocation37 + $0x10] sm:$0xff] %v1973_v46 }
 0x59f   :  { %v4648_v48 = vpop.eup %4647 }
 0x5a0   :  { %v1975_v49 = vmul.f32 %v4648_v48, %v4646_v47 }
 0x5a2   :  { %v5682_v50 = vpack.c.bf16 %v1975_v49, %v1975_v49  ;;  %1977 = vst [vmem:[#allocation35 + $0x10] sm:$0xff] %v1975_v49 }
 0x5a4   :  { %2191 = vmatmul.mubr.bf16.vlgmr.msra.gmra.mrb[12].mxu1 %v5682_v50  ;;  %4046 = vmatmul.mubr.bf16.vlgmr.msra.gmra.mrb[16].mxu0 %v5682_v50 }
 0x5a5   :  { %4051 = vmatprep.mubr.msk.bf16.mxu1 %vm5230_vm0, %v5229_v0  ;;  %4063 = vmatprep.mubr.msk.bf16.mxu0 %vm5230_vm0, %v5229_v0 }
 0x677   :  { %v2192_v54 = vpop.f32.mrb[12].mxu1  ;;  %v2233_v55 = vpop.f32.mrb[16].mxu0 }
 0x678   :  { %v2194_v56 = vpop.f32.mrb[13].mxu1  ;;  %v4047_v57 = vpop.f32.mrb[17].mxu0  ;;  %v2193_v63 = vadd.f32 %v2192_v54, %v2018_v53  ;;  %v5706_v12 = vadd.f32 %v2233_v55, %v2026_v5 }
 0x679   :  { %v2195_v58 = vadd.f32 %v2194_v56, %v2022_v52  ;;  %v2196_v59 = vpop.f32.mrb[14].mxu1  ;;  %v2236_v60 = vpop.f32.mrb[18].mxu0 }
 0x67a   :  { %v2197_v61 = vpop.f32.mrb[15].mxu1  ;;  %v4048_v62 = vpop.f32.mrb[19].mxu0  ;;  %v2249_v25 = vmul.f32 0.17677669, %v2193_v63  ;;  %v2515_v17 = vpack.c.bf16 %v5706_v12, %v5706_v12 }
 0x67b   :  { %2257 = vrot.lane.b32.xlu1 %v2195_v58, %s5933_s5  ;;  %2254 = vrot.lane.b32.xlu0 %v2195_v58, %s5232_s20  ;;  %v2277_v1 = vpack.c.bf16 %v2195_v58, %v2195_v58 }
 0x67c   :  { %v2273_v2 = vpack.c.bf16 %v2249_v25, %v2249_v25  ;;  %v2524_v22 = vsel %vm2522_vm3, %v2515_v17, 0 }
 0x67d   :  { %v2286_v27 = vsel %vm2281_vm2, %v2277_v1, 0 }
 0x67e   :  { %4050 = vmatpush3.bf16.xpose.msra.mxu1 %v2286_v27 }
 0x67f   :  { %2260 = vrot.lane.b32.xlu1 %v2195_v58, %s5233_s1  ;;  %2240 = vrot.lane.b32.xlu0 %v2193_v63, %s5232_s20 }
 0x680   :  { %4055 = vmatprep.subr.bf16.mxu1 %v5229_v0 }
 0x683   :  { %2246 = vrot.lane.b32.xlu1 %v2193_v63, %s5233_s1  ;;  %2243 = vrot.lane.b32.xlu0 %v2193_v63, %s5933_s5 }
 0x685   :  { %4052 = vmatmul.mubr.msk.bf16.vlgmr.msra.gmra.mrb[16].mxu1 %vm2281_vm2, %v2273_v2 }
 0x686   :  { %4057 = vmatprep.mubr.msk.bf16.mxu1 %vm5230_vm0, %v5229_v0 }
 0x6ed   :  { %v2258_v3 = vpop.permute.xlu1 %2257  ;;  %v2255_v4 = vpop.permute.xlu0 %2254 }
 0x6ee   :  { %v2279_v6 = vpack.c.bf16 %v2258_v3, %v2258_v3  ;;  %v2278_v7 = vpack.c.bf16 %v2255_v4, %v2255_v4 }
 0x6f0   :  { %v2378_v8 = vsel %vm2281_vm2, %v2279_v6, 0  ;;  %v2332_v9 = vsel %vm2281_vm2, %v2278_v7, 0 }
 0x6f1   :  { %4062 = vmatpush3.bf16.xpose.msra.mxu0 %v2378_v8  ;;  %v2261_v10 = vpop.permute.xlu1 %2260  ;;  %v2241_v11 = vpop.permute.xlu0 %2240  ;;  %4056 = vmatpush3.bf16.xpose.msra.mxu1 %v2332_v9 }
 0x6f2   :  { %v2250_v13 = vmul.f32 0.17677669, %v2241_v11  ;;  %4067 = vmatprep.subr.bf16.mxu1 %v5229_v0  ;;  %4073 = vmatprep.subr.bf16.mxu0 %v5229_v0  ;;  %v2280_v14 = vpack.c.bf16 %v2261_v10, %v2261_v10 }
 0x6f4   :  { %v2274_v44 = vpack.c.bf16 %v2250_v13, %v2250_v13  ;;  %v2424_v19 = vsel %vm2281_vm2, %v2280_v14, 0 }
 0x6f5   :  { %v2244_v15 = vpop.permute.xlu0 %2243  ;;  %v2247_v18 = vpop.permute.xlu1 %2246 }
 0x6f6   :  { %v2251_v16 = vmul.f32 0.17677669, %v2244_v15  ;;  %v2252_v21 = vmul.f32 0.17677669, %v2247_v18 }
 0x6f8   :  { %v2275_v20 = vpack.c.bf16 %v2251_v16, %v2251_v16  ;;  %4058 = vmatmul.mubr.msk.bf16.vlgmr.msra.gmra.mrb[20].mxu1 %vm2281_vm2, %v2274_v44  ;;  %v2276_v23 = vpack.c.bf16 %v2252_v21, %v2252_v21 }
 0x6f9   :  { %4068 = vmatpush3.bf16.xpose.msra.mxu1 %v2424_v19  ;;  %4069 = vmatprep.mubr.msk.bf16.mxu1 %vm5230_vm0, %v5229_v0 }
 0x6fa   :  { %4064 = vmatmul.mubr.msk.bf16.vlgmr.msra.gmra.mrb[20].mxu0 %vm2281_vm2, %v2275_v20  ;;  %4079 = vmatprep.subr.bf16.mxu1 %v5229_v0 }
 0x6fb   :  { %4074 = vmatpush3.bf16.msra.mxu0 %v2524_v22  ;;  %4075 = vmatprep.mubr.msk.bf16.mxu0 %vm5230_vm0, %v5229_v0 }
 0x6fc   :  { %4085 = vmatprep.subr.bf16.mxu0 %v5229_v0 }
 0x700   :  { %4070 = vmatmul.mubr.msk.bf16.vlgmr.msra.gmra.mrb[24].mxu1 %vm2281_vm2, %v2276_v23 }
 0x701   :  { %4081 = vmatprep.mubr.msk.bf16.mxu1 %vm5230_vm0, %v5229_v0 }
 0x758   :  { %v2322_v24 = vpop.f32.mrb[16].mxu1 }
 0x759   :  { %v4053_v26 = vpop.f32.mrb[17].mxu1  ;;  %v2467_v28 = vsel %vm2466_vm4, %v2322_v24, -inf }
 0x75a   :  { %2468 = vmax.xlane.f32.xlu0 %v2467_v28  ;;  %v2325_v29 = vpop.f32.mrb[18].mxu1 }
 0x75b   :  { %v4054_v30 = vpop.f32.mrb[19].mxu1  ;;  %v4537_v29 = vld [vmem:[#allocation17] sm:$0xff]  }
 0x75c   :  { %v4538_v30 = vld [vmem:[#allocation17 + $0x8] sm:$0xff]  }
 0x7cb   :  { %v2368_v31 = vpop.f32.mrb[20].mxu1 }
 0x7cc   :  { %v4059_v33 = vpop.f32.mrb[21].mxu1  ;;  %v2470_v34 = vsel %vm2466_vm4, %v2368_v31, -inf }
 0x7cd   :  { %v2414_v35 = vpop.f32.mrb[20].mxu0  ;;  %2471 = vmax.xlane.f32.xlu1 %v2470_v34  ;;  %v2371_v36 = vpop.f32.mrb[22].mxu1  ;;  %v4540_v33 = vld [vmem:[#allocation17 + $0x18] sm:$0xff]  }
 0x7ce   :  { %v4060_v37 = vpop.f32.mrb[23].mxu1  ;;  %v4065_v38 = vpop.f32.mrb[21].mxu0  ;;  %v2473_v39 = vsel %vm2466_vm4, %v2414_v35, -inf }
 0x7cf   :  { %v2417_v40 = vpop.f32.mrb[22].mxu0  ;;  %2474 = vmax.xlane.f32.xlu0 %v2473_v39  ;;  %v4541_v37 = vld [vmem:[#allocation17 + $0x20] sm:$0xff]   ;;  %v4542_v38 = vld [vmem:[#allocation17 + $0x28] sm:$0xff]   ;;  %v4543_v39 = vld [vmem:[#allocation17 + $0x30] sm:$0xff]  }
 0x7d0   :  { %v4066_v41 = vpop.f32.mrb[23].mxu0  ;;  %v4544_v40 = vld [vmem:[#allocation17 + $0x38] sm:$0xff]  }
 0x7d1   :  { %v4545_v41 = vld [vmem:[#allocation20 + $0x40] sm:$0xff]  }
 0x7d3   :  { %v2460_v32 = vpop.f32.mrb[24].mxu1 }
 0x7d4   :  { %v4071_v42 = vpop.f32.mrb[25].mxu1  ;;  %v2476_v43 = vsel %vm2466_vm4, %v2460_v32, -inf }
 0x7d5   :  { %2477 = vmax.xlane.f32.xlu0 %v2476_v43  ;;  %v2463_v45 = vpop.f32.mrb[26].mxu1  ;;  %v4547_v42 = vld [vmem:[#allocation20 + $0x48] sm:$0xff]  }
 0x7d6   :  { %v4072_v46 = vpop.f32.mrb[27].mxu1 }
 0x7de   :  { %2264 = vrot.lane.b32.xlu1 %v5706_v12, %s5232_s20 }
 0x7e7   :  { %v2469_v47 = vpop.xlane.xlu0 %2468 }
 0x7e8   :  { %v2479_v48 = vsub.f32 %v2322_v24, %v2469_v47  ;;  %v4548_v47 = vld [vmem:[#allocation20 + $0x8] sm:$0xff]  }
 0x7ea   :  { %v2483_v49 = vmul.f32 1.442695, %v2479_v48 }
 0x7ec   :  { %4649 = vpow2.f32 %v2483_v49 }
 0x7f6   :  { %v4650_v51 = vpop.eup %4649 }
 0x7f7   :  { %v2491_v52 = vsel %vm2466_vm4, %v4650_v51, 0.0 }
 0x802   :  { %2492 = vadd.xlane.f32.xlu1 %v2491_v52 }
 0x85a   :  { %v2472_v53 = vpop.xlane.xlu1 %2471 }
 0x85b   :  { %v2480_v54 = vsub.f32 %v2368_v31, %v2472_v53  ;;  %v4539_v31 = vld [vmem:[#allocation17 + $0x10] sm:$0xff]  }
 0x85c   :  { %v2475_v55 = vpop.xlane.xlu0 %2474 }
 0x85d   :  { %v2485_v56 = vmul.f32 1.442695, %v2480_v54  ;;  %v2481_v57 = vsub.f32 %v2414_v35, %v2475_v55  ;;  %v4550_v55 = vld [vmem:[#allocation20 + $0x10] sm:$0xff]  }
 0x85e   :  { %v2265_v58 = vpop.permute.xlu1 %2264 }
 0x85f   :  { %4651 = vpow2.f32 %v2485_v56  ;;  %v2487_v59 = vmul.f32 1.442695, %v2481_v57  ;;  %v2516_v60 = vpack.c.bf16 %v2265_v58, %v2265_v58  ;;  %v4551_v56 = vld [vmem:[#allocation20 + $0x58] sm:$0xff]  }
 0x861   :  { %4653 = vpow2.f32 %v2487_v59  ;;  %v2570_v61 = vsel %vm2522_vm3, %v2516_v60, 0  ;;  %v4552_v60 = vld [vmem:[#allocation20 + $0x18] sm:$0xff]  }
 0x862   :  { %4080 = vmatpush3.bf16.msra.mxu1 %v2570_v61  ;;  %v2478_v62 = vpop.xlane.xlu0 %2477 }
 0x863   :  { %v2482_v63 = vsub.f32 %v2460_v32, %v2478_v62  ;;  %4091 = vmatprep.subr.bf16.mxu1 %v5229_v0  ;;  %v4546_v32 = vld [vmem:[#allocation20] sm:$0xff]  }
 0x864   :  { %v4553_v62 = vld [vmem:[#allocation20 + $0x60] sm:$0xff]  }
 0x865   :  { %v2489_v1 = vmul.f32 1.442695, %v2482_v63  ;;  %v4554_v63 = vld [vmem:[#allocation20 + $0x20] sm:$0xff]  }
 0x867   :  { %4655 = vpow2.f32 %v2489_v1  ;;  %v4555_v1 = vld [vmem:[#allocation20 + $0x68] sm:$0xff]  }
 0x869   :  { %v4652_v27 = vpop.eup %4651 }
 0x86a   :  { %v2494_v25 = vsel %vm2466_vm4, %v4652_v27, 0.0 }
 0x86b   :  { %v4654_v2 = vpop.eup %4653  ;;  %2495 = vadd.xlane.f32.xlu0 %v2494_v25  ;;  %v4557_v25 = vld [vmem:[#allocation20 + $0x70] sm:$0xff]  }
 0x86c   :  { %v2497_v3 = vsel %vm2466_vm4, %v4654_v2, 0.0 }
 0x86d   :  { %2498 = vadd.xlane.f32.xlu1 %v2497_v3 }
 0x871   :  { %v4656_v4 = vpop.eup %4655 }
 0x872   :  { %v2500_v5 = vsel %vm2466_vm4, %v4656_v4, 0.0 }
 0x873   :  { %2501 = vadd.xlane.f32.xlu0 %v2500_v5 }
 0x87e   :  { %2270 = vrot.lane.b32.xlu1 %v5706_v12, %s5233_s1 }
 0x889   :  { %2267 = vrot.lane.b32.xlu0 %v5706_v12, %s5933_s5 }
 0x88f   :  { %v2493_v6 = vpop.xlane.xlu1 %2492 }
 0x890   :  { %4657 = vrcp.f32 %v2493_v6 }
 0x89a   :  { %v4658_v7 = vpop.eup %4657 }
 0x89b   :  { %v2507_v8 = vmul.f32 %v4658_v7, %v4650_v51  ;;  %v4549_v51 = vld [vmem:[#allocation20 + $0x50] sm:$0xff]  }
 0x89d   :  { %v2511_v9 = vpack.c.bf16 %v2507_v8, %v2507_v8 }
 0x89f   :  { %4076 = vmatmul.mubr.msk.bf16.vlgmr.msra.gmra.mrb[24].mxu0 %vm2466_vm4, %v2511_v9 }
 0x8a0   :  { %4087 = vmatprep.mubr.msk.bf16.mxu0 %vm5230_vm0, %v5229_v0 }
 0x8f8   :  { %v2496_v10 = vpop.xlane.xlu0 %2495 }
 0x8f9   :  { %4659 = vrcp.f32 %v2496_v10  ;;  %v4559_v10 = vld [vmem:[#allocation20 + $0x78] sm:$0xff]  }
 0x8fa   :  { %v2499_v11 = vpop.xlane.xlu1 %2498 }
 0x8fb   :  { %4661 = vrcp.f32 %v2499_v11  ;;  %v4560_v11 = vld [vmem:[#allocation20 + $0x38] sm:$0xff]  }
 0x8fe   :  { %v2271_v14 = vpop.permute.xlu1 %2270 }
 0x8ff   :  { %v2518_v12 = vpack.c.bf16 %v2271_v14, %v2271_v14  ;;  %v4563_v14 = vld [vmem:[%s5886_s13 + $0x8] sm:$0xff]  }
 0x900   :  { %v2502_v13 = vpop.xlane.xlu0 %2501 }
 0x901   :  { %4663 = vrcp.f32 %v2502_v13  ;;  %v2662_v22 = vsel %vm2522_vm3, %v2518_v12, 0  ;;  %v4561_v13 = vld [vmem:[%s5886_s13] sm:$0xff]  }
 0x902   :  { %v4569_v12 = vld [vmem:[%s5886_s13 + $0x20] sm:$0xff]  }
 0x903   :  { %v4660_v15 = vpop.eup %4659 }
 0x904   :  { %v2508_v44 = vmul.f32 %v4660_v15, %v4652_v27  ;;  %v2268_v16 = vpop.permute.xlu0 %2267  ;;  %v4556_v27 = vld [vmem:[#allocation20 + $0x28] sm:$0xff]  }
 0x905   :  { %v4662_v17 = vpop.eup %4661  ;;  %v2517_v18 = vpack.c.bf16 %v2268_v16, %v2268_v16  ;;  %v4565_v15 = vld [vmem:[%s5886_s13 + $0x10] sm:$0xff]   ;;  %v4571_v16 = vld [vmem:[%s5886_s13 + $0x28] sm:$0xff]  }
 0x906   :  { %v2509_v19 = vmul.f32 %v4662_v17, %v4654_v2  ;;  %v2512_v20 = vpack.c.bf16 %v2508_v44, %v2508_v44  ;;  %v4558_v2 = vld [vmem:[#allocation20 + $0x30] sm:$0xff]   ;;  %v3836_v17 = vld [vmem:[#allocation19] ss:$0 sm:$0xff] }
 0x907   :  { %v2616_v21 = vsel %vm2522_vm3, %v2517_v18, 0  ;;  %v4567_v44 = vld [vmem:[%s5886_s13 + $0x18] sm:$0xff]  }
 0x908   :  { %4082 = vmatmul.mubr.msk.bf16.vlgmr.msra.gmra.mrb[28].mxu1 %vm2466_vm4, %v2512_v20  ;;  %4086 = vmatpush3.bf16.msra.mxu0 %v2616_v21  ;;  %v2513_v23 = vpack.c.bf16 %v2509_v19, %v2509_v19 }
 0x909   :  { %4092 = vmatpush3.bf16.msra.mxu1 %v2662_v22  ;;  %4093 = vmatprep.mubr.msk.bf16.mxu1 %vm5230_vm0, %v5229_v0  ;;  %v4562_v22 = vld [vmem:[#allocation25] sm:$0xff]  }
 0x90a   :  { %4097 = vmatprep.subr.bf16.mxu0 %v5229_v0  ;;  %3946 = vmatprep.subr.bf16.mxu1 %v4545_v41 }
 0x90b   :  { %v4664_v24 = vpop.eup %4663  ;;  %4088 = vmatmul.mubr.msk.bf16.vlgmr.msra.gmra.mrb[28].mxu0 %vm2466_vm4, %v2513_v23 }
 0x90c   :  { %v2510_v26 = vmul.f32 %v4664_v24, %v4656_v4  ;;  %4113 = vmatprep.mubr.msk.bf16.mxu0 %vm5230_vm0, %v5229_v0  ;;  %4098 = vmatpush3.bf16.msra.mxu0 %v4537_v29  ;;  %v4568_v29 = vld [vmem:[#allocation25 + $0x18] sm:$0xff]  }
 0x90d   :  { %4099 = vmatprep.subr.bf16.mxu0 %v5229_v0 }
 0x90e   :  { %v2514_v28 = vpack.c.bf16 %v2510_v26, %v2510_v26  ;;  %v4564_v26 = vld [vmem:[#allocation25 + $0x8] sm:$0xff]  }
 0x910   :  { %4094 = vmatmul.mubr.msk.bf16.vlgmr.msra.gmra.mrb[32].mxu1 %vm2466_vm4, %v2514_v28  ;;  %4100 = vmatpush3.bf16.msra.mxu0 %v4538_v30  ;;  %v4566_v28 = vld [vmem:[#allocation25 + $0x10] sm:$0xff]   ;;  %v4570_v30 = vld [vmem:[#allocation25 + $0x20] sm:$0xff]  }
 0x911   :  { %3000 = vmatprep.mubr.bf16.mxu1 %v5682_v50  ;;  %4101 = vmatprep.subr.bf16.mxu0 %v5229_v0 }
 0x912   :  { %3947 = vmatpush3.bf16.msra.mxu1 %v4546_v32 }
 0x913   :  { %3948 = vmatprep.subr.bf16.mxu1 %v4547_v42 }
 0x914   :  { %4102 = vmatpush3.bf16.msra.mxu0 %v4539_v31  ;;  %v4572_v31 = vld [vmem:[#allocation25 + $0x28] sm:$0xff]  }
 0x915   :  { %4103 = vmatprep.subr.bf16.mxu0 %v5229_v0 }
 0x916   :  { %3949 = vmatpush3.bf16.msra.mxu1 %v4548_v47  ;;  %v4579_v47 = vld [vmem:[#allocation28 + $0x48] sm:$0xff]  }
 0x917   :  { %3950 = vmatprep.subr.bf16.mxu1 %v4549_v51  ;;  %v4582_v51 = vld [vmem:[#allocation28 + $0x10] sm:$0xff]  }
 0x918   :  { %4104 = vmatpush3.bf16.msra.mxu0 %v4540_v33  ;;  %v4573_v33 = vld [vmem:[%s5886_s13 + $0x30] sm:$0xff]  }
 0x919   :  { %4105 = vmatprep.subr.bf16.mxu0 %v5229_v0 }
 0x91a   :  { %3951 = vmatpush3.bf16.msra.mxu1 %v4550_v55  ;;  %v4586_v55 = vld [vmem:[#allocation28 + $0x20] sm:$0xff]  }
 0x91b   :  { %3952 = vmatprep.subr.bf16.mxu1 %v4551_v56  ;;  %v4587_v56 = vld [vmem:[#allocation28 + $0x68] sm:$0xff]  }
 0x91c   :  { %4106 = vmatpush3.bf16.msra.mxu0 %v4541_v37  ;;  %v4577_v37 = vld [vmem:[#allocation28 + $0x40] sm:$0xff]  }
 0x91d   :  { %4107 = vmatprep.subr.bf16.mxu0 %v5229_v0 }
 0x91e   :  { %3953 = vmatpush3.bf16.msra.mxu1 %v4552_v60  ;;  %v4591_v60 = vld [vmem:[#allocation28 + $0x78] sm:$0xff]  }
 0x91f   :  { %3954 = vmatprep.subr.bf16.mxu1 %v4553_v62  ;;  %v4593_v62 = vld [vmem:[#allocation31] sm:$0xff]  }
 0x920   :  { %4108 = vmatpush3.bf16.msra.mxu0 %v4542_v38  ;;  %v3845_v38 = vld [vmem:[#allocation22] ss:$0 sm:$0xff] }
 0x921   :  { %4109 = vmatprep.subr.bf16.mxu0 %v5229_v0 }
 0x922   :  { %3955 = vmatpush3.bf16.msra.mxu1 %v4554_v63  ;;  %v4594_v63 = vld [vmem:[#allocation31 + $0x8] sm:$0xff]  }
 0x923   :  { %3956 = vmatprep.subr.bf16.mxu1 %v4555_v1  ;;  %v4595_v1 = vld [vmem:[#allocation31 + $0x10] sm:$0xff]  }
 0x924   :  { %4110 = vmatpush3.bf16.msra.mxu0 %v4543_v39 }
 0x925   :  { %4111 = vmatprep.subr.bf16.mxu0 %v5229_v0 }
 0x926   :  { %3957 = vmatpush3.bf16.msra.mxu1 %v4556_v27  ;;  %v4596_v27 = vld [vmem:[#allocation31 + $0x18] sm:$0xff]  }
 0x927   :  { %3958 = vmatprep.subr.bf16.mxu1 %v4557_v25  ;;  %v4597_v25 = vld [vmem:[#allocation31 + $0x20] sm:$0xff]  }
 0x928   :  { %4112 = vmatpush3.bf16.msra.mxu0 %v4544_v40 }
 0x929   :  { %4117 = vmatprep.subr.bf16.mxu0 %v5229_v0 }
 0x92a   :  { %3959 = vmatpush3.bf16.msra.mxu1 %v4558_v2  ;;  %v4598_v2 = vld [vmem:[#allocation31 + $0x28] sm:$0xff]  }
 0x92b   :  { %3960 = vmatprep.subr.bf16.mxu1 %v4559_v10 }
 0x92e   :  { %3961 = vmatpush3.bf16.msra.mxu1 %v4560_v11 }
 0x92f   :  { %4137 = vmatprep.subr.bf16.mxu1 %v5229_v0 }
 0x972   :  { %v5758_v34 = vpop.f32.mrb[24].mxu0 }
 0x973   :  { %v4077_v35 = vpop.f32.mrb[25].mxu0 }
 0x974   :  { %v2563_v36 = vpop.f32.mrb[26].mxu0  ;;  %v4575_v35 = vld [vmem:[%s5886_s13 + $0x38] sm:$0xff]  }
 0x975   :  { %v4078_v50 = vpop.f32.mrb[27].mxu0  ;;  %v4576_v36 = vld [vmem:[#allocation25 + $0x38] sm:$0xff]  }
 0x9db   :  { %v2606_v43 = vpop.f32.mrb[28].mxu1 }
 0x9dc   :  { %2705 = vrot.lane.b32.xlu1 %v2606_v43, %s5233_s1  ;;  %v4083_v45 = vpop.f32.mrb[29].mxu1 }
 0x9dd   :  { %v2609_v46 = vpop.f32.mrb[30].mxu1  ;;  %v4578_v45 = vld [vmem:[#allocation28] sm:$0xff]  }
 0x9de   :  { %v4084_v48 = vpop.f32.mrb[31].mxu1  ;;  %v2652_v49 = vpop.f32.mrb[28].mxu0 }
 0x9df   :  { %2709 = vrot.lane.b32.xlu0 %v2652_v49, %s5933_s5  ;;  %v4089_v52 = vpop.f32.mrb[29].mxu0  ;;  %v4580_v48 = vld [vmem:[#allocation28 + $0x8] sm:$0xff]   ;;  %v4581_v49 = vld [vmem:[#allocation28 + $0x50] sm:$0xff]  }
 0x9e0   :  { %v2655_v53 = vpop.f32.mrb[30].mxu0  ;;  %v4583_v52 = vld [vmem:[#allocation28 + $0x58] sm:$0xff]  }
 0x9e1   :  { %v4090_v54 = vpop.f32.mrb[31].mxu0  ;;  %v4584_v53 = vld [vmem:[#allocation28 + $0x18] sm:$0xff]  }
 0x9e2   :  { %v4585_v54 = vld [vmem:[#allocation28 + $0x60] sm:$0xff]  }
 0x9e3   :  { %v2698_v57 = vpop.f32.mrb[32].mxu1 }
 0x9e4   :  { %2713 = vrot.lane.b32.xlu1 %v2698_v57, %s5232_s20  ;;  %v4095_v58 = vpop.f32.mrb[33].mxu1  ;;  %v4588_v57 = vld [vmem:[#allocation28 + $0x28] sm:$0xff]  }
 0x9e5   :  { %v2701_v59 = vpop.f32.mrb[34].mxu1  ;;  %v4589_v58 = vld [vmem:[#allocation28 + $0x70] sm:$0xff]  }
 0x9e6   :  { %v4096_v61 = vpop.f32.mrb[35].mxu1  ;;  %v4590_v59 = vld [vmem:[#allocation28 + $0x30] sm:$0xff]  }
 0x9e7   :  { %v4592_v61 = vld [vmem:[#allocation28 + $0x38] sm:$0xff]  }
 0xa4e   :  { %v2706_v3 = vpop.permute.xlu1 %2705 }
 0xa4f   :  { %v2716_v5 = vsel %vm2281_vm2, %v5758_v34, %v2706_v3  ;;  %v4574_v34 = vld [vmem:[#allocation25 + $0x30] sm:$0xff]   ;;  %v3862_v3 = vld [vmem:[#allocation23] ss:$0 sm:$0xff] }
 0xa51   :  { %v2710_v4 = vpop.permute.xlu0 %2709 }
 0xa52   :  { %v2717_v6 = vsel %vm369_vm1, %v2716_v5, %v2710_v4  ;;  %v3871_v4 = vld [vmem:[#allocation26] ss:$0 sm:$0xff] }
 0xa56   :  { %v2714_v7 = vpop.permute.xlu1 %2713 }
 0xa57   :  { %v2719_v8 = vsel %vm2718_vm5, %v2717_v6, %v2714_v7 }
 0xa58   :  { %v2736_v9 = vpack.c.bf16 %v2719_v8, %v2719_v8 }
 0xa5a   :  { %4114 = vmatmul.mubr.bf16.vlgmr.msra.gmra.mrb[32].mxu0 %v2736_v9 }
 0xa5b   :  { %4133 = vmatprep.mubr.msk.bf16.mxu0 %vm5230_vm0, %v5229_v0  ;;  %4118 = vmatpush3.bf16.msra.mxu0 %v4561_v13 }
 0xa5c   :  { %4119 = vmatprep.subr.bf16.mxu0 %v5229_v0 }
 0xa5f   :  { %4120 = vmatpush3.bf16.msra.mxu0 %v4563_v14 }
 0xa60   :  { %4121 = vmatprep.subr.bf16.mxu0 %v5229_v0 }
 0xa63   :  { %4122 = vmatpush3.bf16.msra.mxu0 %v4565_v15 }
 0xa64   :  { %4123 = vmatprep.subr.bf16.mxu0 %v5229_v0 }
 0xa67   :  { %4124 = vmatpush3.bf16.msra.mxu0 %v4567_v44 }
 0xa68   :  { %4125 = vmatprep.subr.bf16.mxu0 %v5229_v0 }
 0xa6b   :  { %4126 = vmatpush3.bf16.msra.mxu0 %v4569_v12 }
 0xa6c   :  { %4127 = vmatprep.subr.bf16.mxu0 %v5229_v0 }
 0xa6f   :  { %4128 = vmatpush3.bf16.msra.mxu0 %v4571_v16 }
 0xa70   :  { %4129 = vmatprep.subr.bf16.mxu0 %v5229_v0 }
 0xa73   :  { %4130 = vmatpush3.bf16.msra.mxu0 %v4573_v33 }
 0xa74   :  { %4131 = vmatprep.subr.bf16.mxu0 %v5229_v0 }
 0xa77   :  { %4132 = vmatpush3.bf16.msra.mxu0 %v4575_v35 }
 0xa78   :  { %3986 = vmatprep.subr.bf16.mxu0 %v4577_v37 }
 0xb2d   :  { %v2826_v18 = vpop.f32.mrb[32].mxu0 }
 0xb2e   :  { %v2827_v19 = vadd.f32 %v3836_v17, %v2826_v18  ;;  %v4115_v20 = vpop.f32.mrb[33].mxu0 }
 0xb2f   :  { %v2829_v21 = vpop.f32.mrb[34].mxu0 }
 0xb30   :  { %v5798_v23 = vpack.c.bf16 %v2827_v19, %v2827_v19  ;;  %v4116_v24 = vpop.f32.mrb[35].mxu0 }
 0xb32   :  { %3001 = vmatmul.mubr.bf16.vlgmr.msra.gmra.mrb[36].mxu1 %v5798_v23 }
 0xb33   :  { %4138 = vmatpush3.bf16.msra.mxu1 %v4562_v22  ;;  %4153 = vmatprep.mubr.msk.bf16.mxu1 %vm5230_vm0, %v5229_v0 }
 0xb34   :  { %4139 = vmatprep.subr.bf16.mxu1 %v5229_v0 }
 0xb37   :  { %4140 = vmatpush3.bf16.msra.mxu1 %v4564_v26 }
 0xb38   :  { %4141 = vmatprep.subr.bf16.mxu1 %v5229_v0 }
 0xb3b   :  { %4142 = vmatpush3.bf16.msra.mxu1 %v4566_v28 }
 0xb3c   :  { %4143 = vmatprep.subr.bf16.mxu1 %v5229_v0 }
 0xb3f   :  { %4144 = vmatpush3.bf16.msra.mxu1 %v4568_v29  ;;  %v4599_v29 = vld [vmem:[#allocation31 + $0x30] sm:$0xff]  }
 0xb40   :  { %4145 = vmatprep.subr.bf16.mxu1 %v5229_v0 }
 0xb43   :  { %4146 = vmatpush3.bf16.msra.mxu1 %v4570_v30 }
 0xb44   :  { %4147 = vmatprep.subr.bf16.mxu1 %v5229_v0 }
 0xb47   :  { %4148 = vmatpush3.bf16.msra.mxu1 %v4572_v31  ;;  %v3881_v31 = vld [vmem:[#allocation29] ss:$0 sm:$0xff] }
 0xb48   :  { %4149 = vmatprep.subr.bf16.mxu1 %v5229_v0 }
 0xb4b   :  { %4150 = vmatpush3.bf16.msra.mxu1 %v4574_v34 }
 0xb4c   :  { %4151 = vmatprep.subr.bf16.mxu1 %v5229_v0 }
 0xb4f   :  { %4152 = vmatpush3.bf16.msra.mxu1 %v4576_v36 }
 0xb50   :  { %4157 = vmatprep.subr.bf16.mxu1 %v5229_v0 }
 0xc05   :  { %v3962_v50 = vpop.f32.mrb[36].mxu1 }
 0xc06   :  { %v3963_v39 = vpop.f32.mrb[37].mxu1 }
 0xc07   :  { %v3964_v40 = vadd.f32 %v3963_v39, %v3962_v50  ;;  %v3965_v41 = vpop.f32.mrb[38].mxu1 }
 0xc08   :  { %v3966_v32 = vpop.f32.mrb[39].mxu1 }
 0xc09   :  { %v3003_v42 = vadd.f32 %v3964_v40, %v3845_v38 }
 0xc0b   :  { %v3008_v43 = vmax.f32 %v3003_v42, 0.0 }
 0xc0d   :  { %v3025_v46 = vpack.c.bf16 %v3008_v43, %v3008_v43 }
 0xc0f   :  { %4134 = vmatmul.mubr.bf16.vlgmr.msra.gmra.mrb[36].mxu0 %v3025_v46  ;;  %4154 = vmatmul.mubr.bf16.vlgmr.msra.gmra.mrb[40].mxu1 %v3025_v46 }
 0xc10   :  { %3987 = vmatpush3.bf16.msra.mxu0 %v4578_v45  ;;  %4173 = vmatprep.mubr.msk.bf16.mxu1 %vm5230_vm0, %v5229_v0 }
 0xc11   :  { %3988 = vmatprep.subr.bf16.mxu0 %v4579_v47  ;;  %4158 = vmatpush3.bf16.msra.mxu1 %v4593_v62 }
 0xc12   :  { %4159 = vmatprep.subr.bf16.mxu1 %v5229_v0 }
 0xc14   :  { %3989 = vmatpush3.bf16.msra.mxu0 %v4580_v48 }
 0xc15   :  { %3990 = vmatprep.subr.bf16.mxu0 %v4581_v49  ;;  %4160 = vmatpush3.bf16.msra.mxu1 %v4594_v63 }
 0xc16   :  { %4161 = vmatprep.subr.bf16.mxu1 %v5229_v0 }
 0xc18   :  { %3991 = vmatpush3.bf16.msra.mxu0 %v4582_v51 }
 0xc19   :  { %3992 = vmatprep.subr.bf16.mxu0 %v4583_v52  ;;  %4162 = vmatpush3.bf16.msra.mxu1 %v4595_v1 }
 0xc1a   :  { %4163 = vmatprep.subr.bf16.mxu1 %v5229_v0 }
 0xc1c   :  { %3993 = vmatpush3.bf16.msra.mxu0 %v4584_v53 }
 0xc1d   :  { %3994 = vmatprep.subr.bf16.mxu0 %v4585_v54  ;;  %4164 = vmatpush3.bf16.msra.mxu1 %v4596_v27 }
 0xc1e   :  { %4165 = vmatprep.subr.bf16.mxu1 %v5229_v0 }
 0xc20   :  { %3995 = vmatpush3.bf16.msra.mxu0 %v4586_v55 }
 0xc21   :  { %3996 = vmatprep.subr.bf16.mxu0 %v4587_v56  ;;  %4166 = vmatpush3.bf16.msra.mxu1 %v4597_v25 }
 0xc22   :  { %4167 = vmatprep.subr.bf16.mxu1 %v5229_v0 }
 0xc24   :  { %3997 = vmatpush3.bf16.msra.mxu0 %v4588_v57 }
 0xc25   :  { %3998 = vmatprep.subr.bf16.mxu0 %v4589_v58  ;;  %4168 = vmatpush3.bf16.msra.mxu1 %v4598_v2 }
 0xc26   :  { %4169 = vmatprep.subr.bf16.mxu1 %v5229_v0 }
 0xc28   :  { %3999 = vmatpush3.bf16.msra.mxu0 %v4590_v59 }
 0xc29   :  { %4000 = vmatprep.subr.bf16.mxu0 %v4591_v60  ;;  %4170 = vmatpush3.bf16.msra.mxu1 %v4599_v29 }
 0xc2a   :  { %4171 = vmatprep.subr.bf16.mxu1 %v5229_v0 }
 0xc2c   :  { %4001 = vmatpush3.bf16.msra.mxu0 %v4592_v61 }
 0xce2   :  { %v3115_v5 = vpop.f32.mrb[36].mxu0  ;;  %v3226_v6 = vpop.f32.mrb[40].mxu1 }
 0xce3   :  { %v3116_v7 = vadd.f32 %v3862_v3, %v3115_v5  ;;  %v3227_v8 = vadd.f32 %v3871_v4, %v3226_v6  ;;  %v4135_v9 = vpop.f32.mrb[37].mxu0  ;;  %v4155_v10 = vpop.f32.mrb[41].mxu1 }
 0xce4   :  { %v3118_v11 = vpop.f32.mrb[38].mxu0  ;;  %v3229_v13 = vpop.f32.mrb[42].mxu1 }
 0xce5   :  { %v3279_v14 = vpack.c.bf16 %v3116_v7, %v3116_v7  ;;  %v3880_v15 = vmul.f32 -1.442695, %v3227_v8  ;;  %v4136_v44 = vpop.f32.mrb[39].mxu0  ;;  %v4156_v12 = vpop.f32.mrb[43].mxu1 }
 0xce7   :  { %4665 = vpow2.f32 %v3880_v15  ;;  %3415 = vmatprep.mubr.bf16.mxu0 %v3279_v14 }
 0xce8   :  { %3416 = vmatmul.mubr.bf16.vlgmr.msra.gmra.mrb[40].mxu0 %v5798_v23  ;;  %v4600_v23 = vld [vmem:[#allocation31 + $0x38] sm:$0xff]  }
 0xce9   :  { %4172 = vmatpush3.bf16.msra.mxu1 %v4600_v23 }
 0xcf1   :  { %v4666_v16 = vpop.eup %4665 }
 0xcf2   :  { %v3235_v17 = vadd.f32 1.0, %v4666_v16 }
 0xcf4   :  { %4667 = vrcp.f32 %v3235_v17 }
 0xcfe   :  { %v4668_v18 = vpop.eup %4667 }
 0xcff   :  { %v3238_v19 = vrot.slane %v4668_v18, 4 }
 0xd01   :  { %v3239_v20 = vadd.f32 %v4668_v18, %v3238_v19 }
 0xd03   :  { %v3240_v21 = vrot.slane %v3239_v20, 2 }
 0xd05   :  { %v3241_v22 = vadd.f32 %v3240_v21, %v3239_v20 }
 0xd07   :  { %v3242_v24 = vrot.slane %v3241_v22, 1 }
 0xd09   :  { %v3243_v26 = vadd.f32 %v3242_v24, %v3241_v22 }
 0xd0b   :  { %v3245_v28 = vmul.f32 0.125, %v3243_v26 }
 0xd0d   :  { %3246 = vst [vmem:[%s5897_s24] sm:$0x1] %v3245_v28  ;;  %s5109_s24 = scalar_lea.vmem %s3553_s9, 384 }
 0xd0e   :  { %p5110_p6 = scmp.ne.s32.totalorder %s3553_s9, %s5109_s24  ;;  %p5115_p8 = scmp.lt.s32.totalorder %s5109_s24, %s5109_s24 }
 0xd10   :  { %p5116_p9 = por %p5115_p8, %p5114_p7 }
 0xd12   :  { %p5117_p10 = pnand %p5116_p9, %p5110_p6 }
 0xdbb   :  { %v4002_v30 = vpop.f32.mrb[40].mxu0 }
 0xdbc   :  { %v4003_v33 = vpop.f32.mrb[41].mxu0 }
 0xdbd   :  { %v4004_v34 = vadd.f32 %v4003_v33, %v4002_v30  ;;  %v4005_v35 = vpop.f32.mrb[42].mxu0 }
 0xdbe   :  { %v4006_v36 = vpop.f32.mrb[43].mxu0 }
 0xdbf   :  { %v3418_v37 = vadd.f32 %v4004_v34, %v3881_v31 }
 0xdc1   :  { %v3423_v50 = vmax.f32 %v3418_v37, 0.0 }
 0xdc3   :  { %v3440_v38 = vpack.c.bf16 %v3423_v50, %v3423_v50 }
 0xdc5   :  { %4174 = vmatmul.mubr.bf16.vlgmr.msra.gmra.mrb[44].mxu1 %v3440_v38 }
 0xdc6   :  { %5120 = shalt.err (!%p5117_p10)
}
 0xdc7   :  { %s5121_s29 = scalar_lea.hbm %s5895_s22, 384 }
 0xdc8   :  { %p5122_p11 = scmp.ne.s32.totalorder %s5895_s22, %s5121_s29  ;;  %p5125_p12 = scmp.lt.u32.totalorder %s5121_s29, %s5895_s22 }
 0xdca   :  { %p5127_p13 = pnand %p5125_p12, %p5122_p11 }
 0xdcc   :  { %5130 = shalt.err (!%p5127_p13)
}
 0xdcd   :  { %3558 = dma.vmem_to_hbm [thread:$0]  %s3553_s9, 384, %s5895_s22, [#allocation36], %s5937_s11, %s5937_s11, %s5936_s14  }
 0xdce   :  { %s5235_s16 = smov [#allocation37]  }
 0xdcf   :  { %s3564_s2 = sshll.u32 %s5235_s16, 4  ;;  %s3565_s2 = int_to_ptr.vmem [resolvable:$true] %s3564_s2 }
 0xdd0   :  { %s5131_s18 = scalar_lea.vmem %s3565_s2, 384  ;;  %p5136_p1 = scmp.lt.s32.totalorder %s3565_s2, %s3565_s2 }
 0xdd1   :  { %p5132_p0 = scmp.ne.s32.totalorder %s3565_s2, %s5131_s18  ;;  %p5137_p2 = scmp.lt.s32.totalorder %s5131_s18, %s5131_s18 }
 0xdd3   :  { %p5138_p3 = por %p5137_p2, %p5136_p1 }
 0xdd5   :  { %p5139_p4 = pnand %p5138_p3, %p5132_p0 }
 0xdd7   :  { %5142 = shalt.err (!%p5139_p4)
}
 0xdd8   :  { %s5941_s6 = sld [smem:[#allocation61_spill]] }
 0xdde   :  { %s5143_s27 = scalar_lea.hbm %s5941_s6, 384 }
 0xddf   :  { %p5144_p5 = scmp.ne.s32.totalorder %s5941_s6, %s5143_s27  ;;  %p5147_p6 = scmp.lt.u32.totalorder %s5143_s27, %s5941_s6 }
 0xde1   :  { %p5149_p7 = pnand %p5147_p6, %p5144_p5 }
 0xde3   :  { %5152 = shalt.err (!%p5149_p7)
}
 0xde4   :  { %3570 = dma.vmem_to_hbm [thread:$0]  %s3565_s2, 384, %s5941_s6, [#allocation36], %s5937_s11, %s5937_s11, %s5936_s14   ;;  %v3898_v0 = vld [vmem:[#allocation32] ss:$0 sm:$0xff] }
 0xde5   :  { %s5236_s8 = smov [#allocation34]  }
 0xde6   :  { %s3543_s10 = sshll.u32 %s5236_s8, 4  ;;  %s3544_s10 = int_to_ptr.vmem [resolvable:$true] %s3543_s10 }
 0xde7   :  { %s5153_s13 = scalar_lea.vmem %s3544_s10, 128  ;;  %p5158_p9 = scmp.lt.s32.totalorder %s3544_s10, %s3544_s10 }
 0xde8   :  { %p5154_p8 = scmp.ne.s32.totalorder %s3544_s10, %s5153_s13  ;;  %p5159_p10 = scmp.lt.s32.totalorder %s5153_s13, %s5153_s13 }
 0xdea   :  { %p5160_p11 = por %p5159_p10, %p5158_p9 }
 0xdec   :  { %p5161_p12 = pnand %p5160_p11, %p5154_p8 }
 0xe98   :  { %v3530_v39 = vpop.f32.mrb[44].mxu1 }
 0xe99   :  { %v3531_v40 = vadd.f32 %v3898_v0, %v3530_v39  ;;  %v4175_v41 = vpop.f32.mrb[45].mxu1 }
 0xe9a   :  { %v3533_v32 = vpop.f32.mrb[46].mxu1 }
 0xe9b   :  { %3536 = vst [vmem:[#allocation34] sm:$0xff] %v3531_v40  ;;  %v4176_v42 = vpop.f32.mrb[47].mxu1 }
 0xe9c   :  { %5164 = shalt.err (!%p5161_p12)
}
 0xe9d   :  { %s5942_s14 = sld [smem:[#allocation60_spill]] }
 0xea3   :  { %s5165_s11 = scalar_lea.hbm %s5942_s14, 128 }
 0xea4   :  { %p5166_p13 = scmp.ne.s32.totalorder %s5942_s14, %s5165_s11  ;;  %p5169_p0 = scmp.lt.u32.totalorder %s5165_s11, %s5942_s14 }
 0xea6   :  { %p5171_p1 = pnand %p5169_p0, %p5166_p13 }
 0xea8   :  { %5174 = shalt.err (!%p5171_p1)
}
 0xea9   :  { %3546 = dma.vmem_to_hbm [thread:$0]  %s3544_s10, 128, %s5942_s14, [#allocation4]  }
 0xeaa   :  { %5197 = dma.done.wait [#allocation4], 128  }
 0xeab   :  { %5198 = vsyncadd [#allocation4], 4294967168 }
 0xeac   :  { %5199 = dma.done.wait [#allocation36], 768  }
 0xead   :  { %5200 = vsyncadd [#allocation36], 4294966528 }
 0xeae   :  { %3584 = vsyncpa [#allocation3], 1 }
 0xeaf   :  { %3585 = vsyncpa [#allocation6], 1 }
 0xeb0   :  { %3586 = vsyncpa [#allocation9], 1 }
 0xeb1   :  { %3587 = vsyncpa [#allocation12], 1 }
 0xeb2   :  { %3588 = vsyncpa [#allocation15], 1 }
 0xeb3   :  { %3589 = vsyncpa [#allocation18], 1 }
 0xeb4   :  { %3590 = vsyncpa [#allocation21], 1 }
 0xeb5   :  { %3591 = vsyncpa [#allocation24], 1 }
 0xeb6   :  { %3592 = vsyncpa [#allocation27], 1 }
 0xeb7   :  { %3593 = vsyncpa [#allocation30], 1 }
 0xeb8   :  { %3594 = vsyncpa [#allocation33], 1 }
 0xeb9   :  { %3595 = vsyncpa [#allocation4], 1 }
 0xeba   :  { %3596 = vsyncpa [#allocation36], 1 }

</bundles_post_ra>
